<compile_context>
chip_gen: v7x
topology: tpu7x:2x2x1
jax: 0.10.0
libtpu: 0.0.40
codegen_flags: <defaults>
</compile_context>

<pallas_src>
import functools

import jax
import jax.numpy as jnp
from jax import lax
from jax.experimental import pallas as pl
from jax.experimental.pallas import tpu as pltpu

_VMEM_LIMIT = 48 * 1024 * 1024


def _pick_tm(h, row_bytes, budget=512 * 1024, max_rows=64):
    """Largest power-of-two divisor of h whose output tile stays small."""
    tm = h
    while tm > 1 and tm % 2 == 0 and (tm > max_rows or tm * row_bytes > budget):
        tm //= 2
    return tm


# ----------------------------------------------------------------------------
# Kernels
# ----------------------------------------------------------------------------
def _convt_s2_kernel(x_ref, w_ref, b_ref, o_ref, *, tm, w_in, cout, relu,
                     out_dtype):
    """Sub-pixel stride-2 ConvTranspose2d (k=3, p=1, op=1), one row-tile.

    x_ref: (1, H+1, W+1, Cin)    padded input image (resident per batch item)
    w_ref: (4, Cin, 4*Cout)      tap-packed weights, tap t = 2*ay + ax
    b_ref: (1, 4*Cout)           f32 bias replicated over the 4 output phases
    o_ref: (1, 2*tm, W, 2*Cout)  output rows [2*i*tm, 2*(i+1)*tm); the last dim
                                 packs (rx, cout) -> free reshape to NHWC.
    """
    r0 = pl.program_id(1) * tm
    bias = b_ref[...]                                    # (1, 4*Cout) f32

    def row_body(m, carry):
        acc = jnp.zeros((w_in, 4 * cout), jnp.float32)
        for ay in range(2):
            row = x_ref[0, r0 + m + ay, :, :]            # (W+1, Cin)
            for ax in range(2):
                xs = row[ax:ax + w_in, :]                # (W, Cin)
                acc = acc + jnp.dot(xs, w_ref[2 * ay + ax],
                                    preferred_element_type=jnp.float32)
        acc = acc + bias
        if relu:
            acc = jnp.maximum(acc, 0.0)
        y = acc.astype(out_dtype)
        o_ref[0, 2 * m, :, :] = y[:, :2 * cout]          # output row 2*(r0+m)
        o_ref[0, 2 * m + 1, :, :] = y[:, 2 * cout:]      # output row 2*(r0+m)+1
        return carry

    lax.fori_loop(0, tm, row_body, 0)


def _convt_s1_kernel(x_ref, w_ref, b_ref, o_ref, *, tm, w_in, cout, relu,
                     out_dtype):
    """Stride-1 ConvTranspose2d (k=3, p=1) == 3x3 conv with flipped weights.

    x_ref: (1, H+2, W+2, Cin); w_ref: (9, Cin, Cout); b_ref: (1, Cout)
    o_ref: (1, tm, W, Cout)
    """
    r0 = pl.program_id(1) * tm
    bias = b_ref[...]                                    # (1, Cout) f32

    def row_body(m, carry):
        acc = jnp.zeros((w_in, cout), jnp.float32)
        for ay in range(3):
            row = x_ref[0, r0 + m + ay, :, :]            # (W+2, Cin)
            for ax in range(3):
                xs = row[ax:ax + w_in, :]                # (W, Cin)
                acc = acc + jnp.dot(xs, w_ref[3 * ay + ax],
                                    preferred_element_type=jnp.float32)
        acc = acc + bias
        if relu:
            acc = jnp.maximum(acc, 0.0)
        o_ref[0, m, :, :] = acc.astype(out_dtype)
        return carry

    lax.fori_loop(0, tm, row_body, 0)


# ----------------------------------------------------------------------------
# Weight packing (sub-pixel decomposition of the transposed conv)
# ----------------------------------------------------------------------------
# For stride 2, padding 1, k=3: output pixel (2*my+ry, 2*mx+rx) only receives
# contributions from input pixels (my+ay, mx+ax), ay/ax in {0,1}, with PyTorch
# kernel index k given by:  (r=0, a=0) -> 1,  (r=1, a=0) -> 2,  (r=1, a=1) -> 0,
# and no contribution for (r=0, a=1).
_KIDX = {(0, 0): 1, (1, 0): 2, (1, 1): 0}


def _pack_w_s2(w_t):
    """PyTorch ConvTranspose2d weight (Cin, Cout, 3, 3) -> (4, Cin, 4*Cout)."""
    cin, cout = w_t.shape[0], w_t.shape[1]
    zeros = jnp.zeros((cin, cout), w_t.dtype)
    taps = []
    for ay in range(2):
        for ax in range(2):
            cols = []
            for ry in range(2):
                for rx in range(2):
                    if (ry, ay) in _KIDX and (rx, ax) in _KIDX:
                        cols.append(w_t[:, :, _KIDX[(ry, ay)], _KIDX[(rx, ax)]])
                    else:
                        cols.append(zeros)
            taps.append(jnp.concatenate(cols, axis=1))   # (Cin, 4*Cout)
    return jnp.stack(taps, axis=0)                       # (4, Cin, 4*Cout)


def _pack_w_s1(w_t):
    """(Cin, Cout, 3, 3) -> (9, Cin, Cout); tap t=3*ay+ax uses w[.., 2-ay, 2-ax]."""
    return jnp.stack([w_t[:, :, 2 - ay, 2 - ax]
                      for ay in range(3) for ax in range(3)], axis=0)


# ----------------------------------------------------------------------------
# Layer drivers (thin glue: pad / cast / pack, then one pallas_call)
# ----------------------------------------------------------------------------
def _convt_s2(x, w_t, b, *, relu, compute_dtype, out_dtype):
    n, h, w, cin = x.shape
    cout = w_t.shape[1]
    xp = jnp.pad(x.astype(compute_dtype), ((0, 0), (0, 1), (0, 1), (0, 0)))
    wp = _pack_w_s2(w_t).astype(compute_dtype)           # (4, Cin, 4*Cout)
    bp = jnp.tile(b.astype(jnp.float32), 4).reshape(1, 4 * cout)
    osize = jnp.dtype(out_dtype).itemsize
    tm = _pick_tm(h, 2 * w * 2 * cout * osize)
    kernel = functools.partial(_convt_s2_kernel, tm=tm, w_in=w, cout=cout,
                               relu=relu, out_dtype=out_dtype)
    flops = 2 * n * h * w * 4 * cin * 4 * cout
    bytes_accessed = (xp.size * xp.dtype.itemsize + wp.size * wp.dtype.itemsize
                      + n * 2 * h * w * 2 * cout * osize)
    out = pl.pallas_call(
        kernel,
        out_shape=jax.ShapeDtypeStruct((n, 2 * h, w, 2 * cout), out_dtype),
        grid=(n, h // tm),
        in_specs=[
            pl.BlockSpec((1, h + 1, w + 1, cin), lambda ni, i: (ni, 0, 0, 0)),
            pl.BlockSpec((4, cin, 4 * cout), lambda ni, i: (0, 0, 0)),
            pl.BlockSpec((1, 4 * cout), lambda ni, i: (0, 0)),
        ],
        out_specs=pl.BlockSpec((1, 2 * tm, w, 2 * cout),
                               lambda ni, i: (ni, i, 0, 0)),
        compiler_params=pltpu.CompilerParams(
            dimension_semantics=("parallel", "arbitrary"),
            vmem_limit_bytes=_VMEM_LIMIT),
        cost_estimate=pl.CostEstimate(flops=flops, transcendentals=0,
                                      bytes_accessed=bytes_accessed),
    )(xp, wp, bp)
    # (N, 2H, W, 2*Cout) -> (N, 2H, 2W, Cout): free reshape (same NHWC memory).
    return out.reshape(n, 2 * h, 2 * w, cout)


def _convt_s1(x, w_t, b, *, relu, compute_dtype, out_dtype):
    n, h, w, cin = x.shape
    cout = w_t.shape[1]
    xp = jnp.pad(x.astype(compute_dtype), ((0, 0), (1, 1), (1, 1), (0, 0)))
    wp = _pack_w_s1(w_t).astype(compute_dtype)           # (9, Cin, Cout)
    bp = b.astype(jnp.float32).reshape(1, cout)
    osize = jnp.dtype(out_dtype).itemsize
    tm = _pick_tm(h, w * cout * osize)
    kernel = functools.partial(_convt_s1_kernel, tm=tm, w_in=w, cout=cout,
                               relu=relu, out_dtype=out_dtype)
    flops = 2 * n * h * w * 9 * cin * cout
    bytes_accessed = (xp.size * xp.dtype.itemsize + wp.size * wp.dtype.itemsize
                      + n * h * w * cout * osize)
    return pl.pallas_call(
        kernel,
        out_shape=jax.ShapeDtypeStruct((n, h, w, cout), out_dtype),
        grid=(n, h // tm),
        in_specs=[
            pl.BlockSpec((1, h + 2, w + 2, cin), lambda ni, i: (ni, 0, 0, 0)),
            pl.BlockSpec((9, cin, cout), lambda ni, i: (0, 0, 0)),
            pl.BlockSpec((1, cout), lambda ni, i: (0, 0)),
        ],
        out_specs=pl.BlockSpec((1, tm, w, cout), lambda ni, i: (ni, i, 0, 0)),
        compiler_params=pltpu.CompilerParams(
            dimension_semantics=("parallel", "arbitrary"),
            vmem_limit_bytes=_VMEM_LIMIT),
        cost_estimate=pl.CostEstimate(flops=flops, transcendentals=0,
                                      bytes_accessed=bytes_accessed),
    )(xp, wp, bp)


# Layer configs mirroring the PyTorch nn.Sequential:
#   ConvT(hid,64,3,2,1,op=1)+ReLU, ConvT(64,32,3,2,1,op=1)+ReLU,
#   ConvT(32,16,3,2,1,op=1)+ReLU,  ConvT(16,out,3,1,1)
_LAYER_CFG = [
    dict(stride=2, padding=1, output_padding=1, relu=True),
    dict(stride=2, padding=1, output_padding=1, relu=True),
    dict(stride=2, padding=1, output_padding=1, relu=True),
    dict(stride=1, padding=1, output_padding=0, relu=False),
]


def decoder_forward(x_nchw, params, compute_dtype=jnp.bfloat16):
    """Pallas decoder forward. x_nchw: (N, hidden, H, W) -> (N, out_ch, 8H, 8W)."""
    x = jnp.transpose(x_nchw, (0, 2, 3, 1))              # NCHW -> NHWC
    for li, ((w_t, b), cfg) in enumerate(zip(params, _LAYER_CFG)):
        last = li == len(params) - 1
        out_dtype = jnp.float32 if last else compute_dtype
        if cfg["stride"] == 2:
            x = _convt_s2(x, w_t, b, relu=cfg["relu"],
                          compute_dtype=compute_dtype, out_dtype=out_dtype)
        else:
            x = _convt_s1(x, w_t, b, relu=cfg["relu"],
                          compute_dtype=compute_dtype, out_dtype=out_dtype)
    return jnp.transpose(x, (0, 3, 1, 2))                # NHWC -> NCHW


# ----------------------------------------------------------------------------
# Pure-JAX reference (lax.conv_general_dilated), matching precision policy
# ----------------------------------------------------------------------------
def decoder_reference(x_nchw, params, compute_dtype=jnp.float32):
    x = jnp.transpose(x_nchw, (0, 2, 3, 1))
    for li, ((w_t, b), cfg) in enumerate(zip(params, _LAYER_CFG)):
        last = li == len(params) - 1
        w_conv = jnp.transpose(w_t[:, :, ::-1, ::-1], (2, 3, 0, 1))  # HWIO
        lo = 2 - cfg["padding"]
        hi = lo + cfg["output_padding"]
        y = lax.conv_general_dilated(
            x.astype(compute_dtype), w_conv.astype(compute_dtype),
            window_strides=(1, 1), padding=((lo, hi), (lo, hi)),
            lhs_dilation=(cfg["stride"],) * 2, rhs_dilation=(1, 1),
            dimension_numbers=("NHWC", "HWIO", "NHWC"),
            preferred_element_type=jnp.float32)
        y = y + b[None, None, None, :].astype(jnp.float32)
        if cfg["relu"]:
            y = jnp.maximum(y, 0.0)
        x = y.astype(jnp.float32 if last else compute_dtype)
    return jnp.transpose(x, (0, 3, 1, 2)).astype(jnp.float32)


# ----------------------------------------------------------------------------
# Deterministic parameter init (PyTorch ConvTranspose2d layout: Cin, Cout, 3, 3)
# ----------------------------------------------------------------------------
def init_params(key, hidden_channels, out_channels):
    chans = [hidden_channels, 64, 32, 16, out_channels]
    params = []
    for i in range(4):
        cin, cout = chans[i], chans[i + 1]
        key, kw, kb = jax.random.split(key, 3)
        bound = 1.0 / jnp.sqrt(cin * 9.0)
        w = jax.random.uniform(kw, (cin, cout, 3, 3), jnp.float32, -bound, bound)
        b = jax.random.uniform(kb, (cout,), jnp.float32, -bound, bound)
        params.append((w, b))
    return params


if __name__ == "__main__":
    hidden_channels = 128   # module default
    out_channels = 3
    N, H, W = 2, 16, 16     # small latent; output is (N, 3, 128, 128)

    key = jax.random.PRNGKey(0)
    key, kx = jax.random.split(key)
    params = init_params(key, hidden_channels, out_channels)
    x = jax.random.normal(kx, (N, hidden_channels, H, W), jnp.float32)

    # 1) Strict correctness: float32 compute path vs. float32 lax reference.
    fwd_f32 = jax.jit(functools.partial(decoder_forward,
                                        compute_dtype=jnp.float32))
    out_f32 = jax.block_until_ready(fwd_f32(x, params))
    ref_f32 = jax.block_until_ready(decoder_reference(x, params, jnp.float32))
    assert out_f32.shape == (N, out_channels, 8 * H, 8 * W), out_f32.shape
    err_f32 = float(jnp.max(jnp.abs(out_f32 - ref_f32)))
    assert jnp.allclose(out_f32, ref_f32, atol=5e-4, rtol=5e-4), err_f32

    # 2) Fast path: bf16 operands / f32 accumulation vs. matching-precision ref.
    fwd_bf16 = jax.jit(functools.partial(decoder_forward,
                                         compute_dtype=jnp.bfloat16))
    out_bf16 = jax.block_until_ready(fwd_bf16(x, params))
    ref_bf16 = jax.block_until_ready(decoder_reference(x, params, jnp.bfloat16))
    assert out_bf16.shape == out_f32.shape, out_bf16.shape
    err_bf16 = float(jnp.max(jnp.abs(out_bf16 - ref_bf16)))
    assert jnp.allclose(out_bf16, ref_bf16, atol=2e-2, rtol=2e-2), err_bf16

    print("KERNEL_OK")
</pallas_src>

<mosaic_0001>
module attributes {stable_mosaic.version = 11 : i64} {
  func.func @_convt_s2_kernel(%arg0: i32, %arg1: i32, %arg2: memref<1x17x17x128xf32, #tpu.memory_space<vmem>>, %arg3: memref<4x128x256xf32, #tpu.memory_space<vmem>>, %arg4: memref<1x256xf32, #tpu.memory_space<vmem>>, %arg5: memref<1x32x16x128xf32, #tpu.memory_space<vmem>>) attributes {dimension_semantics = [#tpu.dimension_semantics<parallel>, #tpu.dimension_semantics<arbitrary>], iteration_bounds = array<i64: 2, 1>, scalar_prefetch = 0 : i64, scratch_operands = 0 : i64, tpu.core_type = #tpu.core_type<tc>, window_params = [{transform_indices = @transform_0, window_bounds = array<i64: 1, 17, 17, 128>}, {pipeline_mode = #tpu.pipeline_mode<synchronous>, transform_indices = @transform_1, window_bounds = array<i64: 4, 128, 256>}, {pipeline_mode = #tpu.pipeline_mode<synchronous>, transform_indices = @transform_2, window_bounds = array<i64: 1, 256>}, {transform_indices = @transform_3, window_bounds = array<i64: 1, 32, 16, 128>}]} {
    %c16_i32 = arith.constant 16 : i32
    %0 = arith.muli %arg1, %c16_i32 : i32
    %c0 = arith.constant 0 : index
    %c0_0 = arith.constant 0 : index
    %1 = vector.load %arg4[%c0, %c0_0] : memref<1x256xf32, #tpu.memory_space<vmem>>, vector<1x256xf32>
    %c0_i32 = arith.constant 0 : i32
    %c16_i32_1 = arith.constant 16 : i32
    %2 = arith.addi %c0_i32, %c16_i32_1 : i32
    %c1_i32 = arith.constant 1 : i32
    scf.for %arg6 = %c0_i32 to %2 step %c1_i32  : i32 {
      %cst = arith.constant 0.000000e+00 : f32
      %3 = vector.broadcast %cst : f32 to vector<16x256xf32>
      %4 = arith.addi %0, %arg6 : i32
      %c0_i32_3 = arith.constant 0 : i32
      %5 = arith.addi %4, %c0_i32_3 : i32
      %c0_4 = arith.constant 0 : index
      %6 = arith.index_cast %5 : i32 to index
      %c0_5 = arith.constant 0 : index
      %c0_6 = arith.constant 0 : index
      %7 = vector.load %arg2[%c0_4, %6, %c0_5, %c0_6] : memref<1x17x17x128xf32, #tpu.memory_space<vmem>>, vector<1x1x17x128xf32>
      %8 = vector.shape_cast %7 : vector<1x1x17x128xf32> to vector<17x128xf32>
      %9 = vector.extract_strided_slice %8 {offsets = [0, 0], sizes = [16, 128], strides = [1, 1]} : vector<17x128xf32> to vector<16x128xf32>
      %c0_7 = arith.constant 0 : index
      %c0_8 = arith.constant 0 : index
      %c0_9 = arith.constant 0 : index
      %10 = vector.load %arg3[%c0_7, %c0_8, %c0_9] : memref<4x128x256xf32, #tpu.memory_space<vmem>>, vector<1x128x256xf32>
      %11 = vector.shape_cast %10 : vector<1x128x256xf32> to vector<128x256xf32>
      %cst_10 = arith.constant dense<0.000000e+00> : vector<16x256xf32>
      %12 = tpu.matmul %9, %11, %cst_10 {dimension_numbers = #tpu.dot_dimension_numbers<[1], [0], [0], [1], [0, 0, 1, 1], [], []>} : vector<16x128xf32>, vector<128x256xf32>, vector<16x256xf32> -> vector<16x256xf32>
      %13 = arith.addf %3, %12 : vector<16x256xf32>
      %14 = vector.extract_strided_slice %8 {offsets = [1, 0], sizes = [16, 128], strides = [1, 1]} : vector<17x128xf32> to vector<16x128xf32>
      %c1 = arith.constant 1 : index
      %c0_11 = arith.constant 0 : index
      %c0_12 = arith.constant 0 : index
      %15 = vector.load %arg3[%c1, %c0_11, %c0_12] : memref<4x128x256xf32, #tpu.memory_space<vmem>>, vector<1x128x256xf32>
      %16 = vector.shape_cast %15 : vector<1x128x256xf32> to vector<128x256xf32>
      %cst_13 = arith.constant dense<0.000000e+00> : vector<16x256xf32>
      %17 = tpu.matmul %14, %16, %cst_13 {dimension_numbers = #tpu.dot_dimension_numbers<[1], [0], [0], [1], [0, 0, 1, 1], [], []>} : vector<16x128xf32>, vector<128x256xf32>, vector<16x256xf32> -> vector<16x256xf32>
      %18 = arith.addf %13, %17 : vector<16x256xf32>
      %19 = arith.addi %0, %arg6 : i32
      %c1_i32_14 = arith.constant 1 : i32
      %20 = arith.addi %19, %c1_i32_14 : i32
      %c0_15 = arith.constant 0 : index
      %21 = arith.index_cast %20 : i32 to index
      %c0_16 = arith.constant 0 : index
      %c0_17 = arith.constant 0 : index
      %22 = vector.load %arg2[%c0_15, %21, %c0_16, %c0_17] : memref<1x17x17x128xf32, #tpu.memory_space<vmem>>, vector<1x1x17x128xf32>
      %23 = vector.shape_cast %22 : vector<1x1x17x128xf32> to vector<17x128xf32>
      %24 = vector.extract_strided_slice %23 {offsets = [0, 0], sizes = [16, 128], strides = [1, 1]} : vector<17x128xf32> to vector<16x128xf32>
      %c2 = arith.constant 2 : index
      %c0_18 = arith.constant 0 : index
      %c0_19 = arith.constant 0 : index
      %25 = vector.load %arg3[%c2, %c0_18, %c0_19] : memref<4x128x256xf32, #tpu.memory_space<vmem>>, vector<1x128x256xf32>
      %26 = vector.shape_cast %25 : vector<1x128x256xf32> to vector<128x256xf32>
      %cst_20 = arith.constant dense<0.000000e+00> : vector<16x256xf32>
      %27 = tpu.matmul %24, %26, %cst_20 {dimension_numbers = #tpu.dot_dimension_numbers<[1], [0], [0], [1], [0, 0, 1, 1], [], []>} : vector<16x128xf32>, vector<128x256xf32>, vector<16x256xf32> -> vector<16x256xf32>
      %28 = arith.addf %18, %27 : vector<16x256xf32>
      %29 = vector.extract_strided_slice %23 {offsets = [1, 0], sizes = [16, 128], strides = [1, 1]} : vector<17x128xf32> to vector<16x128xf32>
      %c3 = arith.constant 3 : index
      %c0_21 = arith.constant 0 : index
      %c0_22 = arith.constant 0 : index
      %30 = vector.load %arg3[%c3, %c0_21, %c0_22] : memref<4x128x256xf32, #tpu.memory_space<vmem>>, vector<1x128x256xf32>
      %31 = vector.shape_cast %30 : vector<1x128x256xf32> to vector<128x256xf32>
      %cst_23 = arith.constant dense<0.000000e+00> : vector<16x256xf32>
      %32 = tpu.matmul %29, %31, %cst_23 {dimension_numbers = #tpu.dot_dimension_numbers<[1], [0], [0], [1], [0, 0, 1, 1], [], []>} : vector<16x128xf32>, vector<128x256xf32>, vector<16x256xf32> -> vector<16x256xf32>
      %33 = arith.addf %28, %32 : vector<16x256xf32>
      %34 = vector.broadcast %1 : vector<1x256xf32> to vector<16x256xf32>
      %35 = arith.addf %33, %34 : vector<16x256xf32>
      %cst_24 = arith.constant 0.000000e+00 : f32
      %36 = vector.broadcast %cst_24 : f32 to vector<16x256xf32>
      %37 = arith.maximumf %35, %36 : vector<16x256xf32>
      %38 = vector.extract_strided_slice %37 {offsets = [0, 0], sizes = [16, 128], strides = [1, 1]} : vector<16x256xf32> to vector<16x128xf32>
      %c2_i32 = arith.constant 2 : i32
      %39 = arith.muli %c2_i32, %arg6 : i32
      %c0_25 = arith.constant 0 : index
      %40 = arith.index_cast %39 : i32 to index
      %c0_26 = arith.constant 0 : index
      %c0_27 = arith.constant 0 : index
      %41 = vector.load %arg5[%c0_25, %40, %c0_26, %c0_27] : memref<1x32x16x128xf32, #tpu.memory_space<vmem>>, vector<1x1x16x128xf32>
      %42 = vector.shape_cast %41 : vector<1x1x16x128xf32> to vector<16x128xf32>
      %43 = vector.shape_cast %38 : vector<16x128xf32> to vector<1x1x16x128xf32>
      tpu.vector_store %arg5[%c0_25, %40, %c0_26, %c0_27], %43 {strides = array<i32>} : memref<1x32x16x128xf32, #tpu.memory_space<vmem>>, vector<1x1x16x128xf32>,
      %44 = vector.extract_strided_slice %37 {offsets = [0, 128], sizes = [16, 128], strides = [1, 1]} : vector<16x256xf32> to vector<16x128xf32>
      %c2_i32_28 = arith.constant 2 : i32
      %45 = arith.muli %c2_i32_28, %arg6 : i32
      %c1_i32_29 = arith.constant 1 : i32
      %46 = arith.addi %45, %c1_i32_29 : i32
      %c0_30 = arith.constant 0 : index
      %47 = arith.index_cast %46 : i32 to index
      %c0_31 = arith.constant 0 : index
      %c0_32 = arith.constant 0 : index
      %48 = vector.load %arg5[%c0_30, %47, %c0_31, %c0_32] : memref<1x32x16x128xf32, #tpu.memory_space<vmem>>, vector<1x1x16x128xf32>
      %49 = vector.shape_cast %48 : vector<1x1x16x128xf32> to vector<16x128xf32>
      %50 = vector.shape_cast %44 : vector<16x128xf32> to vector<1x1x16x128xf32>
      tpu.vector_store %arg5[%c0_30, %47, %c0_31, %c0_32], %50 {strides = array<i32>} : memref<1x32x16x128xf32, #tpu.memory_space<vmem>>, vector<1x1x16x128xf32>,
    }
    %c16_i32_2 = arith.constant 16 : i32
    return
  }
  func.func @transform_0(%arg0: i32, %arg1: i32) -> (i32, i32, i32, i32) {
    %c0_i32 = arith.constant 0 : i32
    %c0_i32_0 = arith.constant 0 : i32
    %c0_i32_1 = arith.constant 0 : i32
    %c0_i32_2 = arith.constant 0 : i32
    return %arg0, %c0_i32, %c0_i32_0, %c0_i32_1 : i32, i32, i32, i32
  }
  func.func @transform_1(%arg0: i32, %arg1: i32) -> (i32, i32, i32) {
    %c0_i32 = arith.constant 0 : i32
    %c0_i32_0 = arith.constant 0 : i32
    %c0_i32_1 = arith.constant 0 : i32
    %c0_i32_2 = arith.constant 0 : i32
    return %c0_i32, %c0_i32_0, %c0_i32_1 : i32, i32, i32
  }
  func.func @transform_2(%arg0: i32, %arg1: i32) -> (i32, i32) {
    %c0_i32 = arith.constant 0 : i32
    %c0_i32_0 = arith.constant 0 : i32
    %c0_i32_1 = arith.constant 0 : i32
    return %c0_i32, %c0_i32_0 : i32, i32
  }
  func.func @transform_3(%arg0: i32, %arg1: i32) -> (i32, i32, i32, i32) {
    %c0_i32 = arith.constant 0 : i32
    %c0_i32_0 = arith.constant 0 : i32
    %c0_i32_1 = arith.constant 0 : i32
    return %arg0, %arg1, %c0_i32, %c0_i32_0 : i32, i32, i32, i32
  }
}

module attributes {stable_mosaic.version = 11 : i64} {
  func.func @_convt_s2_kernel(%arg0: i32, %arg1: i32, %arg2: memref<1x33x33x64xf32, #tpu.memory_space<vmem>>, %arg3: memref<4x64x128xf32, #tpu.memory_space<vmem>>, %arg4: memref<1x128xf32, #tpu.memory_space<vmem>>, %arg5: memref<1x64x32x64xf32, #tpu.memory_space<vmem>>) attributes {dimension_semantics = [#tpu.dimension_semantics<parallel>, #tpu.dimension_semantics<arbitrary>], iteration_bounds = array<i64: 2, 1>, scalar_prefetch = 0 : i64, scratch_operands = 0 : i64, tpu.core_type = #tpu.core_type<tc>, window_params = [{transform_indices = @transform_0, window_bounds = array<i64: 1, 33, 33, 64>}, {pipeline_mode = #tpu.pipeline_mode<synchronous>, transform_indices = @transform_1, window_bounds = array<i64: 4, 64, 128>}, {pipeline_mode = #tpu.pipeline_mode<synchronous>, transform_indices = @transform_2, window_bounds = array<i64: 1, 128>}, {transform_indices = @transform_3, window_bounds = array<i64: 1, 64, 32, 64>}]} {
    %c32_i32 = arith.constant 32 : i32
    %0 = arith.muli %arg1, %c32_i32 : i32
    %c0 = arith.constant 0 : index
    %c0_0 = arith.constant 0 : index
    %1 = vector.load %arg4[%c0, %c0_0] : memref<1x128xf32, #tpu.memory_space<vmem>>, vector<1x128xf32>
    %c0_i32 = arith.constant 0 : i32
    %c32_i32_1 = arith.constant 32 : i32
    %2 = arith.addi %c0_i32, %c32_i32_1 : i32
    %c1_i32 = arith.constant 1 : i32
    scf.for %arg6 = %c0_i32 to %2 step %c1_i32  : i32 {
      %cst = arith.constant 0.000000e+00 : f32
      %3 = vector.broadcast %cst : f32 to vector<32x128xf32>
      %4 = arith.addi %0, %arg6 : i32
      %c0_i32_3 = arith.constant 0 : i32
      %5 = arith.addi %4, %c0_i32_3 : i32
      %c0_4 = arith.constant 0 : index
      %6 = arith.index_cast %5 : i32 to index
      %c0_5 = arith.constant 0 : index
      %c0_6 = arith.constant 0 : index
      %7 = vector.load %arg2[%c0_4, %6, %c0_5, %c0_6] : memref<1x33x33x64xf32, #tpu.memory_space<vmem>>, vector<1x1x33x64xf32>
      %8 = vector.shape_cast %7 : vector<1x1x33x64xf32> to vector<33x64xf32>
      %9 = vector.extract_strided_slice %8 {offsets = [0, 0], sizes = [32, 64], strides = [1, 1]} : vector<33x64xf32> to vector<32x64xf32>
      %c0_7 = arith.constant 0 : index
      %c0_8 = arith.constant 0 : index
      %c0_9 = arith.constant 0 : index
      %10 = vector.load %arg3[%c0_7, %c0_8, %c0_9] : memref<4x64x128xf32, #tpu.memory_space<vmem>>, vector<1x64x128xf32>
      %11 = vector.shape_cast %10 : vector<1x64x128xf32> to vector<64x128xf32>
      %cst_10 = arith.constant dense<0.000000e+00> : vector<32x128xf32>
      %12 = tpu.matmul %9, %11, %cst_10 {dimension_numbers = #tpu.dot_dimension_numbers<[1], [0], [0], [1], [0, 0, 1, 1], [], []>} : vector<32x64xf32>, vector<64x128xf32>, vector<32x128xf32> -> vector<32x128xf32>
      %13 = arith.addf %3, %12 : vector<32x128xf32>
      %14 = vector.extract_strided_slice %8 {offsets = [1, 0], sizes = [32, 64], strides = [1, 1]} : vector<33x64xf32> to vector<32x64xf32>
      %c1 = arith.constant 1 : index
      %c0_11 = arith.constant 0 : index
      %c0_12 = arith.constant 0 : index
      %15 = vector.load %arg3[%c1, %c0_11, %c0_12] : memref<4x64x128xf32, #tpu.memory_space<vmem>>, vector<1x64x128xf32>
      %16 = vector.shape_cast %15 : vector<1x64x128xf32> to vector<64x128xf32>
      %cst_13 = arith.constant dense<0.000000e+00> : vector<32x128xf32>
      %17 = tpu.matmul %14, %16, %cst_13 {dimension_numbers = #tpu.dot_dimension_numbers<[1], [0], [0], [1], [0, 0, 1, 1], [], []>} : vector<32x64xf32>, vector<64x128xf32>, vector<32x128xf32> -> vector<32x128xf32>
      %18 = arith.addf %13, %17 : vector<32x128xf32>
      %19 = arith.addi %0, %arg6 : i32
      %c1_i32_14 = arith.constant 1 : i32
      %20 = arith.addi %19, %c1_i32_14 : i32
      %c0_15 = arith.constant 0 : index
      %21 = arith.index_cast %20 : i32 to index
      %c0_16 = arith.constant 0 : index
      %c0_17 = arith.constant 0 : index
      %22 = vector.load %arg2[%c0_15, %21, %c0_16, %c0_17] : memref<1x33x33x64xf32, #tpu.memory_space<vmem>>, vector<1x1x33x64xf32>
      %23 = vector.shape_cast %22 : vector<1x1x33x64xf32> to vector<33x64xf32>
      %24 = vector.extract_strided_slice %23 {offsets = [0, 0], sizes = [32, 64], strides = [1, 1]} : vector<33x64xf32> to vector<32x64xf32>
      %c2 = arith.constant 2 : index
      %c0_18 = arith.constant 0 : index
      %c0_19 = arith.constant 0 : index
      %25 = vector.load %arg3[%c2, %c0_18, %c0_19] : memref<4x64x128xf32, #tpu.memory_space<vmem>>, vector<1x64x128xf32>
      %26 = vector.shape_cast %25 : vector<1x64x128xf32> to vector<64x128xf32>
      %cst_20 = arith.constant dense<0.000000e+00> : vector<32x128xf32>
      %27 = tpu.matmul %24, %26, %cst_20 {dimension_numbers = #tpu.dot_dimension_numbers<[1], [0], [0], [1], [0, 0, 1, 1], [], []>} : vector<32x64xf32>, vector<64x128xf32>, vector<32x128xf32> -> vector<32x128xf32>
      %28 = arith.addf %18, %27 : vector<32x128xf32>
      %29 = vector.extract_strided_slice %23 {offsets = [1, 0], sizes = [32, 64], strides = [1, 1]} : vector<33x64xf32> to vector<32x64xf32>
      %c3 = arith.constant 3 : index
      %c0_21 = arith.constant 0 : index
      %c0_22 = arith.constant 0 : index
      %30 = vector.load %arg3[%c3, %c0_21, %c0_22] : memref<4x64x128xf32, #tpu.memory_space<vmem>>, vector<1x64x128xf32>
      %31 = vector.shape_cast %30 : vector<1x64x128xf32> to vector<64x128xf32>
      %cst_23 = arith.constant dense<0.000000e+00> : vector<32x128xf32>
      %32 = tpu.matmul %29, %31, %cst_23 {dimension_numbers = #tpu.dot_dimension_numbers<[1], [0], [0], [1], [0, 0, 1, 1], [], []>} : vector<32x64xf32>, vector<64x128xf32>, vector<32x128xf32> -> vector<32x128xf32>
      %33 = arith.addf %28, %32 : vector<32x128xf32>
      %34 = vector.broadcast %1 : vector<1x128xf32> to vector<32x128xf32>
      %35 = arith.addf %33, %34 : vector<32x128xf32>
      %cst_24 = arith.constant 0.000000e+00 : f32
      %36 = vector.broadcast %cst_24 : f32 to vector<32x128xf32>
      %37 = arith.maximumf %35, %36 : vector<32x128xf32>
      %38 = vector.extract_strided_slice %37 {offsets = [0, 0], sizes = [32, 64], strides = [1, 1]} : vector<32x128xf32> to vector<32x64xf32>
      %c2_i32 = arith.constant 2 : i32
      %39 = arith.muli %c2_i32, %arg6 : i32
      %c0_25 = arith.constant 0 : index
      %40 = arith.index_cast %39 : i32 to index
      %c0_26 = arith.constant 0 : index
      %c0_27 = arith.constant 0 : index
      %41 = vector.load %arg5[%c0_25, %40, %c0_26, %c0_27] : memref<1x64x32x64xf32, #tpu.memory_space<vmem>>, vector<1x1x32x64xf32>
      %42 = vector.shape_cast %41 : vector<1x1x32x64xf32> to vector<32x64xf32>
      %43 = vector.shape_cast %38 : vector<32x64xf32> to vector<1x1x32x64xf32>
      tpu.vector_store %arg5[%c0_25, %40, %c0_26, %c0_27], %43 {strides = array<i32>} : memref<1x64x32x64xf32, #tpu.memory_space<vmem>>, vector<1x1x32x64xf32>,
      %44 = vector.extract_strided_slice %37 {offsets = [0, 64], sizes = [32, 64], strides = [1, 1]} : vector<32x128xf32> to vector<32x64xf32>
      %c2_i32_28 = arith.constant 2 : i32
      %45 = arith.muli %c2_i32_28, %arg6 : i32
      %c1_i32_29 = arith.constant 1 : i32
      %46 = arith.addi %45, %c1_i32_29 : i32
      %c0_30 = arith.constant 0 : index
      %47 = arith.index_cast %46 : i32 to index
      %c0_31 = arith.constant 0 : index
      %c0_32 = arith.constant 0 : index
      %48 = vector.load %arg5[%c0_30, %47, %c0_31, %c0_32] : memref<1x64x32x64xf32, #tpu.memory_space<vmem>>, vector<1x1x32x64xf32>
      %49 = vector.shape_cast %48 : vector<1x1x32x64xf32> to vector<32x64xf32>
      %50 = vector.shape_cast %44 : vector<32x64xf32> to vector<1x1x32x64xf32>
      tpu.vector_store %arg5[%c0_30, %47, %c0_31, %c0_32], %50 {strides = array<i32>} : memref<1x64x32x64xf32, #tpu.memory_space<vmem>>, vector<1x1x32x64xf32>,
    }
    %c32_i32_2 = arith.constant 32 : i32
    return
  }
  func.func @transform_0(%arg0: i32, %arg1: i32) -> (i32, i32, i32, i32) {
    %c0_i32 = arith.constant 0 : i32
    %c0_i32_0 = arith.constant 0 : i32
    %c0_i32_1 = arith.constant 0 : i32
    %c0_i32_2 = arith.constant 0 : i32
    return %arg0, %c0_i32, %c0_i32_0, %c0_i32_1 : i32, i32, i32, i32
  }
  func.func @transform_1(%arg0: i32, %arg1: i32) -> (i32, i32, i32) {
    %c0_i32 = arith.constant 0 : i32
    %c0_i32_0 = arith.constant 0 : i32
    %c0_i32_1 = arith.constant 0 : i32
    %c0_i32_2 = arith.constant 0 : i32
    return %c0_i32, %c0_i32_0, %c0_i32_1 : i32, i32, i32
  }
  func.func @transform_2(%arg0: i32, %arg1: i32) -> (i32, i32) {
    %c0_i32 = arith.constant 0 : i32
    %c0_i32_0 = arith.constant 0 : i32
    %c0_i32_1 = arith.constant 0 : i32
    return %c0_i32, %c0_i32_0 : i32, i32
  }
  func.func @transform_3(%arg0: i32, %arg1: i32) -> (i32, i32, i32, i32) {
    %c0_i32 = arith.constant 0 : i32
    %c0_i32_0 = arith.constant 0 : i32
    %c0_i32_1 = arith.constant 0 : i32
    return %arg0, %arg1, %c0_i32, %c0_i32_0 : i32, i32, i32, i32
  }
}

module attributes {stable_mosaic.version = 11 : i64} {
  func.func @_convt_s2_kernel(%arg0: i32, %arg1: i32, %arg2: memref<1x65x65x32xf32, #tpu.memory_space<vmem>>, %arg3: memref<4x32x64xf32, #tpu.memory_space<vmem>>, %arg4: memref<1x64xf32, #tpu.memory_space<vmem>>, %arg5: memref<1x64x64x32xf32, #tpu.memory_space<vmem>>) attributes {dimension_semantics = [#tpu.dimension_semantics<parallel>, #tpu.dimension_semantics<arbitrary>], iteration_bounds = array<i64: 2, 2>, scalar_prefetch = 0 : i64, scratch_operands = 0 : i64, tpu.core_type = #tpu.core_type<tc>, window_params = [{transform_indices = @transform_0, window_bounds = array<i64: 1, 65, 65, 32>}, {pipeline_mode = #tpu.pipeline_mode<synchronous>, transform_indices = @transform_1, window_bounds = array<i64: 4, 32, 64>}, {pipeline_mode = #tpu.pipeline_mode<synchronous>, transform_indices = @transform_2, window_bounds = array<i64: 1, 64>}, {transform_indices = @transform_3, window_bounds = array<i64: 1, 64, 64, 32>}]} {
    %c32_i32 = arith.constant 32 : i32
    %0 = arith.muli %arg1, %c32_i32 : i32
    %c0 = arith.constant 0 : index
    %c0_0 = arith.constant 0 : index
    %1 = vector.load %arg4[%c0, %c0_0] : memref<1x64xf32, #tpu.memory_space<vmem>>, vector<1x64xf32>
    %c0_i32 = arith.constant 0 : i32
    %c32_i32_1 = arith.constant 32 : i32
    %2 = arith.addi %c0_i32, %c32_i32_1 : i32
    %c1_i32 = arith.constant 1 : i32
    scf.for %arg6 = %c0_i32 to %2 step %c1_i32  : i32 {
      %cst = arith.constant 0.000000e+00 : f32
      %3 = vector.broadcast %cst : f32 to vector<64x64xf32>
      %4 = arith.addi %0, %arg6 : i32
      %c0_i32_3 = arith.constant 0 : i32
      %5 = arith.addi %4, %c0_i32_3 : i32
      %c0_4 = arith.constant 0 : index
      %6 = arith.index_cast %5 : i32 to index
      %c0_5 = arith.constant 0 : index
      %c0_6 = arith.constant 0 : index
      %7 = vector.load %arg2[%c0_4, %6, %c0_5, %c0_6] : memref<1x65x65x32xf32, #tpu.memory_space<vmem>>, vector<1x1x65x32xf32>
      %8 = vector.shape_cast %7 : vector<1x1x65x32xf32> to vector<65x32xf32>
      %9 = vector.extract_strided_slice %8 {offsets = [0, 0], sizes = [64, 32], strides = [1, 1]} : vector<65x32xf32> to vector<64x32xf32>
      %c0_7 = arith.constant 0 : index
      %c0_8 = arith.constant 0 : index
      %c0_9 = arith.constant 0 : index
      %10 = vector.load %arg3[%c0_7, %c0_8, %c0_9] : memref<4x32x64xf32, #tpu.memory_space<vmem>>, vector<1x32x64xf32>
      %11 = vector.shape_cast %10 : vector<1x32x64xf32> to vector<32x64xf32>
      %cst_10 = arith.constant dense<0.000000e+00> : vector<64x64xf32>
      %12 = tpu.matmul %9, %11, %cst_10 {dimension_numbers = #tpu.dot_dimension_numbers<[1], [0], [0], [1], [0, 0, 1, 1], [], []>} : vector<64x32xf32>, vector<32x64xf32>, vector<64x64xf32> -> vector<64x64xf32>
      %13 = arith.addf %3, %12 : vector<64x64xf32>
      %14 = vector.extract_strided_slice %8 {offsets = [1, 0], sizes = [64, 32], strides = [1, 1]} : vector<65x32xf32> to vector<64x32xf32>
      %c1 = arith.constant 1 : index
      %c0_11 = arith.constant 0 : index
      %c0_12 = arith.constant 0 : index
      %15 = vector.load %arg3[%c1, %c0_11, %c0_12] : memref<4x32x64xf32, #tpu.memory_space<vmem>>, vector<1x32x64xf32>
      %16 = vector.shape_cast %15 : vector<1x32x64xf32> to vector<32x64xf32>
      %cst_13 = arith.constant dense<0.000000e+00> : vector<64x64xf32>
      %17 = tpu.matmul %14, %16, %cst_13 {dimension_numbers = #tpu.dot_dimension_numbers<[1], [0], [0], [1], [0, 0, 1, 1], [], []>} : vector<64x32xf32>, vector<32x64xf32>, vector<64x64xf32> -> vector<64x64xf32>
      %18 = arith.addf %13, %17 : vector<64x64xf32>
      %19 = arith.addi %0, %arg6 : i32
      %c1_i32_14 = arith.constant 1 : i32
      %20 = arith.addi %19, %c1_i32_14 : i32
      %c0_15 = arith.constant 0 : index
      %21 = arith.index_cast %20 : i32 to index
      %c0_16 = arith.constant 0 : index
      %c0_17 = arith.constant 0 : index
      %22 = vector.load %arg2[%c0_15, %21, %c0_16, %c0_17] : memref<1x65x65x32xf32, #tpu.memory_space<vmem>>, vector<1x1x65x32xf32>
      %23 = vector.shape_cast %22 : vector<1x1x65x32xf32> to vector<65x32xf32>
      %24 = vector.extract_strided_slice %23 {offsets = [0, 0], sizes = [64, 32], strides = [1, 1]} : vector<65x32xf32> to vector<64x32xf32>
      %c2 = arith.constant 2 : index
      %c0_18 = arith.constant 0 : index
      %c0_19 = arith.constant 0 : index
      %25 = vector.load %arg3[%c2, %c0_18, %c0_19] : memref<4x32x64xf32, #tpu.memory_space<vmem>>, vector<1x32x64xf32>
      %26 = vector.shape_cast %25 : vector<1x32x64xf32> to vector<32x64xf32>
      %cst_20 = arith.constant dense<0.000000e+00> : vector<64x64xf32>
      %27 = tpu.matmul %24, %26, %cst_20 {dimension_numbers = #tpu.dot_dimension_numbers<[1], [0], [0], [1], [0, 0, 1, 1], [], []>} : vector<64x32xf32>, vector<32x64xf32>, vector<64x64xf32> -> vector<64x64xf32>
      %28 = arith.addf %18, %27 : vector<64x64xf32>
      %29 = vector.extract_strided_slice %23 {offsets = [1, 0], sizes = [64, 32], strides = [1, 1]} : vector<65x32xf32> to vector<64x32xf32>
      %c3 = arith.constant 3 : index
      %c0_21 = arith.constant 0 : index
      %c0_22 = arith.constant 0 : index
      %30 = vector.load %arg3[%c3, %c0_21, %c0_22] : memref<4x32x64xf32, #tpu.memory_space<vmem>>, vector<1x32x64xf32>
      %31 = vector.shape_cast %30 : vector<1x32x64xf32> to vector<32x64xf32>
      %cst_23 = arith.constant dense<0.000000e+00> : vector<64x64xf32>
      %32 = tpu.matmul %29, %31, %cst_23 {dimension_numbers = #tpu.dot_dimension_numbers<[1], [0], [0], [1], [0, 0, 1, 1], [], []>} : vector<64x32xf32>, vector<32x64xf32>, vector<64x64xf32> -> vector<64x64xf32>
      %33 = arith.addf %28, %32 : vector<64x64xf32>
      %34 = vector.broadcast %1 : vector<1x64xf32> to vector<64x64xf32>
      %35 = arith.addf %33, %34 : vector<64x64xf32>
      %cst_24 = arith.constant 0.000000e+00 : f32
      %36 = vector.broadcast %cst_24 : f32 to vector<64x64xf32>
      %37 = arith.maximumf %35, %36 : vector<64x64xf32>
      %38 = vector.extract_strided_slice %37 {offsets = [0, 0], sizes = [64, 32], strides = [1, 1]} : vector<64x64xf32> to vector<64x32xf32>
      %c2_i32 = arith.constant 2 : i32
      %39 = arith.muli %c2_i32, %arg6 : i32
      %c0_25 = arith.constant 0 : index
      %40 = arith.index_cast %39 : i32 to index
      %c0_26 = arith.constant 0 : index
      %c0_27 = arith.constant 0 : index
      %41 = vector.load %arg5[%c0_25, %40, %c0_26, %c0_27] : memref<1x64x64x32xf32, #tpu.memory_space<vmem>>, vector<1x1x64x32xf32>
      %42 = vector.shape_cast %41 : vector<1x1x64x32xf32> to vector<64x32xf32>
      %43 = vector.shape_cast %38 : vector<64x32xf32> to vector<1x1x64x32xf32>
      tpu.vector_store %arg5[%c0_25, %40, %c0_26, %c0_27], %43 {strides = array<i32>} : memref<1x64x64x32xf32, #tpu.memory_space<vmem>>, vector<1x1x64x32xf32>,
      %44 = vector.extract_strided_slice %37 {offsets = [0, 32], sizes = [64, 32], strides = [1, 1]} : vector<64x64xf32> to vector<64x32xf32>
      %c2_i32_28 = arith.constant 2 : i32
      %45 = arith.muli %c2_i32_28, %arg6 : i32
      %c1_i32_29 = arith.constant 1 : i32
      %46 = arith.addi %45, %c1_i32_29 : i32
      %c0_30 = arith.constant 0 : index
      %47 = arith.index_cast %46 : i32 to index
      %c0_31 = arith.constant 0 : index
      %c0_32 = arith.constant 0 : index
      %48 = vector.load %arg5[%c0_30, %47, %c0_31, %c0_32] : memref<1x64x64x32xf32, #tpu.memory_space<vmem>>, vector<1x1x64x32xf32>
      %49 = vector.shape_cast %48 : vector<1x1x64x32xf32> to vector<64x32xf32>
      %50 = vector.shape_cast %44 : vector<64x32xf32> to vector<1x1x64x32xf32>
      tpu.vector_store %arg5[%c0_30, %47, %c0_31, %c0_32], %50 {strides = array<i32>} : memref<1x64x64x32xf32, #tpu.memory_space<vmem>>, vector<1x1x64x32xf32>,
    }
    %c32_i32_2 = arith.constant 32 : i32
    return
  }
  func.func @transform_0(%arg0: i32, %arg1: i32) -> (i32, i32, i32, i32) {
    %c0_i32 = arith.constant 0 : i32
    %c0_i32_0 = arith.constant 0 : i32
    %c0_i32_1 = arith.constant 0 : i32
    %c0_i32_2 = arith.constant 0 : i32
    return %arg0, %c0_i32, %c0_i32_0, %c0_i32_1 : i32, i32, i32, i32
  }
  func.func @transform_1(%arg0: i32, %arg1: i32) -> (i32, i32, i32) {
    %c0_i32 = arith.constant 0 : i32
    %c0_i32_0 = arith.constant 0 : i32
    %c0_i32_1 = arith.constant 0 : i32
    %c0_i32_2 = arith.constant 0 : i32
    return %c0_i32, %c0_i32_0, %c0_i32_1 : i32, i32, i32
  }
  func.func @transform_2(%arg0: i32, %arg1: i32) -> (i32, i32) {
    %c0_i32 = arith.constant 0 : i32
    %c0_i32_0 = arith.constant 0 : i32
    %c0_i32_1 = arith.constant 0 : i32
    return %c0_i32, %c0_i32_0 : i32, i32
  }
  func.func @transform_3(%arg0: i32, %arg1: i32) -> (i32, i32, i32, i32) {
    %c0_i32 = arith.constant 0 : i32
    %c0_i32_0 = arith.constant 0 : i32
    %c0_i32_1 = arith.constant 0 : i32
    return %arg0, %arg1, %c0_i32, %c0_i32_0 : i32, i32, i32, i32
  }
}

module attributes {stable_mosaic.version = 11 : i64} {
  func.func @_convt_s1_kernel(%arg0: i32, %arg1: i32, %arg2: memref<1x130x130x16xf32, #tpu.memory_space<vmem>>, %arg3: memref<9x16x3xf32, #tpu.memory_space<vmem>>, %arg4: memref<1x3xf32, #tpu.memory_space<vmem>>, %arg5: memref<1x64x128x3xf32, #tpu.memory_space<vmem>>) attributes {dimension_semantics = [#tpu.dimension_semantics<parallel>, #tpu.dimension_semantics<arbitrary>], iteration_bounds = array<i64: 2, 2>, scalar_prefetch = 0 : i64, scratch_operands = 0 : i64, tpu.core_type = #tpu.core_type<tc>, window_params = [{transform_indices = @transform_0, window_bounds = array<i64: 1, 130, 130, 16>}, {pipeline_mode = #tpu.pipeline_mode<synchronous>, transform_indices = @transform_1, window_bounds = array<i64: 9, 16, 3>}, {pipeline_mode = #tpu.pipeline_mode<synchronous>, transform_indices = @transform_2, window_bounds = array<i64: 1, 3>}, {transform_indices = @transform_3, window_bounds = array<i64: 1, 64, 128, 3>}]} {
    %c64_i32 = arith.constant 64 : i32
    %0 = arith.muli %arg1, %c64_i32 : i32
    %c0 = arith.constant 0 : index
    %c0_0 = arith.constant 0 : index
    %1 = vector.load %arg4[%c0, %c0_0] : memref<1x3xf32, #tpu.memory_space<vmem>>, vector<1x3xf32>
    %c0_i32 = arith.constant 0 : i32
    %c64_i32_1 = arith.constant 64 : i32
    %2 = arith.addi %c0_i32, %c64_i32_1 : i32
    %c1_i32 = arith.constant 1 : i32
    scf.for %arg6 = %c0_i32 to %2 step %c1_i32  : i32 {
      %cst = arith.constant 0.000000e+00 : f32
      %3 = vector.broadcast %cst : f32 to vector<128x3xf32>
      %4 = arith.addi %0, %arg6 : i32
      %c0_i32_3 = arith.constant 0 : i32
      %5 = arith.addi %4, %c0_i32_3 : i32
      %c0_4 = arith.constant 0 : index
      %6 = arith.index_cast %5 : i32 to index
      %c0_5 = arith.constant 0 : index
      %c0_6 = arith.constant 0 : index
      %7 = vector.load %arg2[%c0_4, %6, %c0_5, %c0_6] : memref<1x130x130x16xf32, #tpu.memory_space<vmem>>, vector<1x1x130x16xf32>
      %8 = vector.shape_cast %7 : vector<1x1x130x16xf32> to vector<130x16xf32>
      %9 = vector.extract_strided_slice %8 {offsets = [0, 0], sizes = [128, 16], strides = [1, 1]} : vector<130x16xf32> to vector<128x16xf32>
      %c0_7 = arith.constant 0 : index
      %c0_8 = arith.constant 0 : index
      %c0_9 = arith.constant 0 : index
      %10 = vector.load %arg3[%c0_7, %c0_8, %c0_9] : memref<9x16x3xf32, #tpu.memory_space<vmem>>, vector<1x16x3xf32>
      %11 = vector.shape_cast %10 : vector<1x16x3xf32> to vector<16x3xf32>
      %cst_10 = arith.constant dense<0.000000e+00> : vector<128x3xf32>
      %12 = tpu.matmul %9, %11, %cst_10 {dimension_numbers = #tpu.dot_dimension_numbers<[1], [0], [0], [1], [0, 0, 1, 1], [], []>} : vector<128x16xf32>, vector<16x3xf32>, vector<128x3xf32> -> vector<128x3xf32>
      %13 = arith.addf %3, %12 : vector<128x3xf32>
      %14 = vector.extract_strided_slice %8 {offsets = [1, 0], sizes = [128, 16], strides = [1, 1]} : vector<130x16xf32> to vector<128x16xf32>
      %c1 = arith.constant 1 : index
      %c0_11 = arith.constant 0 : index
      %c0_12 = arith.constant 0 : index
      %15 = vector.load %arg3[%c1, %c0_11, %c0_12] : memref<9x16x3xf32, #tpu.memory_space<vmem>>, vector<1x16x3xf32>
      %16 = vector.shape_cast %15 : vector<1x16x3xf32> to vector<16x3xf32>
      %cst_13 = arith.constant dense<0.000000e+00> : vector<128x3xf32>
      %17 = tpu.matmul %14, %16, %cst_13 {dimension_numbers = #tpu.dot_dimension_numbers<[1], [0], [0], [1], [0, 0, 1, 1], [], []>} : vector<128x16xf32>, vector<16x3xf32>, vector<128x3xf32> -> vector<128x3xf32>
      %18 = arith.addf %13, %17 : vector<128x3xf32>
      %19 = vector.extract_strided_slice %8 {offsets = [2, 0], sizes = [128, 16], strides = [1, 1]} : vector<130x16xf32> to vector<128x16xf32>
      %c2 = arith.constant 2 : index
      %c0_14 = arith.constant 0 : index
      %c0_15 = arith.constant 0 : index
      %20 = vector.load %arg3[%c2, %c0_14, %c0_15] : memref<9x16x3xf32, #tpu.memory_space<vmem>>, vector<1x16x3xf32>
      %21 = vector.shape_cast %20 : vector<1x16x3xf32> to vector<16x3xf32>
      %cst_16 = arith.constant dense<0.000000e+00> : vector<128x3xf32>
      %22 = tpu.matmul %19, %21, %cst_16 {dimension_numbers = #tpu.dot_dimension_numbers<[1], [0], [0], [1], [0, 0, 1, 1], [], []>} : vector<128x16xf32>, vector<16x3xf32>, vector<128x3xf32> -> vector<128x3xf32>
      %23 = arith.addf %18, %22 : vector<128x3xf32>
      %24 = arith.addi %0, %arg6 : i32
      %c1_i32_17 = arith.constant 1 : i32
      %25 = arith.addi %24, %c1_i32_17 : i32
      %c0_18 = arith.constant 0 : index
      %26 = arith.index_cast %25 : i32 to index
      %c0_19 = arith.constant 0 : index
      %c0_20 = arith.constant 0 : index
      %27 = vector.load %arg2[%c0_18, %26, %c0_19, %c0_20] : memref<1x130x130x16xf32, #tpu.memory_space<vmem>>, vector<1x1x130x16xf32>
      %28 = vector.shape_cast %27 : vector<1x1x130x16xf32> to vector<130x16xf32>
      %29 = vector.extract_strided_slice %28 {offsets = [0, 0], sizes = [128, 16], strides = [1, 1]} : vector<130x16xf32> to vector<128x16xf32>
      %c3 = arith.constant 3 : index
      %c0_21 = arith.constant 0 : index
      %c0_22 = arith.constant 0 : index
      %30 = vector.load %arg3[%c3, %c0_21, %c0_22] : memref<9x16x3xf32, #tpu.memory_space<vmem>>, vector<1x16x3xf32>
      %31 = vector.shape_cast %30 : vector<1x16x3xf32> to vector<16x3xf32>
      %cst_23 = arith.constant dense<0.000000e+00> : vector<128x3xf32>
      %32 = tpu.matmul %29, %31, %cst_23 {dimension_numbers = #tpu.dot_dimension_numbers<[1], [0], [0], [1], [0, 0, 1, 1], [], []>} : vector<128x16xf32>, vector<16x3xf32>, vector<128x3xf32> -> vector<128x3xf32>
      %33 = arith.addf %23, %32 : vector<128x3xf32>
      %34 = vector.extract_strided_slice %28 {offsets = [1, 0], sizes = [128, 16], strides = [1, 1]} : vector<130x16xf32> to vector<128x16xf32>
      %c4 = arith.constant 4 : index
      %c0_24 = arith.constant 0 : index
      %c0_25 = arith.constant 0 : index
      %35 = vector.load %arg3[%c4, %c0_24, %c0_25] : memref<9x16x3xf32, #tpu.memory_space<vmem>>, vector<1x16x3xf32>
      %36 = vector.shape_cast %35 : vector<1x16x3xf32> to vector<16x3xf32>
      %cst_26 = arith.constant dense<0.000000e+00> : vector<128x3xf32>
      %37 = tpu.matmul %34, %36, %cst_26 {dimension_numbers = #tpu.dot_dimension_numbers<[1], [0], [0], [1], [0, 0, 1, 1], [], []>} : vector<128x16xf32>, vector<16x3xf32>, vector<128x3xf32> -> vector<128x3xf32>
      %38 = arith.addf %33, %37 : vector<128x3xf32>
      %39 = vector.extract_strided_slice %28 {offsets = [2, 0], sizes = [128, 16], strides = [1, 1]} : vector<130x16xf32> to vector<128x16xf32>
      %c5 = arith.constant 5 : index
      %c0_27 = arith.constant 0 : index
      %c0_28 = arith.constant 0 : index
      %40 = vector.load %arg3[%c5, %c0_27, %c0_28] : memref<9x16x3xf32, #tpu.memory_space<vmem>>, vector<1x16x3xf32>
      %41 = vector.shape_cast %40 : vector<1x16x3xf32> to vector<16x3xf32>
      %cst_29 = arith.constant dense<0.000000e+00> : vector<128x3xf32>
      %42 = tpu.matmul %39, %41, %cst_29 {dimension_numbers = #tpu.dot_dimension_numbers<[1], [0], [0], [1], [0, 0, 1, 1], [], []>} : vector<128x16xf32>, vector<16x3xf32>, vector<128x3xf32> -> vector<128x3xf32>
      %43 = arith.addf %38, %42 : vector<128x3xf32>
      %44 = arith.addi %0, %arg6 : i32
      %c2_i32 = arith.constant 2 : i32
      %45 = arith.addi %44, %c2_i32 : i32
      %c0_30 = arith.constant 0 : index
      %46 = arith.index_cast %45 : i32 to index
      %c0_31 = arith.constant 0 : index
      %c0_32 = arith.constant 0 : index
      %47 = vector.load %arg2[%c0_30, %46, %c0_31, %c0_32] : memref<1x130x130x16xf32, #tpu.memory_space<vmem>>, vector<1x1x130x16xf32>
      %48 = vector.shape_cast %47 : vector<1x1x130x16xf32> to vector<130x16xf32>
      %49 = vector.extract_strided_slice %48 {offsets = [0, 0], sizes = [128, 16], strides = [1, 1]} : vector<130x16xf32> to vector<128x16xf32>
      %c6 = arith.constant 6 : index
      %c0_33 = arith.constant 0 : index
      %c0_34 = arith.constant 0 : index
      %50 = vector.load %arg3[%c6, %c0_33, %c0_34] : memref<9x16x3xf32, #tpu.memory_space<vmem>>, vector<1x16x3xf32>
      %51 = vector.shape_cast %50 : vector<1x16x3xf32> to vector<16x3xf32>
      %cst_35 = arith.constant dense<0.000000e+00> : vector<128x3xf32>
      %52 = tpu.matmul %49, %51, %cst_35 {dimension_numbers = #tpu.dot_dimension_numbers<[1], [0], [0], [1], [0, 0, 1, 1], [], []>} : vector<128x16xf32>, vector<16x3xf32>, vector<128x3xf32> -> vector<128x3xf32>
      %53 = arith.addf %43, %52 : vector<128x3xf32>
      %54 = vector.extract_strided_slice %48 {offsets = [1, 0], sizes = [128, 16], strides = [1, 1]} : vector<130x16xf32> to vector<128x16xf32>
      %c7 = arith.constant 7 : index
      %c0_36 = arith.constant 0 : index
      %c0_37 = arith.constant 0 : index
      %55 = vector.load %arg3[%c7, %c0_36, %c0_37] : memref<9x16x3xf32, #tpu.memory_space<vmem>>, vector<1x16x3xf32>
      %56 = vector.shape_cast %55 : vector<1x16x3xf32> to vector<16x3xf32>
      %cst_38 = arith.constant dense<0.000000e+00> : vector<128x3xf32>
      %57 = tpu.matmul %54, %56, %cst_38 {dimension_numbers = #tpu.dot_dimension_numbers<[1], [0], [0], [1], [0, 0, 1, 1], [], []>} : vector<128x16xf32>, vector<16x3xf32>, vector<128x3xf32> -> vector<128x3xf32>
      %58 = arith.addf %53, %57 : vector<128x3xf32>
      %59 = vector.extract_strided_slice %48 {offsets = [2, 0], sizes = [128, 16], strides = [1, 1]} : vector<130x16xf32> to vector<128x16xf32>
      %c8 = arith.constant 8 : index
      %c0_39 = arith.constant 0 : index
      %c0_40 = arith.constant 0 : index
      %60 = vector.load %arg3[%c8, %c0_39, %c0_40] : memref<9x16x3xf32, #tpu.memory_space<vmem>>, vector<1x16x3xf32>
      %61 = vector.shape_cast %60 : vector<1x16x3xf32> to vector<16x3xf32>
      %cst_41 = arith.constant dense<0.000000e+00> : vector<128x3xf32>
      %62 = tpu.matmul %59, %61, %cst_41 {dimension_numbers = #tpu.dot_dimension_numbers<[1], [0], [0], [1], [0, 0, 1, 1], [], []>} : vector<128x16xf32>, vector<16x3xf32>, vector<128x3xf32> -> vector<128x3xf32>
      %63 = arith.addf %58, %62 : vector<128x3xf32>
      %64 = vector.broadcast %1 : vector<1x3xf32> to vector<128x3xf32>
      %65 = arith.addf %63, %64 : vector<128x3xf32>
      %c0_42 = arith.constant 0 : index
      %66 = arith.index_cast %arg6 : i32 to index
      %c0_43 = arith.constant 0 : index
      %c0_44 = arith.constant 0 : index
      %67 = vector.load %arg5[%c0_42, %66, %c0_43, %c0_44] : memref<1x64x128x3xf32, #tpu.memory_space<vmem>>, vector<1x1x128x3xf32>
      %68 = vector.shape_cast %67 : vector<1x1x128x3xf32> to vector<128x3xf32>
      %69 = vector.shape_cast %65 : vector<128x3xf32> to vector<1x1x128x3xf32>
      tpu.vector_store %arg5[%c0_42, %66, %c0_43, %c0_44], %69 {strides = array<i32>} : memref<1x64x128x3xf32, #tpu.memory_space<vmem>>, vector<1x1x128x3xf32>,
    }
    %c64_i32_2 = arith.constant 64 : i32
    return
  }
  func.func @transform_0(%arg0: i32, %arg1: i32) -> (i32, i32, i32, i32) {
    %c0_i32 = arith.constant 0 : i32
    %c0_i32_0 = arith.constant 0 : i32
    %c0_i32_1 = arith.constant 0 : i32
    %c0_i32_2 = arith.constant 0 : i32
    return %arg0, %c0_i32, %c0_i32_0, %c0_i32_1 : i32, i32, i32, i32
  }
  func.func @transform_1(%arg0: i32, %arg1: i32) -> (i32, i32, i32) {
    %c0_i32 = arith.constant 0 : i32
    %c0_i32_0 = arith.constant 0 : i32
    %c0_i32_1 = arith.constant 0 : i32
    %c0_i32_2 = arith.constant 0 : i32
    return %c0_i32, %c0_i32_0, %c0_i32_1 : i32, i32, i32
  }
  func.func @transform_2(%arg0: i32, %arg1: i32) -> (i32, i32) {
    %c0_i32 = arith.constant 0 : i32
    %c0_i32_0 = arith.constant 0 : i32
    %c0_i32_1 = arith.constant 0 : i32
    return %c0_i32, %c0_i32_0 : i32, i32
  }
  func.func @transform_3(%arg0: i32, %arg1: i32) -> (i32, i32, i32, i32) {
    %c0_i32 = arith.constant 0 : i32
    %c0_i32_0 = arith.constant 0 : i32
    %c0_i32_1 = arith.constant 0 : i32
    return %arg0, %arg1, %c0_i32, %c0_i32_0 : i32, i32, i32, i32
  }
}

</mosaic_0001>

<bundles_post_ra>
// kernel: tile.18
= control target key start
LH: loop header
LB: loop body
LE: loop exit
PB: predicated region body
PF: predicated region fallthrough
CT: control target
= control target key end

     0   :  { %2 = vsyncpa [#allocation1], 0  ;;  %s44_s6 = smov [#allocation0]   ;;  %s70_s0 = inlined_call_operand.hbm [shape: f32[64], index: 0, kind: input, shape index: {}]   ;;  %s71_s1 = inlined_call_operand.vmem [shape: f32[4,64], index: 1, kind: output, shape index: {}]  }
   0x1   :  { %s9_s7 = sshll.u32 %s44_s6, 4  ;;  %s20_s10 = scalar_lea.hbm %s70_s0, 16  ;;  %s10_s7 = int_to_ptr.vmem [resolvable:$true] %s9_s7 }
   0x2   :  { %p21_p0 = scmp.ne.s32.totalorder %s70_s0, %s20_s10  ;;  %p24_p1 = scmp.lt.u32.totalorder %s20_s10, %s70_s0 }
   0x4   :  { %p26_p2 = pnand %p24_p1, %p21_p0 }
   0x6   :  { %29 = shalt.err (!%p26_p2)
}
   0x7   :  { %s30_s15 = scalar_lea.vmem %s10_s7, 16  ;;  %s34_s16 = scalar_lea.vmem %s10_s7, 32 }
   0x8   :  { %p31_p3 = scmp.ne.s32.totalorder %s10_s7, %s30_s15  ;;  %p35_p4 = scmp.lt.s32.totalorder %s10_s7, %s10_s7 }
   0x9   :  { %p36_p5 = scmp.lt.s32.totalorder %s34_s16, %s30_s15 }
   0xb   :  { %p37_p6 = por %p36_p5, %p35_p4 }
   0xd   :  { %p38_p7 = pnand %p37_p6, %p31_p3 }
   0xf   :  { %41 = shalt.err (!%p38_p7)
}
  0x10   :  { %12 = dma.hbm_to_vmem [thread:$0]  %s70_s0, 16, %s10_s7, [#allocation1]  }
  0x11   :  { %42 = dma.done.wait [#allocation1], 16  }
  0x12   :  { %43 = vsyncadd [#allocation1], 4294967280  ;;  %v16_v0 = vld [vmem:[#allocation0] ss:$0 sm:$0xff] }
  0x13   :  { %17 = vst [vmem:[%s71_s1] sm:$0xf] %v16_v0 }
  0x14   :  { %18 = vsyncpa [#allocation1], 1 }

// kernel: tile.23
= control target key start
LH: loop header
LB: loop body
LE: loop exit
PB: predicated region body
PF: predicated region fallthrough
CT: control target
= control target key end

     0   :  { %2 = vsyncpa [#allocation1], 0  ;;  %s44_s6 = smov [#allocation0]   ;;  %s70_s0 = inlined_call_operand.hbm [shape: f32[32], index: 0, kind: input, shape index: {}]   ;;  %s71_s1 = inlined_call_operand.vmem [shape: f32[4,32], index: 1, kind: output, shape index: {}]  }
   0x1   :  { %s9_s7 = sshll.u32 %s44_s6, 4  ;;  %s20_s10 = scalar_lea.hbm %s70_s0, 16  ;;  %s10_s7 = int_to_ptr.vmem [resolvable:$true] %s9_s7 }
   0x2   :  { %p21_p0 = scmp.ne.s32.totalorder %s70_s0, %s20_s10  ;;  %p24_p1 = scmp.lt.u32.totalorder %s20_s10, %s70_s0 }
   0x4   :  { %p26_p2 = pnand %p24_p1, %p21_p0 }
   0x6   :  { %29 = shalt.err (!%p26_p2)
}
   0x7   :  { %s30_s15 = scalar_lea.vmem %s10_s7, 16  ;;  %s34_s16 = scalar_lea.vmem %s10_s7, 32 }
   0x8   :  { %p31_p3 = scmp.ne.s32.totalorder %s10_s7, %s30_s15  ;;  %p35_p4 = scmp.lt.s32.totalorder %s10_s7, %s10_s7 }
   0x9   :  { %p36_p5 = scmp.lt.s32.totalorder %s34_s16, %s30_s15 }
   0xb   :  { %p37_p6 = por %p36_p5, %p35_p4 }
   0xd   :  { %p38_p7 = pnand %p37_p6, %p31_p3 }
   0xf   :  { %41 = shalt.err (!%p38_p7)
}
  0x10   :  { %12 = dma.hbm_to_vmem [thread:$0]  %s70_s0, 16, %s10_s7, [#allocation1]  }
  0x11   :  { %42 = dma.done.wait [#allocation1], 16  }
  0x12   :  { %43 = vsyncadd [#allocation1], 4294967280  ;;  %v16_v0 = vld [vmem:[#allocation0] ss:$0 sm:$0xff] }
  0x13   :  { %17 = vst [vmem:[%s71_s1] sm:$0xf] %v16_v0 }
  0x14   :  { %18 = vsyncpa [#allocation1], 1 }

// kernel: tile.19
= control target key start
LH: loop header
LB: loop body
LE: loop exit
PB: predicated region body
PF: predicated region fallthrough
CT: control target
= control target key end

     0   :  { %s6_s8 = smov 3  ;;  %vm8_vm0 = vcmask 523264   ;;  %s30_s9 = smov 64   ;;  %vm15_vm1 = vcmask 1048064   ;;  %s50_s0 = inlined_call_operand.vmem [shape: f32[4,64], index: 0, kind: input, shape index: {}]   ;;  %s51_s1 = inlined_call_operand.vmem [shape: f32[1,256], index: 1, kind: output, shape index: {}]  }
   0x1   :  { %v4_v0 = vld [vmem:[%s50_s0] sm:$0xf]  ;;  %s11_s0 = smov 3 }
   0x2   :  { %5 = vst [vmem:[#allocation1] sm:$0xf] %v4_v0 }
   0x9   :  { %v12_v1 = vld [vmem:[#allocation1 + $0x1] ss:$2 sm:%s11_s0]   ;;  %v7_v2 = vld [vmem:[#allocation1] ss:$2 sm:%s6_s8]  }
   0xa   :  { %13 = vrot.lane.b32.xlu0 %v12_v1, %s30_s9  ;;  %9 = vst.msk [vmem:[#allocation0] ss:$8 sm:$0x3] %vm8_vm0, %v7_v2  }
  0x7c   :  { %v14_v3 = vpop.permute.xlu0 %13  }
  0x7d   :  { %16 = vst.msk [vmem:[#allocation0] ss:$8 sm:$0x3] %vm15_vm1, %v14_v3  }
  0x84   :  { %v20_v4 = vld [vmem:[#allocation0] sm:$0x1]  ;;  %v24_v5 = vld [vmem:[#allocation0 + $0x8] sm:$0x1] }
  0x85   :  { %22 = vst [vmem:[%s51_s1] sm:$0x1] %v20_v4  ;;  %28 = vst [vmem:[%s51_s1 + $0x1] sm:$0x1] %v24_v5 }

// kernel: tile.24
= control target key start
LH: loop header
LB: loop body
LE: loop exit
PB: predicated region body
PF: predicated region fallthrough
CT: control target
= control target key end

     0   :  { %vm7_vm0 = vcmask 261120   ;;  %s37_s8 = smov 32   ;;  %s38_s9 = smov 64   ;;  %vm13_vm1 = vcmask 1048320   ;;  %vm19_vm2 = vcmask 785920   ;;  %vm25_vm3 = vcmask 523520   ;;  %s55_s0 = inlined_call_operand.vmem [shape: f32[4,32], index: 0, kind: input, shape index: {}]   ;;  %s56_s1 = inlined_call_operand.vmem [shape: f32[1,128], index: 1, kind: output, shape index: {}]  }
   0x1   :  { %v4_v0 = vld [vmem:[%s55_s0] sm:$0xf]  ;;  %s36_s0 = smov 96  }
   0x2   :  { %5 = vst [vmem:[#allocation1] sm:$0xf] %v4_v0 }
   0x9   :  { %v10_v1 = vld [vmem:[#allocation1 + $0x3] sm:$0x1]   ;;  %v22_v2 = vld [vmem:[#allocation1 + $0x1] sm:$0x1]   ;;  %v6_v3 = vld [vmem:[#allocation1] sm:$0x1]  }
   0xa   :  { %11 = vrot.lane.b32.xlu0 %v10_v1, %s36_s0  ;;  %23 = vrot.lane.b32.xlu1 %v22_v2, %s37_s8  ;;  %v16_v4 = vld [vmem:[#allocation1 + $0x2] sm:$0x1]   ;;  %8 = vst.msk [vmem:[#allocation0] sm:$0x1] %vm7_vm0, %v6_v3  }
   0xe   :  { %17 = vrot.lane.b32.xlu0 %v16_v4, %s38_s9 }
  0x7c   :  { %v12_v5 = vpop.permute.xlu0 %11   ;;  %v24_v6 = vpop.permute.xlu1 %23  }
  0x7d   :  { %14 = vst.msk [vmem:[#allocation0] sm:$0x1] %vm13_vm1, %v12_v5  }
  0x80   :  { %v18_v7 = vpop.permute.xlu0 %17  }
  0x81   :  { %20 = vst.msk [vmem:[#allocation0] sm:$0x1] %vm19_vm2, %v18_v7  }
  0x82   :  { %26 = vst.msk [vmem:[#allocation0] sm:$0x1] %vm25_vm3, %v24_v6  }
  0x89   :  { %v30_v8 = vld [vmem:[#allocation0] sm:$0x1] }
  0x8a   :  { %32 = vst [vmem:[%s56_s1] sm:$0x1] %v30_v8 }

// kernel: tile.28
= control target key start
LH: loop header
LB: loop body
LE: loop exit
PB: predicated region body
PF: predicated region fallthrough
CT: control target
= control target key end

     0   :  { %2 = vsyncpa [#allocation1], 0  ;;  %s44_s6 = smov [#allocation0]   ;;  %s70_s0 = inlined_call_operand.hbm [shape: f32[16], index: 0, kind: input, shape index: {}]   ;;  %s71_s1 = inlined_call_operand.vmem [shape: f32[4,16], index: 1, kind: output, shape index: {}]  }
   0x1   :  { %s9_s7 = sshll.u32 %s44_s6, 4  ;;  %s20_s10 = scalar_lea.hbm %s70_s0, 16  ;;  %s10_s7 = int_to_ptr.vmem [resolvable:$true] %s9_s7 }
   0x2   :  { %p21_p0 = scmp.ne.s32.totalorder %s70_s0, %s20_s10  ;;  %p24_p1 = scmp.lt.u32.totalorder %s20_s10, %s70_s0 }
   0x4   :  { %p26_p2 = pnand %p24_p1, %p21_p0 }
   0x6   :  { %29 = shalt.err (!%p26_p2)
}
   0x7   :  { %s30_s15 = scalar_lea.vmem %s10_s7, 16  ;;  %s34_s16 = scalar_lea.vmem %s10_s7, 32 }
   0x8   :  { %p31_p3 = scmp.ne.s32.totalorder %s10_s7, %s30_s15  ;;  %p35_p4 = scmp.lt.s32.totalorder %s10_s7, %s10_s7 }
   0x9   :  { %p36_p5 = scmp.lt.s32.totalorder %s34_s16, %s30_s15 }
   0xb   :  { %p37_p6 = por %p36_p5, %p35_p4 }
   0xd   :  { %p38_p7 = pnand %p37_p6, %p31_p3 }
   0xf   :  { %41 = shalt.err (!%p38_p7)
}
  0x10   :  { %12 = dma.hbm_to_vmem [thread:$0]  %s70_s0, 16, %s10_s7, [#allocation1]  }
  0x11   :  { %42 = dma.done.wait [#allocation1], 16  }
  0x12   :  { %43 = vsyncadd [#allocation1], 4294967280  ;;  %v16_v0 = vld [vmem:[#allocation0] ss:$0 sm:$0xff] }
  0x13   :  { %17 = vst [vmem:[%s71_s1] sm:$0xf] %v16_v0 }
  0x14   :  { %18 = vsyncpa [#allocation1], 1 }

// kernel: tile.29
= control target key start
LH: loop header
LB: loop body
LE: loop exit
PB: predicated region body
PF: predicated region fallthrough
CT: control target
= control target key end

     0   :  { %vm7_vm0 = vcmask 130048   ;;  %s37_s8 = smov 16   ;;  %s38_s9 = smov 32   ;;  %vm13_vm1 = vcmask 523648   ;;  %vm19_vm2 = vcmask 392448   ;;  %vm25_vm3 = vcmask 261248   ;;  %s55_s0 = inlined_call_operand.vmem [shape: f32[4,16], index: 0, kind: input, shape index: {}]   ;;  %s56_s1 = inlined_call_operand.vmem [shape: f32[1,64], index: 1, kind: output, shape index: {}]  }
   0x1   :  { %v4_v0 = vld [vmem:[%s55_s0] sm:$0xf]  ;;  %s36_s0 = smov 48  }
   0x2   :  { %5 = vst [vmem:[#allocation1] sm:$0xf] %v4_v0 }
   0x9   :  { %v10_v1 = vld [vmem:[#allocation1 + $0x3] sm:$0x1]   ;;  %v22_v2 = vld [vmem:[#allocation1 + $0x1] sm:$0x1]   ;;  %v6_v3 = vld [vmem:[#allocation1] sm:$0x1]  }
   0xa   :  { %11 = vrot.lane.b32.xlu0 %v10_v1, %s36_s0  ;;  %23 = vrot.lane.b32.xlu1 %v22_v2, %s37_s8  ;;  %v16_v4 = vld [vmem:[#allocation1 + $0x2] sm:$0x1]   ;;  %8 = vst.msk [vmem:[#allocation0] sm:$0x1] %vm7_vm0, %v6_v3  }
   0xe   :  { %17 = vrot.lane.b32.xlu0 %v16_v4, %s38_s9 }
  0x7c   :  { %v12_v5 = vpop.permute.xlu0 %11   ;;  %v24_v6 = vpop.permute.xlu1 %23  }
  0x7d   :  { %14 = vst.msk [vmem:[#allocation0] sm:$0x1] %vm13_vm1, %v12_v5  }
  0x80   :  { %v18_v7 = vpop.permute.xlu0 %17  }
  0x81   :  { %20 = vst.msk [vmem:[#allocation0] sm:$0x1] %vm19_vm2, %v18_v7  }
  0x82   :  { %26 = vst.msk [vmem:[#allocation0] sm:$0x1] %vm25_vm3, %v24_v6  }
  0x89   :  { %v30_v8 = vld [vmem:[#allocation0] sm:$0x1] }
  0x8a   :  { %32 = vst [vmem:[%s56_s1] sm:$0x1] %v30_v8 }

// kernel: decoder_forward.4
= control target key start
LH: loop header
LB: loop body
LE: loop exit
PB: predicated region body
PF: predicated region fallthrough
CT: control target
= control target key end

     0   :  { %s1165_s12 = smov 0   ;;  %s1167_s13 = smov 0   ;;  %s1645_s0 = inlined_call_operand.vmem [shape: f32[2,17,17,128], index: 0, kind: input, shape index: {}]   ;;  %s1646_s1 = inlined_call_operand.vmem [shape: f32[4,128,256], index: 1, kind: input, shape index: {}]   ;;  %s1647_s2 = inlined_call_operand.vmem [shape: f32[1,256], index: 2, kind: input, shape index: {}]   ;;  %s1648_s3 = inlined_call_operand.vmem [shape: f32[2,32,16,128], index: 3, kind: output, shape index: {}]  }
   0x1   :  { %s1169_s14 = smov 0  }
   0x2 LB: > { %s25_s15 = sadd.s32 1, %s1134_s13  ;;  %p824_p0 = scmp.ge.s32.totalorder %s1138_s14, 1  ;;  %s1138_s14 = sphi %s1169_s14, %s13_s14   ;;  %s1134_s13 = sphi %s1167_s13, %s1650_s13   ;;  %s1130_s12 = sphi %s1165_s12, %s1649_s12  }
   0x3   : > { %p27_p1 = scmp.ge.s32.totalorder %s25_s15, 2  ;;  %p151_p2 = scmp.lt.s32.totalorder %s1138_s14, 3 }
   0x5   : > { %s1652_s15 = smov (%p27_p1, %s25_s15), 0  ;;  %p152_p3 = pnand %p824_p0, %p151_p2 }
   0x6   : > { %p180_p4 = scmp.lt.s32.totalorder (!%p152_p3), %s1130_s12, 1  ;;  %v1186_v0 = vld [vmem:[%s1647_s2] sm:$0x3] (!%p152_p3)  ;;  %s1198_s26 = smov (!%p152_p3), 0  }
   0x7   : > { %155 = sbr.rel (%p152_p3) target bundleno = 310 (0x136), region = 32 }
   0xe   : > { %s1654_s12 = smov (!%p180_p4, %s1130_s12), 1 }
   0xf   : > { %s1078_s18 = smul.u32 408, %s1654_s12  ;;  %s935_s19 = sshll.u32 %s1654_s12, 9 }
  0x10   : > { %s1191_s22 = scalar_lea.vmem %s1648_s3, %s935_s19 }
  0x11   : > { %s1196_s25 = scalar_lea.vmem %s1645_s0, %s1078_s18 }
  0x12 LB: >> { %v829_v1 = vld [vmem:[%s1646_s1 + $0x108] sm:$0xff]  ;;  %v831_v2 = vld [vmem:[%s1646_s1 + $0x118] sm:$0xff]  ;;  %v828_v6 = vld [vmem:[%s1646_s1 + $0x100] sm:$0xff]  ;;  %v1144_v8 = vmov 0.0   ;;  %s205_s19 = smul.u32 24, %s1142_s26  ;;  %vm278_vm0 = vcmask 1046528   ;;  %s1142_s26 = sphi %s1198_s26, %s203_s26  }
  0x13   : >> { %v864_v3 = vld [vmem:[%s1646_s1 + $0x208] sm:$0xff]  ;;  %v938_v4 = vpack.c.bf16 %v831_v2, %v829_v1  ;;  %v866_v5 = vld [vmem:[%s1646_s1 + $0x218] sm:$0xff]  ;;  %v830_v7 = vld [vmem:[%s1646_s1 + $0x110] sm:$0xff]  ;;  %350 = vmatprep.mubr.f32.mxu1 %v1144_v8  ;;  %543 = vmatprep.mubr.f32.mxu0 %v1144_v8 }
  0x14   : >> { %v1002_v9 = vpack.c.bf16 %v866_v5, %v864_v3  ;;  %v940_v10 = vpack.c.bf16 %v830_v7, %v828_v6  ;;  %v863_v11 = vld [vmem:[%s1646_s1 + $0x200] sm:$0xff]  ;;  %v865_v12 = vld [vmem:[%s1646_s1 + $0x210] sm:$0xff]  ;;  %v833_v13 = vld [vmem:[%s1646_s1 + $0x128] sm:$0xff]  ;;  %s1381_s12 = scalar_lea.vmem %s1196_s25, %s205_s19 }
  0x15   : >> { %939 = vmatprep.subr.bf16.mxu1 %v938_v4  ;;  %v1004_v14 = vpack.c.bf16 %v865_v12, %v863_v11  ;;  %v835_v15 = vld [vmem:[%s1646_s1 + $0x138] sm:$0xff]  ;;  %v868_v16 = vld [vmem:[%s1646_s1 + $0x228] sm:$0xff]  ;;  %v832_v20 = vld [vmem:[%s1646_s1 + $0x120] sm:$0xff] }
  0x16   : >> { %v870_v17 = vld [vmem:[%s1646_s1 + $0x238] sm:$0xff]  ;;  %1003 = vmatprep.subr.bf16.mxu0 %v1002_v9  ;;  %941 = vmatpush1.bf16.msra.mxu1 %v940_v10  ;;  %v942_v18 = vpack.c.bf16 %v835_v15, %v833_v13  ;;  %v834_v21 = vld [vmem:[%s1646_s1 + $0x130] sm:$0xff]  ;;  %v867_v22 = vld [vmem:[%s1646_s1 + $0x220] sm:$0xff] }
  0x17   : >> { %v1006_v19 = vpack.c.bf16 %v870_v17, %v868_v16  ;;  %1005 = vmatpush1.bf16.msra.mxu0 %v1004_v14  ;;  %v944_v23 = vpack.c.bf16 %v834_v21, %v832_v20  ;;  %v869_v24 = vld [vmem:[%s1646_s1 + $0x230] sm:$0xff]  ;;  %v837_v25 = vld [vmem:[%s1646_s1 + $0x148] sm:$0xff]  ;;  %v839_v26 = vld [vmem:[%s1646_s1 + $0x158] sm:$0xff] }
  0x18   : >> { %943 = vmatprep.subr.bf16.mxu1 %v942_v18  ;;  %v1008_v27 = vpack.c.bf16 %v869_v24, %v867_v22  ;;  %v946_v28 = vpack.c.bf16 %v839_v26, %v837_v25  ;;  %v872_v29 = vld [vmem:[%s1646_s1 + $0x248] sm:$0xff]  ;;  %v874_v30 = vld [vmem:[%s1646_s1 + $0x258] sm:$0xff]  ;;  %v836_v31 = vld [vmem:[%s1646_s1 + $0x140] sm:$0xff] }
  0x19   : >> { %1007 = vmatprep.subr.bf16.mxu0 %v1006_v19  ;;  %v1010_v32 = vpack.c.bf16 %v874_v30, %v872_v29  ;;  %v838_v33 = vld [vmem:[%s1646_s1 + $0x150] sm:$0xff]  ;;  %v871_v34 = vld [vmem:[%s1646_s1 + $0x240] sm:$0xff]  ;;  %v841_v37 = vld [vmem:[%s1646_s1 + $0x168] sm:$0xff] }
  0x1a   : >> { %v873_v35 = vld [vmem:[%s1646_s1 + $0x250] sm:$0xff]  ;;  %945 = vmatpush1.bf16.msra.mxu1 %v944_v23  ;;  %v948_v36 = vpack.c.bf16 %v838_v33, %v836_v31  ;;  %v843_v38 = vld [vmem:[%s1646_s1 + $0x178] sm:$0xff]  ;;  %v876_v39 = vld [vmem:[%s1646_s1 + $0x268] sm:$0xff] }
  0x1b   : >> { %1009 = vmatpush1.bf16.msra.mxu0 %v1008_v27  ;;  %947 = vmatprep.subr.bf16.mxu1 %v946_v28  ;;  %v1012_v40 = vpack.c.bf16 %v873_v35, %v871_v34  ;;  %v950_v41 = vpack.c.bf16 %v843_v38, %v841_v37  ;;  %v878_v42 = vld [vmem:[%s1646_s1 + $0x278] sm:$0xff]  ;;  %v840_v43 = vld [vmem:[%s1646_s1 + $0x160] sm:$0xff]  ;;  %v842_v44 = vld [vmem:[%s1646_s1 + $0x170] sm:$0xff] }
  0x1c   : >> { %1011 = vmatprep.subr.bf16.mxu0 %v1010_v32  ;;  %v1014_v45 = vpack.c.bf16 %v878_v42, %v876_v39  ;;  %v875_v46 = vld [vmem:[%s1646_s1 + $0x260] sm:$0xff]  ;;  %v877_v47 = vld [vmem:[%s1646_s1 + $0x270] sm:$0xff]  ;;  %v845_v48 = vld [vmem:[%s1646_s1 + $0x188] sm:$0xff]  ;;  %v952_v52 = vpack.c.bf16 %v842_v44, %v840_v43 }
  0x1d   : >> { %v847_v49 = vld [vmem:[%s1646_s1 + $0x198] sm:$0xff]  ;;  %v880_v50 = vld [vmem:[%s1646_s1 + $0x288] sm:$0xff]  ;;  %v1016_v53 = vpack.c.bf16 %v877_v47, %v875_v46  ;;  %v844_v55 = vld [vmem:[%s1646_s1 + $0x180] sm:$0xff] }
  0x1e   : >> { %v882_v51 = vld [vmem:[%s1646_s1 + $0x298] sm:$0xff]  ;;  %949 = vmatpush1.bf16.msra.mxu1 %v948_v36  ;;  %v954_v54 = vpack.c.bf16 %v847_v49, %v845_v48  ;;  %v846_v56 = vld [vmem:[%s1646_s1 + $0x190] sm:$0xff]  ;;  %v879_v57 = vld [vmem:[%s1646_s1 + $0x280] sm:$0xff] }
  0x1f   : >> { %1013 = vmatpush1.bf16.msra.mxu0 %v1012_v40  ;;  %951 = vmatprep.subr.bf16.mxu1 %v950_v41  ;;  %v1018_v58 = vpack.c.bf16 %v882_v51, %v880_v50  ;;  %v881_v59 = vld [vmem:[%s1646_s1 + $0x290] sm:$0xff]  ;;  %v849_v60 = vld [vmem:[%s1646_s1 + $0x1a8] sm:$0xff]  ;;  %v851_v61 = vld [vmem:[%s1646_s1 + $0x1b8] sm:$0xff]  ;;  %v956_v1 = vpack.c.bf16 %v846_v56, %v844_v55 }
  0x20   : >> { %1015 = vmatprep.subr.bf16.mxu0 %v1014_v45  ;;  %v884_v62 = vld [vmem:[%s1646_s1 + $0x2a8] sm:$0xff]  ;;  %v886_v63 = vld [vmem:[%s1646_s1 + $0x2b8] sm:$0xff]  ;;  %v1020_v2 = vpack.c.bf16 %v881_v59, %v879_v57  ;;  %v958_v3 = vpack.c.bf16 %v851_v61, %v849_v60  ;;  %v848_v4 = vld [vmem:[%s1646_s1 + $0x1a0] sm:$0xff] }
  0x21   : >> { %v850_v5 = vld [vmem:[%s1646_s1 + $0x1b0] sm:$0xff]  ;;  %v883_v6 = vld [vmem:[%s1646_s1 + $0x2a0] sm:$0xff]  ;;  %v1022_v7 = vpack.c.bf16 %v886_v63, %v884_v62  ;;  %v853_v10 = vld [vmem:[%s1646_s1 + $0x1c8] sm:$0xff] }
  0x22   : >> { %953 = vmatpush1.bf16.msra.mxu1 %v952_v52  ;;  %v885_v9 = vld [vmem:[%s1646_s1 + $0x2b0] sm:$0xff]  ;;  %v855_v11 = vld [vmem:[%s1646_s1 + $0x1d8] sm:$0xff]  ;;  %v888_v12 = vld [vmem:[%s1646_s1 + $0x2c8] sm:$0xff]  ;;  %v960_v14 = vpack.c.bf16 %v850_v5, %v848_v4 }
  0x23   : >> { %1017 = vmatpush1.bf16.msra.mxu0 %v1016_v53  ;;  %955 = vmatprep.subr.bf16.mxu1 %v954_v54  ;;  %v890_v13 = vld [vmem:[%s1646_s1 + $0x2d8] sm:$0xff]  ;;  %v1024_v15 = vpack.c.bf16 %v885_v9, %v883_v6  ;;  %v962_v16 = vpack.c.bf16 %v855_v11, %v853_v10  ;;  %v852_v17 = vld [vmem:[%s1646_s1 + $0x1c0] sm:$0xff]  ;;  %v854_v18 = vld [vmem:[%s1646_s1 + $0x1d0] sm:$0xff] }
  0x24   : >> { %1019 = vmatprep.subr.bf16.mxu0 %v1018_v58  ;;  %v887_v19 = vld [vmem:[%s1646_s1 + $0x2c0] sm:$0xff]  ;;  %v1026_v20 = vpack.c.bf16 %v890_v13, %v888_v12  ;;  %v889_v21 = vld [vmem:[%s1646_s1 + $0x2d0] sm:$0xff]  ;;  %v857_v22 = vld [vmem:[%s1646_s1 + $0x1e8] sm:$0xff]  ;;  %v964_v26 = vpack.c.bf16 %v854_v18, %v852_v17 }
  0x25   : >> { %v859_v23 = vld [vmem:[%s1646_s1 + $0x1f8] sm:$0xff]  ;;  %v892_v24 = vld [vmem:[%s1646_s1 + $0x2e8] sm:$0xff]  ;;  %v856_v27 = vld [vmem:[%s1646_s1 + $0x1e0] sm:$0xff]  ;;  %v1028_v29 = vpack.c.bf16 %v889_v21, %v887_v19 }
  0x26   : >> { %957 = vmatpush1.bf16.msra.mxu1 %v956_v1  ;;  %v894_v25 = vld [vmem:[%s1646_s1 + $0x2f8] sm:$0xff]  ;;  %v858_v28 = vld [vmem:[%s1646_s1 + $0x1f0] sm:$0xff]  ;;  %v966_v30 = vpack.c.bf16 %v859_v23, %v857_v22  ;;  %v891_v31 = vld [vmem:[%s1646_s1 + $0x2e0] sm:$0xff] }
  0x27   : >> { %1021 = vmatpush1.bf16.msra.mxu0 %v1020_v2  ;;  %959 = vmatprep.subr.bf16.mxu1 %v958_v3  ;;  %v1399_v32 = vld [vmem:[%s1381_s12] sm:$0xff]  ;;  %v1402_v33 = vld [vmem:[%s1381_s12 + $0x8] sm:$0xff]  ;;  %v1030_v34 = vpack.c.bf16 %v894_v25, %v892_v24  ;;  %v893_v35 = vld [vmem:[%s1646_s1 + $0x2f0] sm:$0xff]  ;;  %v968_v40 = vpack.c.bf16 %v858_v28, %v856_v27 }
  0x28   : >> { %1023 = vmatprep.subr.bf16.mxu0 %v1022_v7  ;;  %v211_v36 = vld [vmem:[%s1646_s1 + $0x8] sm:$0xff]  ;;  %v213_v37 = vld [vmem:[%s1646_s1 + $0x18] sm:$0xff]  ;;  %v279_v41 = vrot.slane %v1399_v32, 1  ;;  %v280_v42 = vrot.slane %v1402_v33, 1  ;;  %v1032_v43 = vpack.c.bf16 %v893_v35, %v891_v31  ;;  %v210_v45 = vld [vmem:[%s1646_s1] sm:$0xff] }
  0x29   : >> { %v896_v38 = vld [vmem:[%s1646_s1 + $0x308] sm:$0xff]  ;;  %v898_v39 = vld [vmem:[%s1646_s1 + $0x318] sm:$0xff]  ;;  %v970_v44 = vpack.c.bf16 %v213_v37, %v211_v36  ;;  %v212_v46 = vld [vmem:[%s1646_s1 + $0x10] sm:$0xff] }
  0x2a   : >> { %961 = vmatpush1.bf16.msra.mxu1 %v960_v14  ;;  %v895_v47 = vld [vmem:[%s1646_s1 + $0x300] sm:$0xff]  ;;  %v1034_v48 = vpack.c.bf16 %v898_v39, %v896_v38  ;;  %v897_v49 = vld [vmem:[%s1646_s1 + $0x310] sm:$0xff]  ;;  %v215_v50 = vld [vmem:[%s1646_s1 + $0x28] sm:$0xff]  ;;  %v281_v54 = vsel %vm278_vm0, %v279_v41, %v280_v42  ;;  %v972_v55 = vpack.c.bf16 %v212_v46, %v210_v45 }
  0x2b   : >> { %1025 = vmatpush1.bf16.msra.mxu0 %v1024_v15  ;;  %963 = vmatprep.subr.bf16.mxu1 %v962_v16  ;;  %v217_v51 = vld [vmem:[%s1646_s1 + $0x38] sm:$0xff]  ;;  %v900_v52 = vld [vmem:[%s1646_s1 + $0x328] sm:$0xff]  ;;  %v1036_v57 = vpack.c.bf16 %v897_v49, %v895_v47  ;;  %v214_v59 = vld [vmem:[%s1646_s1 + $0x20] sm:$0xff] }
  0x2c   : >> { %1027 = vmatprep.subr.bf16.mxu0 %v1026_v20  ;;  %v902_v53 = vld [vmem:[%s1646_s1 + $0x338] sm:$0xff]  ;;  %v974_v58 = vpack.c.bf16 %v217_v51, %v215_v50  ;;  %v216_v60 = vld [vmem:[%s1646_s1 + $0x30] sm:$0xff]  ;;  %v899_v61 = vld [vmem:[%s1646_s1 + $0x320] sm:$0xff] }
  0x2d   : >> { %v1449_v56 = vld [vmem:[%s1381_s12 + $0x18] sm:$0xff]  ;;  %v1038_v62 = vpack.c.bf16 %v902_v53, %v900_v52  ;;  %v901_v63 = vld [vmem:[%s1646_s1 + $0x330] sm:$0xff]  ;;  %v219_v1 = vld [vmem:[%s1646_s1 + $0x48] sm:$0xff]  ;;  %v976_v5 = vpack.c.bf16 %v216_v60, %v214_v59 }
  0x2e   : >> { %965 = vmatpush1.bf16.msra.mxu1 %v964_v26  ;;  %v221_v2 = vld [vmem:[%s1646_s1 + $0x58] sm:$0xff]  ;;  %v904_v3 = vld [vmem:[%s1646_s1 + $0x348] sm:$0xff]  ;;  %v1040_v6 = vpack.c.bf16 %v901_v63, %v899_v61  ;;  %v218_v9 = vld [vmem:[%s1646_s1 + $0x40] sm:$0xff] }
  0x2f   : >> { %1029 = vmatpush1.bf16.msra.mxu0 %v1028_v29  ;;  %967 = vmatprep.subr.bf16.mxu1 %v966_v30  ;;  %v906_v4 = vld [vmem:[%s1646_s1 + $0x358] sm:$0xff]  ;;  %v978_v7 = vpack.c.bf16 %v221_v2, %v219_v1  ;;  %v220_v10 = vld [vmem:[%s1646_s1 + $0x50] sm:$0xff]  ;;  %v903_v11 = vld [vmem:[%s1646_s1 + $0x340] sm:$0xff] }
  0x30   : >> { %1031 = vmatprep.subr.bf16.mxu0 %v1030_v34  ;;  %v1042_v12 = vpack.c.bf16 %v906_v4, %v904_v3  ;;  %v905_v13 = vld [vmem:[%s1646_s1 + $0x350] sm:$0xff]  ;;  %v223_v14 = vld [vmem:[%s1646_s1 + $0x68] sm:$0xff]  ;;  %v225_v15 = vld [vmem:[%s1646_s1 + $0x78] sm:$0xff]  ;;  %v980_v18 = vpack.c.bf16 %v220_v10, %v218_v9 }
  0x31   : >> { %v908_v16 = vld [vmem:[%s1646_s1 + $0x368] sm:$0xff]  ;;  %v910_v17 = vld [vmem:[%s1646_s1 + $0x378] sm:$0xff]  ;;  %v222_v19 = vld [vmem:[%s1646_s1 + $0x60] sm:$0xff]  ;;  %v1044_v21 = vpack.c.bf16 %v905_v13, %v903_v11  ;;  %v982_v22 = vpack.c.bf16 %v225_v15, %v223_v14 }
  0x32   : >> { %969 = vmatpush1.bf16.msra.mxu1 %v968_v40  ;;  %v224_v20 = vld [vmem:[%s1646_s1 + $0x70] sm:$0xff]  ;;  %v907_v23 = vld [vmem:[%s1646_s1 + $0x360] sm:$0xff]  ;;  %v1046_v26 = vpack.c.bf16 %v910_v17, %v908_v16  ;;  %v227_v27 = vld [vmem:[%s1646_s1 + $0x88] sm:$0xff] }
  0x33   : >> { %1033 = vmatpush1.bf16.msra.mxu0 %v1032_v43  ;;  %971 = vmatprep.subr.bf16.mxu1 %v970_v44  ;;  %v909_v24 = vld [vmem:[%s1646_s1 + $0x370] sm:$0xff]  ;;  %v229_v28 = vld [vmem:[%s1646_s1 + $0x98] sm:$0xff]  ;;  %v1522_v30 = vld [vmem:[%s1381_s12 + $0x20] sm:$0xff]  ;;  %v984_v35 = vpack.c.bf16 %v224_v20, %v222_v19  ;;  %v596_v20 = vrot.slane %v1449_v56, 1 }
  0x34   : >> { %1035 = vmatprep.subr.bf16.mxu0 %v1034_v48  ;;  %v209_v25 = vld [vmem:[%s1381_s12 + $0x10] sm:$0x1]  ;;  %v912_v31 = vld [vmem:[%s1646_s1 + $0x388] sm:$0xff]  ;;  %v914_v34 = vld [vmem:[%s1646_s1 + $0x398] sm:$0xff]  ;;  %v1048_v37 = vpack.c.bf16 %v909_v24, %v907_v23  ;;  %v986_v38 = vpack.c.bf16 %v229_v28, %v227_v27 }
  0x35   : >> { %351 = vmatmul.mubr.f32.vlgmr.msra.gmra.mrb[0].mxu1 %v281_v54  ;;  %v282_v29 = vrot.slane %v209_v25, 1  ;;  %v226_v39 = vld [vmem:[%s1646_s1 + $0x80] sm:$0xff]  ;;  %v228_v40 = vld [vmem:[%s1646_s1 + $0x90] sm:$0xff]  ;;  %v231_v44 = vld [vmem:[%s1646_s1 + $0xa8] sm:$0xff] }
  0x36   : >> { %973 = vmatpush1.bf16.msra.mxu1 %v972_v55  ;;  %544 = vmatmul.mubr.f32.vlgmr.msra.gmra.mrb[0].mxu0 %v1449_v56  ;;  %v911_v41 = vld [vmem:[%s1646_s1 + $0x380] sm:$0xff]  ;;  %v913_v43 = vld [vmem:[%s1646_s1 + $0x390] sm:$0xff]  ;;  %v233_v45 = vld [vmem:[%s1646_s1 + $0xb8] sm:$0xff]  ;;  %v988_v48 = vpack.c.bf16 %v228_v40, %v226_v39 }
  0x37   : >> { %1037 = vmatpush1.bf16.msra.mxu0 %v1036_v57  ;;  %975 = vmatprep.subr.bf16.mxu1 %v974_v58  ;;  %v283_v36 = vsel %vm278_vm0, %v280_v42, %v282_v29  ;;  %v1050_v42 = vpack.c.bf16 %v914_v34, %v912_v31  ;;  %v916_v46 = vld [vmem:[%s1646_s1 + $0x3a8] sm:$0xff]  ;;  %v918_v47 = vld [vmem:[%s1646_s1 + $0x3b8] sm:$0xff]  ;;  %v1052_v49 = vpack.c.bf16 %v913_v43, %v911_v41  ;;  %v230_v51 = vld [vmem:[%s1646_s1 + $0xa0] sm:$0xff] }
  0x38   : >> { %1039 = vmatprep.subr.bf16.mxu0 %v1038_v62  ;;  %356 = vmatprep.mubr.f32.mxu1 %v1144_v8  ;;  %v990_v50 = vpack.c.bf16 %v233_v45, %v231_v44  ;;  %v232_v52 = vld [vmem:[%s1646_s1 + $0xb0] sm:$0xff]  ;;  %v915_v53 = vld [vmem:[%s1646_s1 + $0x3a0] sm:$0xff]  ;;  %v1054_v54 = vpack.c.bf16 %v918_v47, %v916_v46  ;;  %v235_v57 = vld [vmem:[%s1646_s1 + $0xc8] sm:$0xff] }
  0x39   : >> { %549 = vmatprep.mubr.f32.mxu0 %v1144_v8  ;;  %357 = vmatmul.mubr.f32.gmra.mrb[2].mxu1 %v283_v36  ;;  %v917_v55 = vld [vmem:[%s1646_s1 + $0x3b0] sm:$0xff]  ;;  %v237_v58 = vld [vmem:[%s1646_s1 + $0xd8] sm:$0xff]  ;;  %v920_v59 = vld [vmem:[%s1646_s1 + $0x3c8] sm:$0xff]  ;;  %v992_v61 = vpack.c.bf16 %v232_v52, %v230_v51 }
  0x3a   : >> { %977 = vmatpush1.bf16.msra.mxu1 %v976_v5  ;;  %550 = vmatmul.mubr.f32.gmra.mrb[2].mxu0 %v1522_v30  ;;  %v922_v60 = vld [vmem:[%s1646_s1 + $0x3d8] sm:$0xff]  ;;  %v1056_v62 = vpack.c.bf16 %v917_v55, %v915_v53  ;;  %v994_v63 = vpack.c.bf16 %v237_v58, %v235_v57  ;;  %v234_v1 = vld [vmem:[%s1646_s1 + $0xc0] sm:$0xff]  ;;  %v236_v2 = vld [vmem:[%s1646_s1 + $0xd0] sm:$0xff] }
  0x3b   : >> { %1041 = vmatpush1.bf16.msra.mxu0 %v1040_v6  ;;  %979 = vmatprep.subr.bf16.mxu1 %v978_v7  ;;  %v919_v3 = vld [vmem:[%s1646_s1 + $0x3c0] sm:$0xff]  ;;  %v1058_v4 = vpack.c.bf16 %v922_v60, %v920_v59  ;;  %v921_v5 = vld [vmem:[%s1646_s1 + $0x3d0] sm:$0xff]  ;;  %v239_v6 = vld [vmem:[%s1646_s1 + $0xe8] sm:$0xff]  ;;  %v996_v11 = vpack.c.bf16 %v236_v2, %v234_v1 }
  0x3c   : >> { %1043 = vmatprep.subr.bf16.mxu0 %v1042_v12  ;;  %667 = vmatprep.mubr.f32.mxu0 %v1144_v8  ;;  %v241_v7 = vld [vmem:[%s1646_s1 + $0xf8] sm:$0xff]  ;;  %v924_v9 = vld [vmem:[%s1646_s1 + $0x3e8] sm:$0xff]  ;;  %v1060_v12 = vpack.c.bf16 %v921_v5, %v919_v3  ;;  %v238_v14 = vld [vmem:[%s1646_s1 + $0xe0] sm:$0xff] }
  0x3d   : >> { %427 = vmatprep.mubr.f32.mxu1 %v1144_v8  ;;  %v926_v10 = vld [vmem:[%s1646_s1 + $0x3f8] sm:$0xff]  ;;  %v998_v13 = vpack.c.bf16 %v241_v7, %v239_v6  ;;  %v240_v15 = vld [vmem:[%s1646_s1 + $0xf0] sm:$0xff]  ;;  %v923_v17 = vld [vmem:[%s1646_s1 + $0x3e0] sm:$0xff] }
  0x3e   : >> { %981 = vmatpush1.bf16.msra.mxu1 %v980_v18  ;;  %v1062_v16 = vpack.c.bf16 %v926_v10, %v924_v9  ;;  %v925_v18 = vld [vmem:[%s1646_s1 + $0x3f0] sm:$0xff]  ;;  %v1000_v19 = vpack.c.bf16 %v240_v15, %v238_v14  ;;  %v862_v23 = vld [vmem:[%s1381_s12 + $0x28] sm:$0x1]  ;;  %s936_s12 = sshll.u32 %s1142_s26, 5  ;;  %s203_s26 = sadd.s32 1, %s1142_s26  }
  0x3f   : >> { %1045 = vmatpush1.bf16.msra.mxu0 %v1044_v21  ;;  %983 = vmatprep.subr.bf16.mxu1 %v982_v22  ;;  %v597_v21 = vrot.slane %v1522_v30, 1  ;;  %v1064_v22 = vpack.c.bf16 %v925_v18, %v923_v17  ;;  %v599_v25 = vrot.slane %v862_v23, 1  ;;  %s705_s16 = scalar_lea.vmem %s1191_s22, %s936_s12  ;;  %p200_p5 = scmp.ge.s32.totalorder %s203_s26, 16  }
  0x40   : >> { %1047 = vmatprep.subr.bf16.mxu0 %v1046_v26  ;;  %v685_v26 = vlaneseq }
  0x41   : >> { %v598_v24 = vsel %vm278_vm0, %v596_v20, %v597_v21  ;;  %v600_v56 = vsel %vm278_vm0, %v597_v21, %v599_v25 }
  0x42   : >> { %985 = vmatpush1.bf16.msra.mxu1 %v984_v35  ;;  %v686_v27 = vshrl.u32 %v685_v26, 7 }
  0x43   : >> { %1049 = vmatpush1.bf16.msra.mxu0 %v1048_v37  ;;  %987 = vmatprep.subr.bf16.mxu1 %v986_v38 }
  0x44   : >> { %1051 = vmatprep.subr.bf16.mxu0 %v1050_v42  ;;  %v687_v28 = vsub.s32 0, %v686_v27  ;;  %v691_v29 = vsub.s32 1, %v686_v27 }
  0x46   : >> { %989 = vmatpush1.bf16.msra.mxu1 %v988_v48  ;;  %v688_v31 = vrot.slane %v1186_v0, %v687_v28  ;;  %v692_v35 = vrot.slane %v1186_v0, %v691_v29 }
  0x47   : >> { %1053 = vmatpush1.bf16.msra.mxu0 %v1052_v49  ;;  %991 = vmatprep.subr.bf16.mxu1 %v990_v50 }
  0x48   : >> { %1055 = vmatprep.subr.bf16.mxu0 %v1054_v54 }
  0x4a   : >> { %993 = vmatpush1.bf16.msra.mxu1 %v992_v61 }
  0x4b   : >> { %1057 = vmatpush1.bf16.msra.mxu0 %v1056_v62  ;;  %995 = vmatprep.subr.bf16.mxu1 %v994_v63 }
  0x4c   : >> { %1059 = vmatprep.subr.bf16.mxu0 %v1058_v4 }
  0x4e   : >> { %997 = vmatpush1.bf16.msra.mxu1 %v996_v11 }
  0x4f   : >> { %1061 = vmatpush1.bf16.msra.mxu0 %v1060_v12  ;;  %999 = vmatprep.subr.bf16.mxu1 %v998_v13 }
  0x50   : >> { %1063 = vmatprep.subr.bf16.mxu0 %v1062_v16 }
  0x52   : >> { %1001 = vmatpush1.bf16.msra.mxu1 %v1000_v19 }
  0x53   : >> { %1065 = vmatpush1.bf16.msra.mxu0 %v1064_v22 }
  0x55   : >> { %428 = vmatmul.mubr.f32.vlgmr.msra.gmra.mrb[0].mxu1 %v1399_v32 }
  0x56   : >> { %668 = vmatmul.mubr.f32.vlgmr.msra.gmra.mrb[0].mxu0 %v598_v24  ;;  %433 = vmatprep.mubr.f32.mxu1 %v1144_v8 }
  0x57   : >> { %673 = vmatprep.mubr.f32.mxu0 %v1144_v8 }
  0x59   : >> { %434 = vmatmul.mubr.f32.gmra.mrb[2].mxu1 %v1402_v33 }
  0x5a   : >> { %674 = vmatmul.mubr.f32.gmra.mrb[2].mxu0 %v600_v56 }
 0x128   : >> { %v429_v30 = vpop.f32.mrb[0].mxu1 }
 0x129   : >> { %v669_v32 = vpop.f32.mrb[0].mxu0  ;;  %v431_v34 = vpop.f32.mrb[1].mxu1 }
 0x12a   : >> { %v1066_v36 = vadd.f32 %v669_v32, %v429_v30  ;;  %v671_v8 = vpop.f32.mrb[1].mxu0 }
 0x12b   : >> { %v1067_v37 = vadd.f32 %v671_v8, %v431_v34 }
 0x12c   : >> { %v695_v38 = vadd.f32 %v1066_v36, %v688_v31  ;;  %v435_v39 = vpop.f32.mrb[2].mxu1 }
 0x12d   : >> { %v696_v33 = vadd.f32 %v1067_v37, %v692_v35  ;;  %v675_v40 = vpop.f32.mrb[2].mxu0  ;;  %v437_v41 = vpop.f32.mrb[3].mxu1 }
 0x12e   : >> { %v699_v42 = vmax.f32 %v695_v38, 0.0  ;;  %v1068_v43 = vadd.f32 %v675_v40, %v435_v39  ;;  %v677_v44 = vpop.f32.mrb[3].mxu0 }
 0x12f   : >> { %v700_v45 = vmax.f32 %v696_v33, 0.0  ;;  %v1069_v46 = vadd.f32 %v677_v44, %v437_v41  ;;  %202 = sbr.rel (!%p200_p5) target bundleno = 18 (0x12), region = 76 }
 0x130   : >> { %706 = vst [vmem:[%s705_s16] sm:$0xff] %v699_v42  ;;  %v697_v47 = vadd.f32 %v1068_v43, %v688_v31 }
 0x131   : >> { %931 = vst [vmem:[%s705_s16 + $0x10] sm:$0xff] %v700_v45  ;;  %v698_v48 = vadd.f32 %v1069_v46, %v692_v35 }
 0x132   : >> { %v701_v49 = vmax.f32 %v697_v47, 0.0 }
 0x133   : >> { %v702_v50 = vmax.f32 %v698_v48, 0.0 }
 0x134   : >> { %707 = vst [vmem:[%s705_s16 + $0x8] sm:$0xff] %v701_v49 }
 0x135   : >> { %932 = vst [vmem:[%s705_s16 + $0x18] sm:$0xff] %v702_v50 }
 0x136 PF: > { %s13_s14 = sadd.s32 1, %s1138_s14   ;;  %s1649_s12 = smov %s1134_s13 }
 0x137   : > { %p10_p6 = scmp.ge.s32.totalorder %s13_s14, 4   ;;  %s1650_s13 = smov %s1652_s15 }
 0x139   :  { %12 = sbr.rel (!%p10_p6) target bundleno = 2 (0x2), region = 87 }

// kernel: decoder_forward.5
= control target key start
LH: loop header
LB: loop body
LE: loop exit
PB: predicated region body
PF: predicated region fallthrough
CT: control target
= control target key end

     0   :  { %s1182_s12 = smov 0   ;;  %s1184_s13 = smov 0   ;;  %s1400_s0 = inlined_call_operand.vmem [shape: f32[2,33,33,64], index: 0, kind: input, shape index: {}]   ;;  %s1401_s1 = inlined_call_operand.vmem [shape: f32[4,64,128], index: 1, kind: input, shape index: {}]   ;;  %s1402_s2 = inlined_call_operand.vmem [shape: f32[1,128], index: 2, kind: input, shape index: {}]   ;;  %s1403_s3 = inlined_call_operand.vmem [shape: f32[2,64,32,64], index: 3, kind: output, shape index: {}]  }
   0x1   :  { %s1186_s14 = smov 0  }
   0x2 LB: > { %s25_s15 = sadd.s32 1, %s1151_s13  ;;  %p820_p0 = scmp.ge.s32.totalorder %s1155_s14, 1  ;;  %s1155_s14 = sphi %s1186_s14, %s13_s14   ;;  %s1151_s13 = sphi %s1184_s13, %s1405_s13   ;;  %s1147_s12 = sphi %s1182_s12, %s1404_s12  }
   0x3   : > { %p27_p1 = scmp.ge.s32.totalorder %s25_s15, 2  ;;  %p151_p2 = scmp.lt.s32.totalorder %s1155_s14, 3 }
   0x5   : > { %s1407_s15 = smov (%p27_p1, %s25_s15), 0  ;;  %p152_p3 = pnand %p820_p0, %p151_p2 }
   0x6   : > { %p180_p4 = scmp.lt.s32.totalorder (!%p152_p3), %s1147_s12, 1  ;;  %v1203_v0 = vld [vmem:[%s1402_s2] ss:$0 sm:$0xff] (!%p152_p3)  ;;  %s1215_s26 = smov (!%p152_p3), 0  }
   0x7   : > { %155 = sbr.rel (%p152_p3) target bundleno = 397 (0x18d), region = 32 }
   0xe   : > { %s1409_s12 = smov (!%p180_p4, %s1147_s12), 1 }
   0xf   : > { %s1095_s18 = smul.u32 1320, %s1409_s12  ;;  %s880_s19 = sshll.u32 %s1409_s12, 11 }
  0x10   : > { %s1208_s22 = scalar_lea.vmem %s1403_s3, %s880_s19 }
  0x11   : > { %s1213_s25 = scalar_lea.vmem %s1400_s0, %s1095_s18 }
  0x12 LB: >> { %v824_v1 = vld [vmem:[%s1401_s1 + $0x40] sm:$0xff]  ;;  %v825_v2 = vld [vmem:[%s1401_s1 + $0x48] sm:$0xff]  ;;  %v826_v6 = vld [vmem:[%s1401_s1 + $0x50] sm:$0xff]  ;;  %s205_s21 = smul.u32 40, %s1159_s26  ;;  %vm244_vm0 = vcmask 523264   ;;  %vm234_vm1 = vcmask 1046528   ;;  %s1159_s26 = sphi %s1215_s26, %s203_s26  }
  0x13   : >> { %v845_v3 = vld [vmem:[%s1401_s1 + $0x80] sm:$0xff]  ;;  %v1019_v4 = vpack.c.bf16 %v825_v2, %v824_v1  ;;  %v846_v5 = vld [vmem:[%s1401_s1 + $0x88] sm:$0xff]  ;;  %v827_v7 = vld [vmem:[%s1401_s1 + $0x58] sm:$0xff]  ;;  %s1161_s6 = smov 64  }
  0x14   : >> { %v1051_v8 = vpack.c.bf16 %v846_v5, %v845_v3  ;;  %v1023_v9 = vpack.c.bf16 %v827_v7, %v826_v6  ;;  %v847_v10 = vld [vmem:[%s1401_s1 + $0x90] sm:$0xff]  ;;  %v848_v11 = vld [vmem:[%s1401_s1 + $0x98] sm:$0xff]  ;;  %v828_v12 = vld [vmem:[%s1401_s1 + $0x60] sm:$0xff]  ;;  %s1258_s4 = scalar_lea.vmem %s1213_s25, %s205_s21 }
  0x15   : >> { %1020 = vmatprep.subr.bf16.mxu1 %v1019_v4  ;;  %v1055_v13 = vpack.c.bf16 %v848_v11, %v847_v10  ;;  %v829_v14 = vld [vmem:[%s1401_s1 + $0x68] sm:$0xff]  ;;  %v849_v15 = vld [vmem:[%s1401_s1 + $0xa0] sm:$0xff]  ;;  %v830_v21 = vld [vmem:[%s1401_s1 + $0x70] sm:$0xff] }
  0x16   : >> { %v850_v16 = vld [vmem:[%s1401_s1 + $0xa8] sm:$0xff]  ;;  %1052 = vmatprep.subr.bf16.mxu0 %v1051_v8  ;;  %1022 = vmatpush3.bf16.msra.mxu1 %v1019_v4  ;;  %v1027_v17 = vpack.c.bf16 %v829_v14, %v828_v12  ;;  %v1261_v18 = vld [vmem:[%s1258_s4] sm:$0xff]  ;;  %v831_v22 = vld [vmem:[%s1401_s1 + $0x78] sm:$0xff] }
  0x17   : >> { %1054 = vmatpush3.bf16.msra.mxu0 %v1051_v8  ;;  %1024 = vmatprep.subr.bf16.mxu1 %v1023_v9  ;;  %v1264_v19 = vld [vmem:[%s1258_s4 + $0x8] sm:$0xff]  ;;  %v1059_v20 = vpack.c.bf16 %v850_v16, %v849_v15  ;;  %v235_v23 = vrot.slane %v1261_v18, 1  ;;  %v851_v26 = vld [vmem:[%s1401_s1 + $0xb0] sm:$0xff]  ;;  %v852_v27 = vld [vmem:[%s1401_s1 + $0xb8] sm:$0xff]  ;;  %v1031_v29 = vpack.c.bf16 %v831_v22, %v830_v21 }
  0x18   : >> { %1056 = vmatprep.subr.bf16.mxu0 %v1055_v13  ;;  %v236_v24 = vrot.slane %v1264_v19, 1  ;;  %v1275_v25 = vld [vmem:[%s1258_s4 + $0x28] sm:$0xff]  ;;  %v1287_v30 = vld [vmem:[%s1258_s4 + $0x10] sm:$0xff]  ;;  %v1063_v31 = vpack.c.bf16 %v852_v27, %v851_v26  ;;  %v212_v32 = vld [vmem:[%s1401_s1] sm:$0xff] }
  0x19   : >> { %991 = vmatprep.mubr.msk.f32.mxu0 %vm244_vm0, %v1275_v25  ;;  %v213_v33 = vld [vmem:[%s1401_s1 + $0x8] sm:$0xff]  ;;  %v857_v34 = vld [vmem:[%s1401_s1 + $0xc0] sm:$0xff]  ;;  %v238_v36 = vrot.slane %v1287_v30, 1  ;;  %v1304_v37 = vld [vmem:[%s1258_s4 + $0x18] sm:$0xff]  ;;  %v559_v56 = vrot.slane %v1275_v25, 1 }
  0x1a   : >> { %1026 = vmatpush3.bf16.msra.mxu1 %v1023_v9  ;;  %v237_v28 = vsel %vm234_vm1, %v235_v23, %v236_v24  ;;  %v858_v35 = vld [vmem:[%s1401_s1 + $0xc8] sm:$0xff]  ;;  %v1035_v38 = vpack.c.bf16 %v213_v33, %v212_v32  ;;  %v211_v39 = vld [vmem:[%s1258_s4 + $0x20] sm:$0x1]  ;;  %v214_v41 = vld [vmem:[%s1401_s1 + $0x10] sm:$0xff]  ;;  %v240_v45 = vrot.slane %v1304_v37, 1 }
  0x1b   : >> { %1058 = vmatpush3.bf16.msra.mxu0 %v1055_v13  ;;  %1028 = vmatprep.subr.bf16.mxu1 %v1027_v17  ;;  %v1067_v40 = vpack.c.bf16 %v858_v35, %v857_v34  ;;  %v215_v42 = vld [vmem:[%s1401_s1 + $0x18] sm:$0xff]  ;;  %v859_v43 = vld [vmem:[%s1401_s1 + $0xd0] sm:$0xff]  ;;  %v239_v46 = vsel %vm234_vm1, %v236_v24, %v238_v36  ;;  %v242_v47 = vrot.slane %v211_v39, 1  ;;  %v216_v51 = vld [vmem:[%s1401_s1 + $0x20] sm:$0xff] }
  0x1c   : >> { %1060 = vmatprep.subr.bf16.mxu0 %v1059_v20  ;;  %947 = vmatprep.mubr.msk.f32.mxu1 %vm244_vm0, %v237_v28  ;;  %v860_v44 = vld [vmem:[%s1401_s1 + $0xd8] sm:$0xff]  ;;  %v841_v48 = vld [vmem:[%s1258_s4 + $0x30] sm:$0xff]  ;;  %v1039_v49 = vpack.c.bf16 %v215_v42, %v214_v41  ;;  %v217_v52 = vld [vmem:[%s1401_s1 + $0x28] sm:$0xff]  ;;  %v241_v55 = vsel %vm234_vm1, %v238_v36, %v240_v45 }
  0x1d   : >> { %v1071_v50 = vpack.c.bf16 %v860_v44, %v859_v43  ;;  %v861_v53 = vld [vmem:[%s1401_s1 + $0xe0] sm:$0xff]  ;;  %v862_v54 = vld [vmem:[%s1401_s1 + $0xe8] sm:$0xff]  ;;  %v560_v57 = vrot.slane %v841_v48, 1  ;;  %v842_v58 = vld [vmem:[%s1258_s4 + $0x38] sm:$0xff]  ;;  %v243_v59 = vsel %vm234_vm1, %v240_v45, %v242_v47  ;;  %v1043_v60 = vpack.c.bf16 %v217_v52, %v216_v51 }
  0x1e   : >> { %1030 = vmatpush3.bf16.msra.mxu1 %v1027_v17  ;;  %v843_v61 = vld [vmem:[%s1258_s4 + $0x40] sm:$0xff]  ;;  %v1075_v62 = vpack.c.bf16 %v862_v54, %v861_v53  ;;  %v218_v63 = vld [vmem:[%s1401_s1 + $0x30] sm:$0xff]  ;;  %v219_v1 = vld [vmem:[%s1401_s1 + $0x38] sm:$0xff]  ;;  %v562_v7 = vrot.slane %v842_v58, 1 }
  0x1f   : >> { %1062 = vmatpush3.bf16.msra.mxu0 %v1059_v20  ;;  %1032 = vmatprep.subr.bf16.mxu1 %v1031_v29  ;;  %v863_v2 = vld [vmem:[%s1401_s1 + $0xf0] sm:$0xff]  ;;  %v864_v3 = vld [vmem:[%s1401_s1 + $0xf8] sm:$0xff]  ;;  %v561_v4 = vsel %vm234_vm1, %v559_v56, %v560_v57  ;;  %v1047_v5 = vpack.c.bf16 %v219_v1, %v218_v63  ;;  %v564_v8 = vrot.slane %v843_v61, 1  ;;  %v844_v9 = vld [vmem:[%s1258_s4 + $0x48] sm:$0x1]  ;;  %s881_s4 = sshll.u32 %s1159_s26, 6 }
  0x20   : >> { %1064 = vmatprep.subr.bf16.mxu0 %v1063_v31  ;;  %v1079_v6 = vpack.c.bf16 %v864_v3, %v863_v2  ;;  %v563_v10 = vsel %vm234_vm1, %v560_v57, %v562_v7  ;;  %v566_v11 = vrot.slane %v844_v9, 1  ;;  %s681_s5 = scalar_lea.vmem %s1208_s22, %s881_s4  ;;  %s203_s26 = sadd.s32 1, %s1159_s26  }
  0x21   : >> { %v565_v12 = vsel %vm234_vm1, %v562_v7, %v564_v8  ;;  %p200_p5 = scmp.ge.s32.totalorder %s203_s26, 32  }
  0x22   : >> { %1034 = vmatpush3.bf16.msra.mxu1 %v1031_v29  ;;  %v567_v13 = vsel %vm234_vm1, %v564_v8, %v566_v11 }
  0x23   : >> { %1066 = vmatpush3.bf16.msra.mxu0 %v1063_v31  ;;  %1036 = vmatprep.subr.bf16.mxu1 %v1035_v38 }
  0x24   : >> { %1068 = vmatprep.subr.bf16.mxu0 %v1067_v40 }
  0x25   : >> { %948 = vmatmul.mubr.msk.f32.vlgmr.msra.gmra.mrb[0].mxu1 %vm244_vm0, %v239_v46 }
  0x26   : >> { %1038 = vmatpush3.bf16.msra.mxu1 %v1035_v38  ;;  %992 = vmatmul.mubr.msk.f32.vlgmr.msra.gmra.mrb[0].mxu0 %vm244_vm0, %v841_v48 }
  0x27   : >> { %1070 = vmatpush3.bf16.msra.mxu0 %v1067_v40  ;;  %1040 = vmatprep.subr.bf16.mxu1 %v1039_v49 }
  0x28   : >> { %1072 = vmatprep.subr.bf16.mxu0 %v1071_v50  ;;  %950 = vmatprep.mubr.msk.f32.mxu1 %vm244_vm0, %v241_v55 }
  0x29   : >> { %994 = vmatprep.mubr.msk.f32.mxu0 %vm244_vm0, %v842_v58  ;;  %951 = vmatmul.mubr.msk.f32.gmra.mrb[2].mxu1 %vm244_vm0, %v243_v59 }
  0x2a   : >> { %1042 = vmatpush3.bf16.msra.mxu1 %v1039_v49  ;;  %995 = vmatmul.mubr.msk.f32.gmra.mrb[2].mxu0 %vm244_vm0, %v843_v61 }
  0x2b   : >> { %1074 = vmatpush3.bf16.msra.mxu0 %v1071_v50  ;;  %1044 = vmatprep.subr.bf16.mxu1 %v1043_v60 }
  0x2c   : >> { %1076 = vmatprep.subr.bf16.mxu0 %v1075_v62  ;;  %969 = vmatprep.mubr.msk.f32.mxu1 %vm244_vm0, %v1261_v18 }
  0x2d   : >> { %1013 = vmatprep.mubr.msk.f32.mxu0 %vm244_vm0, %v561_v4 }
  0x2e   : >> { %1046 = vmatpush3.bf16.msra.mxu1 %v1043_v60 }
  0x2f   : >> { %1078 = vmatpush3.bf16.msra.mxu0 %v1075_v62  ;;  %1048 = vmatprep.subr.bf16.mxu1 %v1047_v5 }
  0x30   : >> { %1080 = vmatprep.subr.bf16.mxu0 %v1079_v6 }
  0x32   : >> { %1050 = vmatpush3.bf16.msra.mxu1 %v1047_v5 }
  0x33   : >> { %1082 = vmatpush3.bf16.msra.mxu0 %v1079_v6 }
  0x35   : >> { %970 = vmatmul.mubr.msk.f32.vlgmr.msra.gmra.mrb[0].mxu1 %vm244_vm0, %v1264_v19 }
  0x36   : >> { %1014 = vmatmul.mubr.msk.f32.vlgmr.msra.gmra.mrb[0].mxu0 %vm244_vm0, %v563_v10  ;;  %972 = vmatprep.mubr.msk.f32.mxu1 %vm244_vm0, %v1287_v30 }
  0x37   : >> { %1016 = vmatprep.mubr.msk.f32.mxu0 %vm244_vm0, %v565_v12 }
  0x39   : >> { %973 = vmatmul.mubr.msk.f32.gmra.mrb[2].mxu1 %vm244_vm0, %v1304_v37 }
  0x3a   : >> { %1017 = vmatmul.mubr.msk.f32.gmra.mrb[2].mxu0 %vm244_vm0, %v567_v13 }
 0x108   : >> { %v971_v14 = vpop.f32.mrb[0].mxu1 }
 0x109   : >> { %v1015_v15 = vpop.f32.mrb[0].mxu0  ;;  %v412_v16 = vpop.f32.mrb[1].mxu1 }
 0x10a   : >> { %v1083_v17 = vadd.f32 %v1015_v15, %v971_v14  ;;  %v642_v18 = vpop.f32.mrb[1].mxu0 }
 0x10b   : >> { %v1084_v19 = vadd.f32 %v642_v18, %v412_v16 }
 0x10c   : >> { %v672_v20 = vadd.f32 %v1083_v17, %v1203_v0  ;;  %v974_v21 = vpop.f32.mrb[2].mxu1 }
 0x10d   : >> { %v671_v22 = vadd.f32 %v1084_v19, %v1203_v0  ;;  %v1018_v23 = vpop.f32.mrb[2].mxu0  ;;  %v422_v24 = vpop.f32.mrb[3].mxu1 }
 0x10e   : >> { %v676_v25 = vmax.f32 %v672_v20, 0.0  ;;  %v1085_v26 = vadd.f32 %v1018_v23, %v974_v21  ;;  %v652_v27 = vpop.f32.mrb[3].mxu0 }
 0x10f   : >> { %v1086_v28 = vadd.f32 %v652_v27, %v422_v24  ;;  %v675_v29 = vmax.f32 %v671_v22, 0.0 }
 0x110   : >> { %683 = vst.msk [vmem:[%s681_s5 + $0x8] sm:$0xff] %vm244_vm0, %v676_v25  ;;  %v674_v30 = vadd.f32 %v1085_v26, %v1203_v0 }
 0x111   : >> { %v673_v31 = vadd.f32 %v1086_v28, %v1203_v0  ;;  %691 = vrot.lane.b32.xlu0 %v675_v29, %s1161_s6  ;;  %682 = vst.msk [vmem:[%s681_s5] sm:$0xff] %vm244_vm0, %v675_v29 }
 0x112   : >> { %v678_v32 = vmax.f32 %v674_v30, 0.0 }
 0x113   : >> { %v677_v33 = vmax.f32 %v673_v31, 0.0 }
 0x114   : >> { %685 = vst.msk [vmem:[%s681_s5 + $0x18] sm:$0xff] %vm244_vm0, %v678_v32 }
 0x115   : >> { %693 = vrot.lane.b32.xlu0 %v676_v25, %s1161_s6  ;;  %695 = vrot.lane.b32.xlu1 %v677_v33, %s1161_s6  ;;  %684 = vst.msk [vmem:[%s681_s5 + $0x10] sm:$0xff] %vm244_vm0, %v677_v33 }
 0x119   : >> { %697 = vrot.lane.b32.xlu1 %v678_v32, %s1161_s6 }
 0x183   : >> { %v692_v34 = vpop.permute.xlu0 %691 }
 0x184   : >> { %874 = vst.msk [vmem:[%s681_s5 + $0x20] sm:$0xff] %vm244_vm0, %v692_v34 }
 0x186   : > { %202 = sbr.rel (!%p200_p5) target bundleno = 18 (0x12), region = 76 }
 0x187   : >> { %v694_v35 = vpop.permute.xlu0 %693  ;;  %v696_v36 = vpop.permute.xlu1 %695 }
 0x188   : >> { %875 = vst.msk [vmem:[%s681_s5 + $0x28] sm:$0xff] %vm244_vm0, %v694_v35  ;;  %876 = vst.msk [vmem:[%s681_s5 + $0x30] sm:$0xff] %vm244_vm0, %v696_v36 }
 0x18b   : >> { %v698_v37 = vpop.permute.xlu1 %697 }
 0x18c   : >> { %877 = vst.msk [vmem:[%s681_s5 + $0x38] sm:$0xff] %vm244_vm0, %v698_v37 }
 0x18d PF: > { %s13_s14 = sadd.s32 1, %s1155_s14   ;;  %s1404_s12 = smov %s1151_s13 }
 0x18e   : > { %p10_p6 = scmp.ge.s32.totalorder %s13_s14, 4   ;;  %s1405_s13 = smov %s1407_s15 }
 0x190   :  { %12 = sbr.rel (!%p10_p6) target bundleno = 2 (0x2), region = 87 }

// kernel: decoder_forward.6
= control target key start
LH: loop header
LB: loop body
LE: loop exit
PB: predicated region body
PF: predicated region fallthrough
CT: control target
= control target key end

     0   :  { %s1372_s12 = smov 0   ;;  %s1374_s13 = smov 0   ;;  %s1652_s0 = inlined_call_operand.vmem [shape: f32[2,65,65,32], index: 0, kind: input, shape index: {}]   ;;  %s1653_s1 = inlined_call_operand.vmem [shape: f32[4,32,64], index: 1, kind: input, shape index: {}]   ;;  %s1654_s2 = inlined_call_operand.vmem [shape: f32[1,64], index: 2, kind: input, shape index: {}]   ;;  %s1655_s3 = inlined_call_operand.vmem [shape: f32[2,128,64,32], index: 3, kind: output, shape index: {}]  }
   0x1   :  { %s1376_s14 = smov 0   ;;  %s1378_s15 = smov 0  }
   0x2   :  { %s1380_s16 = smov 0  }
   0x3 LB: > { %s22_s17 = sadd.s32 1, %s1337_s14  ;;  %s25_s18 = sadd.s32 1, %s1341_s15  ;;  %s1345_s16 = sphi %s1380_s16, %s13_s16   ;;  %s1341_s15 = sphi %s1378_s15, %s1659_s15   ;;  %s1337_s14 = sphi %s1376_s14, %s1658_s14   ;;  %s1333_s13 = sphi %s1374_s13, %s1657_s13   ;;  %s1329_s12 = sphi %s1372_s12, %s1656_s12  }
   0x4   : > { %p23_p0 = scmp.ge.s32.totalorder %s22_s17, 2  ;;  %p991_p1 = scmp.ge.s32.totalorder %s1345_s16, 1 }
   0x5   : > { %p151_p2 = scmp.lt.s32.totalorder %s1345_s16, 5 }
   0x6   : > { %s1661_s17 = smov (%p23_p0, %s22_s17), 0  ;;  %s1663_s18 = smov (!%p23_p0, %s25_s18), %s1341_s15 }
   0x7   : > { %p152_p3 = pnand %p991_p1, %p151_p2  ;;  %p27_p4 = scmp.ge.s32.totalorder %s1663_s18, 2 }
   0x8   : > { %p180_p5 = scmp.lt.s32.totalorder (!%p152_p3), %s1333_s13, 1  ;;  %s993_s19 = sshll.u32 (!%p152_p3), %s1329_s12, 6  ;;  %v1408_v0 = vld [vmem:[%s1654_s2] ss:$0 sm:$0xff] (!%p152_p3) }
   0x9   : > { %s1665_s18 = smov (%p27_p4, %s1663_s18), 0  ;;  %155 = sbr.rel (%p152_p3) target bundleno = 400 (0x190), region = 32 }
   0xa   : > { %p188_p6 = scmp.lt.s32.totalorder (!%p152_p3), %s993_s19, 127  ;;  %s997_s22 = sshll.u32 (!%p152_p3), %s1329_s12, 5 }
   0xb   : > { %s1421_s7 = smov (!%p152_p3), 0  }
  0x10   : > { %s1667_s13 = smov (!%p180_p5, %s1333_s13), 1  ;;  %s1669_s19 = smov (!%p188_p6, %s993_s19), 127 }
  0x11   : > { %s1253_s23 = smul.u32 4680, %s1667_s13  ;;  %s995_s24 = sshll.u32 %s1667_s13, 10 }
  0x12   : > { %s994_s25 = sshll.u32 %s1669_s19, 3 }
  0x13   : > { %s1414_s28 = scalar_lea.vmem %s1652_s0, %s1253_s23  ;;  %s192_s29 = sadd.s32 %s995_s24, %s994_s25 }
  0x14   : > { %s996_s30 = sshll.u32 %s192_s29, 3 }
  0x15   : > { %s1419_s6 = scalar_lea.vmem %s1655_s3, %s996_s30 }
  0x16 LB: >> { %v998_v1 = vld [vmem:[%s1653_s1 + $0x20] sm:$0xff]  ;;  %v999_v2 = vld [vmem:[%s1653_s1 + $0x28] sm:$0xff]  ;;  %v1000_v6 = vld [vmem:[%s1653_s1 + $0x30] sm:$0xff]  ;;  %s204_s5 = sadd.s32 %s1349_s7, %s997_s22  ;;  %vm252_vm0 = vcmask 261120   ;;  %vm234_vm1 = vcmask 1046528   ;;  %s1067_s9 = sshll.u32 %s1349_s7, 7  ;;  %s1349_s7 = sphi %s1421_s7, %s203_s7  }
  0x17   : >> { %v1028_v3 = vld [vmem:[%s1653_s1 + $0x40] sm:$0xff]  ;;  %v1197_v4 = vpack.c.bf16 %v999_v2, %v998_v1  ;;  %v1029_v5 = vld [vmem:[%s1653_s1 + $0x48] sm:$0xff]  ;;  %v1001_v7 = vld [vmem:[%s1653_s1 + $0x38] sm:$0xff]  ;;  %s205_s10 = smul.u32 72, %s204_s5  ;;  %s1351_s11 = smov 96  }
  0x18   : >> { %v1213_v8 = vpack.c.bf16 %v1029_v5, %v1028_v3  ;;  %v1201_v9 = vpack.c.bf16 %v1001_v7, %v1000_v6  ;;  %v1030_v10 = vld [vmem:[%s1653_s1 + $0x50] sm:$0xff]  ;;  %v1031_v11 = vld [vmem:[%s1653_s1 + $0x58] sm:$0xff]  ;;  %v216_v12 = vld [vmem:[%s1653_s1] sm:$0xff]  ;;  %s203_s7 = sadd.s32 1, %s1349_s7  }
  0x19   : >> { %1198 = vmatprep.subr.bf16.mxu1 %v1197_v4  ;;  %v1217_v13 = vpack.c.bf16 %v1031_v11, %v1030_v10  ;;  %v217_v14 = vld [vmem:[%s1653_s1 + $0x8] sm:$0xff]  ;;  %v1040_v15 = vld [vmem:[%s1653_s1 + $0x60] sm:$0xff]  ;;  %s1466_s24 = scalar_lea.vmem %s1414_s28, %s205_s10  ;;  %v218_v18 = vld [vmem:[%s1653_s1 + $0x10] sm:$0xff]  ;;  %s1586_s10 = scalar_lea.vmem %s1419_s6, %s1067_s9 }
  0x1a   : >> { %v1041_v16 = vld [vmem:[%s1653_s1 + $0x68] sm:$0xff]  ;;  %1214 = vmatprep.subr.bf16.mxu0 %v1213_v8  ;;  %1200 = vmatpush3.bf16.msra.mxu1 %v1197_v4  ;;  %v1205_v17 = vpack.c.bf16 %v217_v14, %v216_v12  ;;  %v1472_v19 = vld [vmem:[%s1466_s24] sm:$0xff]  ;;  %v1485_v25 = vld [vmem:[%s1466_s24 + $0x10] sm:$0xff]  ;;  %p200_p7 = scmp.ge.s32.totalorder %s203_s7, 32  }
  0x1b   : >> { %1216 = vmatpush3.bf16.msra.mxu0 %v1213_v8  ;;  %1202 = vmatprep.subr.bf16.mxu1 %v1201_v9  ;;  %v1475_v20 = vld [vmem:[%s1466_s24 + $0x8] sm:$0xff]  ;;  %v1221_v22 = vpack.c.bf16 %v1041_v16, %v1040_v15  ;;  %v235_v23 = vrot.slane %v1472_v19, 1  ;;  %v1488_v26 = vld [vmem:[%s1466_s24 + $0x18] sm:$0xff]  ;;  %v238_v28 = vrot.slane %v1485_v25, 1  ;;  %v1496_v30 = vld [vmem:[%s1466_s24 + $0x20] sm:$0xff] }
  0x1c   : >> { %1218 = vmatprep.subr.bf16.mxu0 %v1217_v13  ;;  %v1478_v21 = vld [vmem:[%s1466_s24 + $0x48] sm:$0xff]  ;;  %v236_v24 = vrot.slane %v1475_v20, 1  ;;  %v219_v27 = vld [vmem:[%s1653_s1 + $0x18] sm:$0xff]  ;;  %v240_v29 = vrot.slane %v1488_v26, 1  ;;  %v1042_v31 = vld [vmem:[%s1653_s1 + $0x70] sm:$0xff]  ;;  %v242_v35 = vrot.slane %v1496_v30, 1 }
  0x1d   : >> { %1165 = vmatprep.mubr.msk.f32.mxu0 %vm252_vm0, %v1478_v21  ;;  %v1043_v32 = vld [vmem:[%s1653_s1 + $0x78] sm:$0xff]  ;;  %v1020_v34 = vld [vmem:[%s1466_s24 + $0x50] sm:$0xff]  ;;  %v1508_v36 = vld [vmem:[%s1466_s24 + $0x28] sm:$0xff]  ;;  %v1209_v41 = vpack.c.bf16 %v219_v27, %v218_v18  ;;  %v655_v56 = vrot.slane %v1478_v21, 1 }
  0x1e   : >> { %1204 = vmatpush3.bf16.msra.mxu1 %v1201_v9  ;;  %v237_v33 = vsel %vm234_vm1, %v235_v23, %v236_v24  ;;  %v1511_v37 = vld [vmem:[%s1466_s24 + $0x30] sm:$0xff]  ;;  %v239_v38 = vsel %vm234_vm1, %v236_v24, %v238_v28  ;;  %v241_v39 = vsel %vm234_vm1, %v238_v28, %v240_v29  ;;  %v244_v40 = vrot.slane %v1508_v36, 1  ;;  %v1518_v42 = vld [vmem:[%s1466_s24 + $0x38] sm:$0xff]  ;;  %v1022_v47 = vld [vmem:[%s1466_s24 + $0x60] sm:$0xff] }
  0x1f   : >> { %1220 = vmatpush3.bf16.msra.mxu0 %v1217_v13  ;;  %1206 = vmatprep.subr.bf16.mxu1 %v1205_v17  ;;  %v1021_v43 = vld [vmem:[%s1466_s24 + $0x58] sm:$0xff]  ;;  %v1225_v44 = vpack.c.bf16 %v1043_v32, %v1042_v31  ;;  %v243_v45 = vsel %vm234_vm1, %v240_v29, %v242_v35  ;;  %v246_v46 = vrot.slane %v1511_v37, 1  ;;  %v248_v49 = vrot.slane %v1518_v42, 1  ;;  %v215_v50 = vld [vmem:[%s1466_s24 + $0x40] sm:$0x1]  ;;  %v1023_v51 = vld [vmem:[%s1466_s24 + $0x68] sm:$0xff] }
  0x20   : >> { %1125 = vmatprep.mubr.msk.f32.mxu1 %vm252_vm0, %v237_v33  ;;  %1222 = vmatprep.subr.bf16.mxu0 %v1221_v22  ;;  %v245_v48 = vsel %vm234_vm1, %v242_v35, %v244_v40  ;;  %v250_v53 = vrot.slane %v215_v50, 1  ;;  %v1024_v54 = vld [vmem:[%s1466_s24 + $0x70] sm:$0xff]  ;;  %v656_v57 = vrot.slane %v1020_v34, 1  ;;  %v1025_v58 = vld [vmem:[%s1466_s24 + $0x78] sm:$0xff]  ;;  %v658_v60 = vrot.slane %v1021_v43, 1  ;;  %v1026_v61 = vld [vmem:[%s1466_s24 + $0x80] sm:$0xff] }
  0x21   : >> { %1126 = vmatmul.mubr.msk.f32.vlgmr.msra.gmra.mrb[0].mxu1 %vm252_vm0, %v239_v38  ;;  %v247_v52 = vsel %vm234_vm1, %v244_v40, %v246_v46  ;;  %v249_v55 = vsel %vm234_vm1, %v246_v46, %v248_v49  ;;  %v660_v62 = vrot.slane %v1022_v47, 1  ;;  %v662_v1 = vrot.slane %v1023_v51, 1  ;;  %v1027_v9 = vld [vmem:[%s1466_s24 + $0x88] sm:$0x1] }
  0x22   : >> { %1166 = vmatmul.mubr.msk.f32.vlgmr.msra.gmra.mrb[0].mxu0 %vm252_vm0, %v1020_v34  ;;  %1208 = vmatpush3.bf16.msra.mxu1 %v1205_v17  ;;  %v251_v59 = vsel %vm234_vm1, %v248_v49, %v250_v53  ;;  %v657_v63 = vsel %vm234_vm1, %v655_v56, %v656_v57  ;;  %v659_v2 = vsel %vm234_vm1, %v656_v57, %v658_v60  ;;  %v664_v3 = vrot.slane %v1024_v54, 1 }
  0x23   : >> { %1224 = vmatpush3.bf16.msra.mxu0 %v1221_v22  ;;  %1128 = vmatprep.mubr.msk.f32.mxu1 %vm252_vm0, %v241_v39  ;;  %v661_v4 = vsel %vm234_vm1, %v658_v60, %v660_v62  ;;  %v666_v5 = vrot.slane %v1025_v58, 1  ;;  %v663_v6 = vsel %vm234_vm1, %v660_v62, %v662_v1  ;;  %v668_v7 = vrot.slane %v1026_v61, 1 }
  0x24   : >> { %1168 = vmatprep.mubr.msk.f32.mxu0 %vm252_vm0, %v1021_v43  ;;  %1210 = vmatprep.subr.bf16.mxu1 %v1209_v41  ;;  %v665_v8 = vsel %vm234_vm1, %v662_v1, %v664_v3  ;;  %v670_v11 = vrot.slane %v1027_v9, 1 }
  0x25   : >> { %1129 = vmatmul.mubr.msk.f32.gmra.mrb[2].mxu1 %vm252_vm0, %v243_v45  ;;  %1226 = vmatprep.subr.bf16.mxu0 %v1225_v44  ;;  %v667_v10 = vsel %vm234_vm1, %v664_v3, %v666_v5  ;;  %v669_v12 = vsel %vm234_vm1, %v666_v5, %v668_v7 }
  0x26   : >> { %1169 = vmatmul.mubr.msk.f32.gmra.mrb[2].mxu0 %vm252_vm0, %v1022_v47  ;;  %1131 = vmatprep.mubr.msk.f32.mxu1 %vm252_vm0, %v245_v48  ;;  %v671_v13 = vsel %vm234_vm1, %v668_v7, %v670_v11 }
  0x27   : >> { %1171 = vmatprep.mubr.msk.f32.mxu0 %vm252_vm0, %v1023_v51  ;;  %1212 = vmatpush3.bf16.msra.mxu1 %v1209_v41 }
  0x28   : >> { %1228 = vmatpush3.bf16.msra.mxu0 %v1225_v44 }
  0x29   : >> { %1132 = vmatmul.mubr.msk.f32.gmra.mrb[4].mxu1 %vm252_vm0, %v247_v52 }
  0x2a   : >> { %1172 = vmatmul.mubr.msk.f32.gmra.mrb[4].mxu0 %vm252_vm0, %v1024_v54  ;;  %1134 = vmatprep.mubr.msk.f32.mxu1 %vm252_vm0, %v249_v55 }
  0x2b   : >> { %1174 = vmatprep.mubr.msk.f32.mxu0 %vm252_vm0, %v1025_v58 }
  0x2d   : >> { %1135 = vmatmul.mubr.msk.f32.gmra.mrb[6].mxu1 %vm252_vm0, %v251_v59 }
  0x2e   : >> { %1175 = vmatmul.mubr.msk.f32.gmra.mrb[6].mxu0 %vm252_vm0, %v1026_v61  ;;  %1145 = vmatprep.mubr.msk.f32.mxu1 %vm252_vm0, %v1472_v19 }
  0x2f   : >> { %1185 = vmatprep.mubr.msk.f32.mxu0 %vm252_vm0, %v657_v63 }
  0x31   : >> { %1146 = vmatmul.mubr.msk.f32.vlgmr.msra.gmra.mrb[0].mxu1 %vm252_vm0, %v1475_v20 }
  0x32   : >> { %1186 = vmatmul.mubr.msk.f32.vlgmr.msra.gmra.mrb[0].mxu0 %vm252_vm0, %v659_v2  ;;  %1148 = vmatprep.mubr.msk.f32.mxu1 %vm252_vm0, %v1485_v25 }
  0x33   : >> { %1188 = vmatprep.mubr.msk.f32.mxu0 %vm252_vm0, %v661_v4 }
  0x35   : >> { %1149 = vmatmul.mubr.msk.f32.gmra.mrb[2].mxu1 %vm252_vm0, %v1488_v26 }
  0x36   : >> { %1189 = vmatmul.mubr.msk.f32.gmra.mrb[2].mxu0 %vm252_vm0, %v663_v6  ;;  %1151 = vmatprep.mubr.msk.f32.mxu1 %vm252_vm0, %v1496_v30 }
  0x37   : >> { %1191 = vmatprep.mubr.msk.f32.mxu0 %vm252_vm0, %v665_v8 }
  0x39   : >> { %1152 = vmatmul.mubr.msk.f32.gmra.mrb[4].mxu1 %vm252_vm0, %v1508_v36 }
  0x3a   : >> { %1192 = vmatmul.mubr.msk.f32.gmra.mrb[4].mxu0 %vm252_vm0, %v667_v10  ;;  %1154 = vmatprep.mubr.msk.f32.mxu1 %vm252_vm0, %v1511_v37 }
  0x3b   : >> { %1194 = vmatprep.mubr.msk.f32.mxu0 %vm252_vm0, %v669_v12 }
  0x3d   : >> { %1155 = vmatmul.mubr.msk.f32.gmra.mrb[6].mxu1 %vm252_vm0, %v1518_v42 }
  0x3e   : >> { %1195 = vmatmul.mubr.msk.f32.gmra.mrb[6].mxu0 %vm252_vm0, %v671_v13 }
 0x104   : >> { %v1147_v14 = vpop.f32.mrb[0].mxu1 }
 0x105   : >> { %v1187_v15 = vpop.f32.mrb[0].mxu0  ;;  %v456_v16 = vpop.f32.mrb[1].mxu1 }
 0x106   : >> { %v1229_v17 = vadd.f32 %v1187_v15, %v1147_v14  ;;  %v754_v18 = vpop.f32.mrb[1].mxu0 }
 0x107   : >> { %v1230_v19 = vadd.f32 %v754_v18, %v456_v16 }
 0x108   : >> { %v808_v20 = vadd.f32 %v1229_v17, %v1408_v0  ;;  %v1150_v21 = vpop.f32.mrb[2].mxu1 }
 0x109   : >> { %v807_v22 = vadd.f32 %v1230_v19, %v1408_v0  ;;  %v1190_v23 = vpop.f32.mrb[2].mxu0  ;;  %v466_v24 = vpop.f32.mrb[3].mxu1 }
 0x10a   : >> { %v1231_v25 = vadd.f32 %v1190_v23, %v1150_v21  ;;  %v764_v26 = vpop.f32.mrb[3].mxu0  ;;  %v816_v27 = vmax.f32 %v808_v20, 0.0 }
 0x10b   : >> { %v815_v28 = vmax.f32 %v807_v22, 0.0  ;;  %v1232_v29 = vadd.f32 %v764_v26, %v466_v24 }
 0x10c   : >> { %v810_v30 = vadd.f32 %v1231_v25, %v1408_v0  ;;  %845 = vrot.lane.b32.xlu0 %v816_v27, %s1351_s11  ;;  %827 = vst.msk [vmem:[%s1586_s10 + $0x8] sm:$0xff] %vm252_vm0, %v816_v27  ;;  %v1153_v31 = vpop.f32.mrb[4].mxu1 }
 0x10d   : >> { %826 = vst.msk [vmem:[%s1586_s10] sm:$0xff] %vm252_vm0, %v815_v28  ;;  %v809_v32 = vadd.f32 %v1232_v29, %v1408_v0  ;;  %v1193_v33 = vpop.f32.mrb[4].mxu0  ;;  %v476_v34 = vpop.f32.mrb[5].mxu1 }
 0x10e   : >> { %v1233_v35 = vadd.f32 %v1193_v33, %v1153_v31  ;;  %v774_v36 = vpop.f32.mrb[5].mxu0  ;;  %v818_v37 = vmax.f32 %v810_v30, 0.0 }
 0x10f   : >> { %v817_v38 = vmax.f32 %v809_v32, 0.0  ;;  %v1234_v39 = vadd.f32 %v774_v36, %v476_v34 }
 0x110   : >> { %v812_v40 = vadd.f32 %v1233_v35, %v1408_v0  ;;  %843 = vrot.lane.b32.xlu0 %v815_v28, %s1351_s11  ;;  %849 = vrot.lane.b32.xlu1 %v818_v37, %s1351_s11  ;;  %829 = vst.msk [vmem:[%s1586_s10 + $0x18] sm:$0xff] %vm252_vm0, %v818_v37  ;;  %v1156_v41 = vpop.f32.mrb[6].mxu1 }
 0x111   : >> { %828 = vst.msk [vmem:[%s1586_s10 + $0x10] sm:$0xff] %vm252_vm0, %v817_v38  ;;  %v811_v42 = vadd.f32 %v1234_v39, %v1408_v0  ;;  %v1196_v43 = vpop.f32.mrb[6].mxu0  ;;  %v486_v44 = vpop.f32.mrb[7].mxu1 }
 0x112   : >> { %v820_v45 = vmax.f32 %v812_v40, 0.0  ;;  %v1235_v46 = vadd.f32 %v1196_v43, %v1156_v41  ;;  %v784_v47 = vpop.f32.mrb[7].mxu0 }
 0x113   : >> { %v819_v48 = vmax.f32 %v811_v42, 0.0  ;;  %v1236_v49 = vadd.f32 %v784_v47, %v486_v44 }
 0x114   : >> { %831 = vst.msk [vmem:[%s1586_s10 + $0x28] sm:$0xff] %vm252_vm0, %v820_v45  ;;  %v814_v50 = vadd.f32 %v1235_v46, %v1408_v0  ;;  %847 = vrot.lane.b32.xlu1 %v817_v38, %s1351_s11 }
 0x115   : >> { %830 = vst.msk [vmem:[%s1586_s10 + $0x20] sm:$0xff] %vm252_vm0, %v819_v48  ;;  %v813_v51 = vadd.f32 %v1236_v49, %v1408_v0  ;;  %851 = vrot.lane.b32.xlu0 %v819_v48, %s1351_s11 }
 0x116   : >> { %v822_v52 = vmax.f32 %v814_v50, 0.0 }
 0x117   : >> { %v821_v53 = vmax.f32 %v813_v51, 0.0 }
 0x118   : >> { %833 = vst.msk [vmem:[%s1586_s10 + $0x38] sm:$0xff] %vm252_vm0, %v822_v52  ;;  %853 = vrot.lane.b32.xlu1 %v820_v45, %s1351_s11 }
 0x119   : >> { %832 = vst.msk [vmem:[%s1586_s10 + $0x30] sm:$0xff] %vm252_vm0, %v821_v53  ;;  %855 = vrot.lane.b32.xlu0 %v821_v53, %s1351_s11 }
 0x11c   : >> { %857 = vrot.lane.b32.xlu1 %v822_v52, %s1351_s11 }
 0x17e   : >> { %v846_v54 = vpop.permute.xlu0 %845 }
 0x17f   : >> { %1058 = vst.msk [vmem:[%s1586_s10 + $0x48] sm:$0xff] %vm252_vm0, %v846_v54 }
 0x182   : >> { %v844_v55 = vpop.permute.xlu0 %843  ;;  %v850_v56 = vpop.permute.xlu1 %849 }
 0x183   : >> { %1057 = vst.msk [vmem:[%s1586_s10 + $0x40] sm:$0xff] %vm252_vm0, %v844_v55  ;;  %1060 = vst.msk [vmem:[%s1586_s10 + $0x58] sm:$0xff] %vm252_vm0, %v850_v56 }
 0x186   : >> { %v848_v57 = vpop.permute.xlu1 %847 }
 0x187   : >> { %1059 = vst.msk [vmem:[%s1586_s10 + $0x50] sm:$0xff] %vm252_vm0, %v848_v57  ;;  %v852_v58 = vpop.permute.xlu0 %851 }
 0x188   : >> { %1061 = vst.msk [vmem:[%s1586_s10 + $0x60] sm:$0xff] %vm252_vm0, %v852_v58 }
 0x189   : > { %202 = sbr.rel (!%p200_p7) target bundleno = 22 (0x16), region = 76 }
 0x18a   : >> { %v854_v59 = vpop.permute.xlu1 %853 }
 0x18b   : >> { %1062 = vst.msk [vmem:[%s1586_s10 + $0x68] sm:$0xff] %vm252_vm0, %v854_v59  ;;  %v856_v60 = vpop.permute.xlu0 %855 }
 0x18c   : >> { %1063 = vst.msk [vmem:[%s1586_s10 + $0x70] sm:$0xff] %vm252_vm0, %v856_v60 }
 0x18e   : >> { %v858_v61 = vpop.permute.xlu1 %857 }
 0x18f   : >> { %1064 = vst.msk [vmem:[%s1586_s10 + $0x78] sm:$0xff] %vm252_vm0, %v858_v61 }
 0x190 PF: > { %s13_s16 = sadd.s32 1, %s1345_s16   ;;  %s1656_s12 = smov %s1337_s14 }
 0x191   : > { %p10_p8 = scmp.ge.s32.totalorder %s13_s16, 6   ;;  %s1657_s13 = smov %s1341_s15 }
 0x192   : > { %s1658_s14 = smov %s1661_s17  ;;  %s1659_s15 = smov %s1665_s18 }
 0x193   :  { %12 = sbr.rel (!%p10_p8) target bundleno = 3 (0x3), region = 87 }

// kernel: decoder_forward.7
= control target key start
LH: loop header
LB: loop body
LE: loop exit
PB: predicated region body
PF: predicated region fallthrough
CT: control target
= control target key end

     0   :  { %8 = vsyncpa [#allocation3], 0  ;;  %s4590_s0 = inlined_call_operand.hbm [shape: f32[2,130,130,16], index: 0, kind: input, shape index: {}]   ;;  %s4591_s1 = inlined_call_operand.hbm [shape: f32[9,16,3], index: 1, kind: input, shape index: {}]   ;;  %s4592_s2 = inlined_call_operand.hbm [shape: f32[1,3], index: 2, kind: input, shape index: {}]   ;;  %s4593_s3 = inlined_call_operand.vmem [shape: f32[2,128,128,3], index: 3, kind: output, shape index: {}]  }
   0x1   :  { %10 = vsyncpa [#allocation3 + $0x1], 0 }
   0x2   :  { %11 = vsyncpa [#allocation5], 0  ;;  %s3551_s12 = smov 0   ;;  %s3553_s13 = smov 0  }
   0x3   :  { %s3555_s14 = smov 0   ;;  %s3557_s15 = smov 0  }
   0x4   :  { %s3559_s16 = smov 0   ;;  %s3561_s17 = smov 0  }
   0x5   :  { %s3563_s18 = smov 0   ;;  %s3565_s19 = smov 0  }
   0x6 LB: > { %s2476_s20 = sadd.s32 4294967295, %s3520_s19   ;;  %p49_p0 = scmp.ne.s32.totalorder %s3496_s13, %s3492_s12  ;;  %s3520_s19 = sphi %s3565_s19, %s17_s19   ;;  %s3516_s18 = sphi %s3563_s18, %s4709_s18   ;;  %s3512_s17 = sphi %s3561_s17, %s4708_s17   ;;  %s3508_s16 = sphi %s3559_s16, %s4707_s16   ;;  %s3504_s15 = sphi %s3557_s15, %s4706_s15   ;;  %s3500_s14 = sphi %s3555_s14, %s4705_s14   ;;  %s3496_s13 = sphi %s3553_s13, %s4704_s13   ;;  %s3492_s12 = sphi %s3551_s12, %s4703_s12  }
   0x7   : > { %p3591_p1 = scmp.eq.s32.totalorder %s2476_s20, 0  ;;  %p2478_p2 = scmp.ge.s32.totalorder %s3520_s19, 1 }
   0x8   : > { %p130_p3 = scmp.lt.s32.totalorder %s3520_s19, 5  ;;  %s3526_s24 = smov [#allocation4]  }
   0x9   : > { %s4621_s21 = scalar_select %p3591_p1, 1, 0 }
   0xa   : > { %p3599_p4 = por %p3591_p1, %p49_p0  ;;  %p3603_p5 = pnand %p2478_p2, %p130_p3 }
   0xb   : > { %s142_s25 = sshll.u32 %s3526_s24, 4  ;;  %s3527_s27 = smov [#allocation6]   ;;  %s143_s25 = int_to_ptr.vmem [resolvable:$true] %s142_s25 }
   0xc   : > { %s4622_s22 = scalar_select %p3599_p4, 1, 0 }
   0xd   : > { %s4623_s23 = scalar_select %p3603_p5, 1, 0 }
   0xe   : > { %p3268_p6 = pneg %p3603_p5  ;;  %s156_s28 = sshll.u32 %s3527_s27, 4  ;;  %s3615_s28 = int_to_ptr.vmem [resolvable:$true] %s156_s28 }
   0xf   : > { %s3360_s4 = scalar_lea.hbm %s4591_s1, 2304 }
  0x10   : > { %p3611_p7 = pnand %p3268_p6, %p3591_p1  ;;  %p3361_p8 = scmp.ne.s32.totalorder %s4591_s1, %s3360_s4 }
  0x11   : > { %p3367_p12 = scmp.lt.u32.totalorder %s3360_s4, %s4591_s1 }
  0x12   : > { %p3362_p9 = pneg %p3611_p7 }
  0x14   : > { %p3363_p10 = pnand %p3362_p9, %p3361_p8 }
  0x16   : > { %p3364_p11 = pneg %p3363_p10 }
  0x18   : > { %p3369_p13 = pnand %p3367_p12, %p3364_p11 }
  0x1a   : > { %3372 = shalt.err (!%p3369_p13)
}
  0x1b   : > { %s3373_s9 = scalar_lea.vmem %s143_s25, 2304  ;;  %p3381_p6 = scmp.lt.s32.totalorder %s143_s25, %s143_s25 }
  0x1c   : > { %p3374_p0 = scmp.ne.s32.totalorder %s143_s25, %s3373_s9  ;;  %p3382_p1 = scmp.lt.s32.totalorder %s3373_s9, %s3373_s9 }
  0x1e   : > { %p3376_p2 = pnand %p3374_p0, %p3362_p9  ;;  %p3383_p4 = por %p3382_p1, %p3381_p6 }
  0x20   : > { %p3377_p3 = pneg %p3376_p2 }
  0x22   : > { %p3384_p5 = pnand %p3383_p4, %p3377_p3 }
  0x24   : > { %3387 = shalt.err (!%p3384_p5)
}
  0x25   : > { %s3528_s10 = smov 128   ;;  %s3529_s11 = smov 8  }
  0x26   : > { %3271 = dma.hbm_to_vmem [thread:$0]  (!%p3611_p7), %s4591_s1, 2304, %s143_s25, [#allocation5], %s3528_s10, %s3528_s10, %s3529_s11  }
  0x27   : > { %s3388_s29 = scalar_lea.hbm %s4592_s2, 16 }
  0x28   : > { %p3389_p1 = scmp.ne.s32.totalorder %s4592_s2, %s3388_s29  ;;  %p3395_p8 = scmp.lt.u32.totalorder %s3388_s29, %s4592_s2 }
  0x2a   : > { %p3391_p4 = pnand %p3389_p1, %p3362_p9 }
  0x2c   : > { %p3392_p5 = pneg %p3391_p4 }
  0x2e   : > { %p3397_p10 = pnand %p3395_p8, %p3392_p5 }
  0x30   : > { %3400 = shalt.err (!%p3397_p10)
}
  0x31   : > { %s3401_s25 = scalar_lea.vmem %s3615_s28, 16  ;;  %s3408_s7 = scalar_lea.vmem %s3615_s28, 32 }
  0x32   : > { %p3402_p11 = scmp.ne.s32.totalorder %s3615_s28, %s3401_s25  ;;  %p3409_p0 = scmp.lt.s32.totalorder %s3615_s28, %s3615_s28 }
  0x33   : > { %p3410_p2 = scmp.lt.s32.totalorder %s3408_s7, %s3401_s25 }
  0x34   : > { %p3404_p12 = pnand %p3402_p11, %p3362_p9 }
  0x35   : > { %p3411_p3 = por %p3410_p2, %p3409_p0 }
  0x36   : > { %p3405_p13 = pneg %p3404_p12 }
  0x38   : > { %p3412_p6 = pnand %p3411_p3, %p3405_p13 }
  0x3a   : > { %3415 = shalt.err (!%p3412_p6)
}
  0x3b   : > { %3274 = dma.hbm_to_vmem [thread:$0]  (!%p3611_p7), %s4592_s2, 16, %s3615_s28, [#allocation5]  }
  0x3c   : > { %s26_s12 = sadd.s32 1, %s3512_s17  ;;  %s29_s20 = sadd.s32 1, %s3516_s18 }
  0x3d   : > { %p27_p9 = scmp.ge.s32.totalorder %s26_s12, 2  ;;  %s36_s26 = sadd.s32 1, %s3500_s14 }
  0x3e   : > { %p43_p1 = scmp.ne.s32.totalorder %s3500_s14, %s3496_s13  ;;  %p44_p4 = scmp.eq.s32.totalorder %s3520_s19, 0 }
  0x3f   : > { %s4711_s12 = smov (%p27_p9, %s26_s12), 0  ;;  %s4713_s20 = smov (!%p27_p9, %s29_s20), %s3516_s18 }
  0x40   : > { %p3677_p5 = por %p44_p4, %p43_p1  ;;  %p3281_p8 = scmp.lt.s32.totalorder %s3520_s19, 4 }
  0x41   : > { %p31_p10 = scmp.ge.s32.totalorder %s4713_s20, 2  ;;  %s167_s27 = sand.u32 1, %s3500_s14  }
  0x42   : > { %s3255_s28 = smul.u32 17680, %s167_s27  ;;  %p3697_p11 = pnand %p3281_p8, %p3677_p5 }
  0x43   : > { %s4715_s20 = smov (%p31_p10, %s4713_s20), 0  ;;  %s3256_s29 = smul.u32 282880, %s3516_s18 }
  0x44   : > { %s33_s30 = ssub.s32 %s3516_s18, %s4715_s20  ;;  %s171_s4 = scalar_lea.vmem [#allocation2], %s3255_s28 }
  0x45   : > { %s178_s5 = sshll.u32 %s171_s4, 4  ;;  %p34_p7 = scmp.eq.s32.totalorder %s33_s30, 0  ;;  %s3693_s5 = int_to_ptr.vmem [resolvable:$true] %s178_s5 }
  0x46   : > { %s3691_s7 = scalar_lea.hbm %s4590_s0, %s3256_s29  ;;  %s3704_s28 = scalar_lea.sflag [#allocation3], %s167_s27 }
  0x47   : > { %s3702_s9 = scalar_select %p34_p7, %s3500_s14, %s36_s26  }
  0x48   : > { %s3416_s30 = scalar_lea.hbm %s3691_s7, 282880  ;;  %p3418_p13 = pneg %p3697_p11 }
  0x49   : > { %p3417_p12 = scmp.ne.s32.totalorder %s3691_s7, %s3416_s30  ;;  %s3421_s4 = scalar_lea.hbm %s4590_s0, 565760 }
  0x4a   : > { %p3422_p3 = scmp.lt.u32.totalorder %s3691_s7, %s4590_s0  ;;  %p3423_p6 = scmp.lt.u32.totalorder %s3421_s4, %s3416_s30 }
  0x4b   : > { %p3419_p0 = pnand %p3418_p13, %p3417_p12  ;;  %p3425_p1 = scmp.lt.u32.totalorder %s3416_s30, %s3691_s7 }
  0x4c   : > { %p3424_p9 = por %p3423_p6, %p3422_p3 }
  0x4d   : > { %p3420_p2 = pneg %p3419_p0 }
  0x4e   : > { %p3426_p4 = por %p3425_p1, %p3424_p9 }
  0x50   : > { %p3427_p5 = pnand %p3426_p4, %p3420_p2 }
  0x52   : > { %3430 = shalt.err (!%p3427_p5)
}
  0x53   : > { %s3431_s26 = scalar_lea.vmem %s3693_s5, 282880  ;;  %s3530_s27 = smov [#allocation2]  }
  0x54   : > { %p3432_p8 = scmp.ne.s32.totalorder %s3693_s5, %s3431_s26  ;;  %s3436_s29 = sshll.u32 %s3530_s27, 4  ;;  %s3437_s29 = int_to_ptr.vmem [resolvable:$false] %s3436_s29 }
  0x55   : > { %s3438_s24 = scalar_lea.vmem %s3437_s29, 565760  ;;  %p3439_p12 = scmp.lt.s32.totalorder %s3693_s5, %s3437_s29 }
  0x56   : > { %p3434_p10 = pnand %p3432_p8, %p3418_p13  ;;  %p3440_p0 = scmp.lt.s32.totalorder %s3438_s24, %s3431_s26 }
  0x58   : > { %p3435_p7 = pneg %p3434_p10  ;;  %p3441_p3 = por %p3440_p0, %p3439_p12 }
  0x5a   : > { %p3442_p6 = pnand %p3441_p3, %p3435_p7 }
  0x5c   : > { %3445 = shalt.err (!%p3442_p6)
}
  0x5d   : > { %3278 = dma.hbm_to_vmem [thread:$0]  (!%p3697_p11), %s3691_s7, 282880, %s3693_s5, %s3704_s28, %s3528_s10, %s3528_s10, %s3529_s11  }
  0x5e   : > { %p4627_p13 = scmp.ne.s32.totalorder %s4623_s23, 0 }
  0x5f   : > { %s192_s30 = sand.u32 (!%p4627_p13), 1, %s3496_s13   ;;  %p4628_p2 = scmp.ne.s32.totalorder (!%p4627_p13), %s4622_s22, 0 }
  0x60   : > { %190 = sbr.rel (%p4627_p13) target bundleno = 485 (0x1e5), region = 32  ;;  %s193_s6 = scalar_lea.sflag (!%p4627_p13), [#allocation3], %s192_s30 }
  0x61   : > { %s3738_s4 = smul.u32 (!%p4627_p13), 17680, %s192_s30 }
  0x63   : > { %s196_s25 = scalar_lea.vmem (!%p4627_p13), [#allocation2], %s3738_s4 }
  0x67   : > { %3483 = dma.done.wait (%p4628_p2), %s193_s6, 282880  }
  0x68   : > { %3485 = vsyncadd (%p4628_p2), %s193_s6, 4294684416  ;;  %p4629_p9 = scmp.ne.s32.totalorder %s4621_s21, 0 }
  0x6a   : > { %3487 = dma.done.wait (%p4629_p9), [#allocation5], 2320  }
  0x6b   : > { %3489 = vsyncadd (%p4629_p9), [#allocation5], 4294964976  ;;  %s3750_s23 = sshll.u32 %s3504_s15, 6  ;;  %p233_p11 = scmp.lt.s32.totalorder %s3508_s16, 1  ;;  %v3756_v0 = vld [vmem:[#allocation6] ss:$0 sm:$0xff] }
  0x6c   : > { %p235_p1 = scmp.lt.s32.totalorder %s3750_s23, 127  ;;  %4630 = vst [vmem:[#allocation9_spill] sm:$0xff] %v3756_v0  ;;  %s3763_s26 = smov 0  }
  0x6d   : > { %s4717_s16 = smov (!%p233_p11, %s3508_s16), 1 }
  0x6e   : > { %s236_s10 = scalar_select %p235_p1, %s3750_s23, 127 }
  0x6f   : > { %s2488_s11 = sshll.u32 %s4717_s16, 11 }
  0x70   : > { %s2487_s22 = sshll.u32 %s236_s10, 4 }
  0x71   : > { %s239_s5 = sadd.s32 %s2488_s11, %s2487_s22 }
  0x72   : > { %s2489_s7 = sshll.u32 %s239_s5, 3 }
  0x73   : > { %s3761_s28 = scalar_lea.vmem %s4593_s3, %s2489_s7 }
  0x74 LB: >> { %v274_v1 = vld [vmem:[#allocation4 + $0x10] sm:$0xff]  ;;  %v275_v2 = vld [vmem:[#allocation4 + $0x18] sm:$0xff]  ;;  %v1145_v3 = vld [vmem:[#allocation4 + $0x40] sm:$0xff]  ;;  %s251_s15 = sadd.s32 %s3524_s26, %s3750_s23  ;;  %vm293_vm0 = vcmask 1046528   ;;  %vm327_vm1 = vcmask 130048   ;;  %vm685_vm2 = vcmask 1045504   ;;  %s3524_s26 = sphi %s3763_s26, %s250_s26  }
  0x75   : >> { %v3089_v4 = vpack.c.bf16 %v275_v2, %v274_v1  ;;  %v1146_v5 = vld [vmem:[#allocation4 + $0x48] sm:$0xff]  ;;  %v271_v6 = vld [vmem:[#allocation4] sm:$0xff]  ;;  %v1375_v10 = vld [vmem:[#allocation4 + $0x50] sm:$0xff]  ;;  %s252_s16 = smul.u32 136, %s251_s15  ;;  %s2672_s29 = sshll.u32 %s3524_s26, 7  ;;  %vm2318_vm3 = vcmask 23552  }
  0x76   : >> { %v272_v7 = vld [vmem:[#allocation4 + $0x8] sm:$0xff]  ;;  %v3768_v8 = vpack.c.bf16 %v1146_v5, %v1145_v3  ;;  %v1376_v11 = vld [vmem:[#allocation4 + $0x58] sm:$0xff]  ;;  %v1624_v13 = vld [vmem:[#allocation4 + $0x60] sm:$0xff]  ;;  %s4513_s24 = scalar_lea.vmem %s3761_s28, %s2672_s29  ;;  %s250_s26 = sadd.s32 1, %s3524_s26  }
  0x77   : >> { %v3093_v9 = vpack.c.bf16 %v272_v7, %v271_v6  ;;  %3090 = vmatprep.subr.bf16.mxu1 %v3089_v4  ;;  %v3109_v12 = vpack.c.bf16 %v1376_v11, %v1375_v10  ;;  %s3776_s27 = scalar_lea.vmem %s196_s25, %s252_s16 [#allocation2]  ;;  %v1625_v14 = vld [vmem:[#allocation4 + $0x68] sm:$0xff]  ;;  %v683_v15 = vld [vmem:[#allocation4 + $0x20] sm:$0xff]  ;;  %p247_p4 = scmp.ge.s32.totalorder %s250_s26, 64  }
  0x78   : >> { %3106 = vmatprep.subr.bf16.mxu0 %v3768_v8  ;;  %3092 = vmatpush3.bf16.msra.mxu1 %v3089_v4  ;;  %v684_v16 = vld [vmem:[#allocation4 + $0x28] sm:$0xff]  ;;  %v3779_v17 = vld [vmem:[%s3776_s27] sm:$0xff]  ;;  %v3790_v22 = vld [vmem:[%s3776_s27 + $0x90] sm:$0xff]  ;;  %v3808_v31 = vpack.c.bf16 %v1625_v14, %v1624_v13 }
  0x79   : >> { %3108 = vmatpush3.bf16.msra.mxu0 %v3768_v8  ;;  %3094 = vmatprep.subr.bf16.mxu1 %v3093_v9  ;;  %v3782_v18 = vld [vmem:[%s3776_s27 + $0x8] sm:$0xff]  ;;  %v294_v20 = vrot.slane %v3779_v17, 1  ;;  %4632 = vst [vmem:[#allocation11_spill] sm:$0xff] %v3790_v22  ;;  %v3794_v24 = vld [vmem:[%s3776_s27 + $0x10] sm:$0xff]  ;;  %v3797_v25 = vld [vmem:[%s3776_s27 + $0x98] sm:$0xff]  ;;  %v1149_v26 = vrot.slane %v3790_v22, 1  ;;  %v3822_v38 = vpack.c.bf16 %v684_v16, %v683_v15 }
  0x7a   : >> { %v3785_v19 = vld [vmem:[%s3776_s27 + $0x88] sm:$0xff]  ;;  %3110 = vmatprep.subr.bf16.mxu0 %v3109_v12  ;;  %v295_v21 = vrot.slane %v3782_v18, 1  ;;  %4633 = vst [vmem:[#allocation12_spill] sm:$0xff] %v3797_v25  ;;  %v297_v27 = vrot.slane %v3794_v24, 1  ;;  %v1151_v28 = vrot.slane %v3797_v25, 1  ;;  %v3803_v29 = vld [vmem:[%s3776_s27 + $0x18] sm:$0xff] }
  0x7b   : >> { %4631 = vst [vmem:[#allocation10_spill] sm:$0xff] %v3785_v19  ;;  %v1148_v23 = vrot.slane %v3785_v19, 1  ;;  %v3806_v30 = vld [vmem:[%s3776_s27 + $0xa0] sm:$0xff]  ;;  %v299_v33 = vrot.slane %v3803_v29, 1  ;;  %v3817_v36 = vld [vmem:[%s3776_s27 + $0xa8] sm:$0xff]  ;;  %v3830_v43 = vld [vmem:[%s3776_s27 + $0xb0] sm:$0xff] }
  0x7c   : >> { %4634 = vst [vmem:[#allocation13_spill] sm:$0xff] %v3806_v30  ;;  %v296_v32 = vsel %vm293_vm0, %v294_v20, %v295_v21  ;;  %v1153_v34 = vrot.slane %v3806_v30, 1  ;;  %v3814_v35 = vld [vmem:[%s3776_s27 + $0x20] sm:$0xff]  ;;  %4635 = vst [vmem:[#allocation14_spill] sm:$0xff] %v3817_v36  ;;  %v3820_v37 = vld [vmem:[%s3776_s27 + $0x28] sm:$0xff]  ;;  %v298_v40 = vsel %vm293_vm0, %v295_v21, %v297_v27  ;;  %v1152_v41 = vsel %vm293_vm0, %v1149_v26, %v1151_v28 }
  0x7d   : >> { %2841 = vmatprep.mubr.msk.f32.mxu1 %vm327_vm1, %v296_v32  ;;  %v1150_v39 = vsel %vm293_vm0, %v1148_v23, %v1149_v26  ;;  %v301_v42 = vrot.slane %v3814_v35, 1  ;;  %4636 = vst [vmem:[#allocation15_spill] sm:$0xff] %v3830_v43  ;;  %v3833_v44 = vld [vmem:[%s3776_s27 + $0x30] sm:$0xff]  ;;  %v3836_v45 = vld [vmem:[%s3776_s27 + $0xb8] sm:$0xff]  ;;  %v300_v46 = vsel %vm293_vm0, %v297_v27, %v299_v33  ;;  %v1155_v48 = vrot.slane %v3817_v36, 1  ;;  %v3848_v51 = vld [vmem:[%s3776_s27 + $0xc0] sm:$0xff] }
  0x7e   : >> { %4637 = vst [vmem:[#allocation16_spill] sm:$0xff] %v3836_v45  ;;  %2953 = vmatprep.mubr.msk.f32.mxu0 %vm327_vm1, %v1150_v39  ;;  %2842 = vmatmul.mubr.msk.f32.vlgmr.msra.gmra.mrb[0].mxu1 %vm327_vm1, %v298_v40  ;;  %v1154_v47 = vsel %vm293_vm0, %v1151_v28, %v1153_v34  ;;  %v303_v49 = vrot.slane %v3820_v37, 1  ;;  %v3845_v50 = vld [vmem:[%s3776_s27 + $0x38] sm:$0xff]  ;;  %4638 = vst [vmem:[#allocation17_spill] sm:$0xff] %v3848_v51  ;;  %v1157_v53 = vrot.slane %v3830_v43, 1  ;;  %v305_v54 = vrot.slane %v3833_v44, 1 }
  0x7f   : >> { %3096 = vmatpush3.bf16.msra.mxu1 %v3093_v9  ;;  %2954 = vmatmul.mubr.msk.f32.vlgmr.msra.gmra.mrb[0].mxu0 %vm327_vm1, %v1152_v41  ;;  %v302_v52 = vsel %vm293_vm0, %v299_v33, %v301_v42  ;;  %v1156_v55 = vsel %vm293_vm0, %v1153_v34, %v1155_v48  ;;  %v1159_v57 = vrot.slane %v3836_v45, 1  ;;  %v307_v58 = vrot.slane %v3845_v50, 1  ;;  %v3860_v59 = vld [vmem:[%s3776_s27 + $0x40] sm:$0xff]  ;;  %v3866_v62 = vld [vmem:[%s3776_s27 + $0xc8] sm:$0xff]  ;;  %v3884_v7 = vld [vmem:[%s3776_s27 + $0x50] sm:$0xff] }
  0x80   : >> { %3112 = vmatpush3.bf16.msra.mxu0 %v3109_v12  ;;  %2844 = vmatprep.mubr.msk.f32.mxu1 %vm327_vm1, %v300_v46  ;;  %v304_v56 = vsel %vm293_vm0, %v301_v42, %v303_v49  ;;  %v1158_v60 = vsel %vm293_vm0, %v1155_v48, %v1157_v53  ;;  %v1161_v61 = vrot.slane %v3848_v51, 1  ;;  %v3869_v63 = vld [vmem:[%s3776_s27 + $0x48] sm:$0xff]  ;;  %v306_v1 = vsel %vm293_vm0, %v303_v49, %v305_v54  ;;  %v3890_v12 = vld [vmem:[%s3776_s27 + $0x58] sm:$0xff]  ;;  %v3898_v15 = vld [vmem:[%s3776_s27 + $0x60] sm:$0xff] }
  0x81   : >> { %2956 = vmatprep.mubr.msk.f32.mxu0 %vm327_vm1, %v1154_v47  ;;  %3114 = vmatprep.subr.bf16.mxu0 %v3808_v31  ;;  %v309_v2 = vrot.slane %v3860_v59, 1  ;;  %v1160_v3 = vsel %vm293_vm0, %v1157_v53, %v1159_v57  ;;  %v308_v4 = vsel %vm293_vm0, %v305_v54, %v307_v58  ;;  %v4598_v5 = vrot.slane %v3866_v62, 1  ;;  %v3910_v28 = vld [vmem:[%s3776_s27 + $0x68] sm:$0xff]  ;;  %v1836_v33 = vld [vmem:[#allocation4 + $0x70] sm:$0xff]  ;;  %v1837_v34 = vld [vmem:[#allocation4 + $0x78] sm:$0xff] }
  0x82   : >> { %2845 = vmatmul.mubr.msk.f32.gmra.mrb[2].mxu1 %vm327_vm1, %v302_v52  ;;  %3098 = vmatprep.subr.bf16.mxu1 %v3822_v38  ;;  %v311_v6 = vrot.slane %v3869_v63, 1  ;;  %v1162_v9 = vsel %vm293_vm0, %v1159_v57, %v1161_v61  ;;  %v1377_v10 = vrot.slane %v3785_v19, 2  ;;  %v1378_v11 = vrot.slane %v3790_v22, 2  ;;  %v3919_v41 = vld [vmem:[%s3776_s27 + $0x70] sm:$0xff]  ;;  %v3922_v42 = vld [vmem:[%s3776_s27 + $0x78] sm:$0xff] }
  0x83   : >> { %2957 = vmatmul.mubr.msk.f32.gmra.mrb[2].mxu0 %vm327_vm1, %v1156_v55  ;;  %2847 = vmatprep.mubr.msk.f32.mxu1 %vm327_vm1, %v304_v56  ;;  %v310_v13 = vsel %vm293_vm0, %v307_v58, %v309_v2  ;;  %v313_v14 = vrot.slane %v3884_v7, 1  ;;  %v1380_v16 = vrot.slane %v3797_v25, 2  ;;  %v1164_v20 = vsel %vm293_vm0, %v1161_v61, %v4598_v5  ;;  %v3929_v49 = vld [vmem:[%s3776_s27 + $0x80] sm:$0x3]  ;;  %v3934_v54 = vld [vmem:[%s3776_s27 + $0xd0] sm:$0xff]  ;;  %v3937_v55 = vld [vmem:[%s3776_s27 + $0xd8] sm:$0xff] }
  0x84   : >> { %2959 = vmatprep.mubr.msk.f32.mxu0 %vm327_vm1, %v1158_v60  ;;  %v312_v21 = vsel %vm293_vm0, %v309_v2, %v311_v6  ;;  %v315_v23 = vrot.slane %v3890_v12, 1  ;;  %v1379_v26 = vsel %vm685_vm2, %v1377_v10, %v1378_v11  ;;  %v1382_v27 = vrot.slane %v3806_v30, 2  ;;  %4639 = vst [vmem:[#allocation18_spill] sm:$0xff] %v3937_v55  ;;  %v3940_v56 = vld [vmem:[%s3776_s27 + $0xe0] sm:$0xff]  ;;  %v3950_v2 = vld [vmem:[%s3776_s27 + $0xe8] sm:$0xff] }
  0x85   : >> { %v317_v32 = vrot.slane %v3898_v15, 1  ;;  %v314_v39 = vsel %vm293_vm0, %v311_v6, %v313_v14  ;;  %v1384_v40 = vrot.slane %v3817_v36, 2  ;;  %v1381_v46 = vsel %vm685_vm2, %v1378_v11, %v1380_v16  ;;  %4640 = vst [vmem:[#allocation19_spill] sm:$0xff] %v3940_v56  ;;  %4641 = vst [vmem:[#allocation20_spill] sm:$0xff] %v3950_v2  ;;  %v4088_v36 = vld [vmem:[%s3776_s27 + $0x180] sm:$0xff]  ;;  %v4103_v25 = vld [vmem:[%s3776_s27 + $0x188] sm:$0xff] }
  0x86   : >> { %2848 = vmatmul.mubr.msk.f32.gmra.mrb[4].mxu1 %vm327_vm1, %v306_v1  ;;  %v316_v47 = vsel %vm293_vm0, %v313_v14, %v315_v23  ;;  %v319_v48 = vrot.slane %v3910_v28, 1  ;;  %v1383_v52 = vsel %vm685_vm2, %v1380_v16, %v1382_v27  ;;  %v1386_v53 = vrot.slane %v3830_v43, 2  ;;  %v4097_v30 = vld [vmem:[%s3776_s27 + $0x190] sm:$0x3] }
  0x87   : >> { %2960 = vmatmul.mubr.msk.f32.gmra.mrb[4].mxu0 %vm327_vm1, %v1160_v3  ;;  %2850 = vmatprep.mubr.msk.f32.mxu1 %vm327_vm1, %v308_v4  ;;  %v3942_v57 = vpack.c.bf16 %v1837_v34, %v1836_v33  ;;  %v318_v58 = vsel %vm293_vm0, %v315_v23, %v317_v32  ;;  %v321_v60 = vrot.slane %v3919_v41, 1  ;;  %v1388_v61 = vrot.slane %v3836_v45, 2  ;;  %v933_v3 = vld [vmem:[#allocation4 + $0x30] sm:$0xff]  ;;  %v934_v4 = vld [vmem:[#allocation4 + $0x38] sm:$0xff] }
  0x88   : >> { %2962 = vmatprep.mubr.msk.f32.mxu0 %vm327_vm1, %v1162_v9  ;;  %v323_v1 = vrot.slane %v3922_v42, 1  ;;  %v1385_v6 = vsel %vm685_vm2, %v1382_v27, %v1384_v40  ;;  %v1390_v9 = vrot.slane %v3848_v51, 2  ;;  %v325_v10 = vrot.slane %v3929_v49, 1 }
  0x89   : >> { %v1392_v11 = vrot.slane %v3866_v62, 2  ;;  %v320_v14 = vsel %vm293_vm0, %v317_v32, %v319_v48  ;;  %v1394_v16 = vrot.slane %v3934_v54, 2  ;;  %v1387_v23 = vsel %vm685_vm2, %v1384_v40, %v1386_v53  ;;  %v3981_v40 = vld [vmem:[%s3776_s27 + $0x100] sm:$0xff] }
  0x8a   : >> { %2851 = vmatmul.mubr.msk.f32.gmra.mrb[6].mxu1 %vm327_vm1, %v310_v13  ;;  %v3959_v13 = vld [vmem:[%s3776_s27 + $0xf0] sm:$0xff]  ;;  %v3970_v27 = vpack.c.bf16 %v934_v4, %v933_v3  ;;  %v1389_v32 = vsel %vm685_vm2, %v1386_v53, %v1388_v61  ;;  %v324_v33 = vsel %vm293_vm0, %v321_v60, %v323_v1  ;;  %v691_v3 = vrot.slane %v3803_v29, 2 }
  0x8b   : >> { %2963 = vmatmul.mubr.msk.f32.gmra.mrb[6].mxu0 %vm327_vm1, %v1164_v20  ;;  %2853 = vmatprep.mubr.msk.f32.mxu1 %vm327_vm1, %v312_v21  ;;  %4642 = vst [vmem:[#allocation21_spill] sm:$0xff] %v3959_v13  ;;  %v1396_v20 = vrot.slane %v3937_v55, 2  ;;  %v1398_v21 = vrot.slane %v3940_v56, 2  ;;  %v4600_v34 = vrot.slane %v3959_v13, 2  ;;  %v1395_v53 = vsel %vm685_vm2, %v1392_v11, %v1394_v16  ;;  %v4076_v55 = vld [vmem:[%s3776_s27 + $0x170] sm:$0xff] }
  0x8c   : >> { %2981 = vmatprep.mubr.msk.f32.mxu0 %vm327_vm1, %v1379_v26  ;;  %v1400_v26 = vrot.slane %v3950_v2, 2  ;;  %v697_v5 = vrot.slane %v3833_v44, 2  ;;  %v4065_v2 = vld [vmem:[%s3776_s27 + $0x168] sm:$0xff]  ;;  %v1862_v45 = vrot.slane %v4076_v55, 1  ;;  %v711_v19 = vrot.slane %v3910_v28, 2 }
  0x8e   : >> { %2854 = vmatmul.mubr.msk.f32.gmra.mrb[8].mxu1 %vm327_vm1, %v314_v39  ;;  %v3978_v39 = vld [vmem:[%s3776_s27 + $0xf8] sm:$0xff] }
  0x8f   : >> { %2982 = vmatmul.mubr.msk.f32.vlgmr.msra.gmra.mrb[0].mxu0 %vm327_vm1, %v1381_v46  ;;  %2856 = vmatprep.mubr.msk.f32.mxu1 %vm327_vm1, %v316_v47  ;;  %4643 = vst [vmem:[#allocation22_spill] sm:$0xff] %v3978_v39  ;;  %v4599_v46 = vrot.slane %v3794_v24, 2  ;;  %v1391_v47 = vsel %vm685_vm2, %v1388_v61, %v1390_v9  ;;  %v3999_v61 = vsel %vm685_vm2, %v1398_v21, %v1400_v26 }
  0x90   : >> { %3116 = vmatpush3.bf16.msra.mxu0 %v3808_v31  ;;  %2984 = vmatprep.mubr.msk.f32.mxu0 %vm327_vm1, %v1383_v52  ;;  %v322_v31 = vsel %vm293_vm0, %v319_v48, %v321_v60  ;;  %v326_v48 = vsel %vm293_vm0, %v323_v1, %v325_v10  ;;  %v1393_v52 = vsel %vm685_vm2, %v1390_v9, %v1392_v11  ;;  %v693_v9 = vrot.slane %v3814_v35, 2  ;;  %v4047_v1 = vld [vmem:[%s3776_s27 + $0x160] sm:$0xff] }
  0x91   : >> { %3118 = vmatprep.subr.bf16.mxu0 %v3942_v57  ;;  %v3995_v60 = vsel %vm685_vm2, %v1396_v20, %v1398_v21  ;;  %v4011_v10 = vsel %vm685_vm2, %v1400_v26, %v4600_v34  ;;  %v4028_v26 = vld [vmem:[%s3776_s27 + $0x150] sm:$0xff]  ;;  %v699_v21 = vrot.slane %v3845_v50, 2  ;;  %v1858_v11 = vrot.slane %v4047_v1, 1 }
  0x92   : >> { %2857 = vmatmul.mubr.msk.f32.gmra.mrb[10].mxu1 %vm327_vm1, %v318_v58  ;;  %v3992_v58 = vsel %vm685_vm2, %v1394_v16, %v1396_v20  ;;  %v4020_v16 = vsel %vm685_vm2, %v4599_v46, %v691_v3  ;;  %v695_v20 = vrot.slane %v3820_v37, 2  ;;  %v1854_v4 = vrot.slane %v4028_v26, 1 }
  0x93   : >> { %2985 = vmatmul.mubr.msk.f32.gmra.mrb[2].mxu0 %vm327_vm1, %v1385_v6  ;;  %2859 = vmatprep.mubr.msk.f32.mxu1 %vm327_vm1, %v320_v14  ;;  %v4004_v6 = vld [vmem:[%s3776_s27 + $0x140] sm:$0xff]  ;;  %v4015_v14 = vld [vmem:[%s3776_s27 + $0x148] sm:$0xff]  ;;  %v701_v46 = vrot.slane %v3860_v59, 2  ;;  %v4057_v0 = vsel %vm685_vm2, %v697_v5, %v699_v21  ;;  %v703_v34 = vrot.slane %v3869_v63, 2 }
  0x94   : >> { %2987 = vmatprep.mubr.msk.f32.mxu0 %vm327_vm1, %v1387_v23  ;;  %v1852_v23 = vrot.slane %v4015_v14, 1 }
  0x95   : >> { %v4082_v51 = vsel %vm685_vm2, %v701_v46, %v703_v34 }
  0x96   : >> { %2860 = vmatmul.mubr.msk.f32.gmra.mrb[12].mxu1 %vm327_vm1, %v322_v31  ;;  %v4031_v31 = vsel %vm685_vm2, %v691_v3, %v693_v9  ;;  %4645 = vst [vmem:[#allocation24_spill] sm:$0xff] %v4082_v51 }
  0x97   : >> { %2988 = vmatmul.mubr.msk.f32.gmra.mrb[4].mxu0 %vm327_vm1, %v1389_v32  ;;  %2862 = vmatprep.mubr.msk.f32.mxu1 %vm327_vm1, %v324_v33  ;;  %v4038_v32 = vld [vmem:[%s3776_s27 + $0x158] sm:$0xff]  ;;  %v4041_v33 = vsel %vm685_vm2, %v693_v9, %v695_v20  ;;  %v705_v9 = vrot.slane %v3884_v7, 2 }
  0x98   : >> { %2990 = vmatprep.mubr.msk.f32.mxu0 %vm327_vm1, %v1391_v47  ;;  %v1856_v3 = vrot.slane %v4038_v32, 1  ;;  %v4050_v47 = vsel %vm685_vm2, %v695_v20, %v697_v5  ;;  %v707_v5 = vrot.slane %v3890_v12, 2  ;;  %v4079_v20 = vld [vmem:[%s3776_s27 + $0x178] sm:$0xff] }
  0x99   : >> { %v1864_v43 = vrot.slane %v4079_v20, 1 }
  0x9a   : >> { %2863 = vmatmul.mubr.msk.f32.gmra.mrb[14].mxu1 %vm327_vm1, %v326_v48  ;;  %v4068_v48 = vsel %vm685_vm2, %v699_v21, %v701_v46  ;;  %v709_v21 = vrot.slane %v3898_v15, 2  ;;  %v4094_v56 = vsel %vm685_vm2, %v705_v9, %v707_v5  ;;  %v1866_v46 = vrot.slane %v4088_v36, 1 }
  0x9b   : >> { %2991 = vmatmul.mubr.msk.f32.gmra.mrb[6].mxu0 %vm327_vm1, %v1393_v52  ;;  %2869 = vmatprep.mubr.msk.f32.mxu1 %vm327_vm1, %v3779_v17  ;;  %4644 = vst [vmem:[#allocation23_spill] sm:$0xff] %v4068_v48  ;;  %v1860_v52 = vrot.slane %v4065_v2, 1  ;;  %4647 = vst [vmem:[#allocation26_spill] sm:$0xff] %v4094_v56  ;;  %v715_v56 = vrot.slane %v3922_v42, 2  ;;  %v4133_v48 = vsel %vm293_vm0, %v1852_v23, %v1854_v4 }
  0x9c   : >> { %2993 = vmatprep.mubr.msk.f32.mxu0 %vm327_vm1, %v1395_v53  ;;  %v4091_v53 = vsel %vm685_vm2, %v703_v34, %v705_v9  ;;  %v4106_v22 = vsel %vm685_vm2, %v707_v5, %v709_v21  ;;  %v713_v34 = vrot.slane %v3919_v41, 2  ;;  %v1868_v9 = vrot.slane %v4103_v25, 1 }
  0x9d   : >> { %4646 = vst [vmem:[#allocation25_spill] sm:$0xff] %v4091_v53  ;;  %4648 = vst [vmem:[#allocation27_spill] sm:$0xff] %v4106_v22  ;;  %v4649_v53 = vrot.slane %v4004_v6, 1  ;;  %v717_v5 = vrot.slane %v3929_v49, 2 }
  0x9e   : >> { %2870 = vmatmul.mubr.msk.f32.vlgmr.msra.gmra.mrb[0].mxu1 %vm327_vm1, %v3782_v18  ;;  %v4130_v22 = vsel %vm685_vm2, %v711_v19, %v713_v34  ;;  %v4138_v49 = vsel %vm685_vm2, %v713_v34, %v715_v56  ;;  %v4158_v34 = vsel %vm293_vm0, %v1862_v45, %v1864_v43 }
  0x9f   : >> { %3100 = vmatpush3.bf16.msra.mxu1 %v3822_v38  ;;  %2994 = vmatmul.mubr.msk.f32.gmra.mrb[8].mxu0 %vm327_vm1, %v3992_v58  ;;  %v4118_v51 = vsel %vm293_vm0, %v4649_v53, %v1852_v23  ;;  %v2556_v38 = vld [vmem:[%s3776_s27 + $0x108] sm:$0x3]  ;;  %v4127_v58 = vsel %vm685_vm2, %v709_v21, %v711_v19  ;;  %v1870_v53 = vrot.slane %v4097_v30, 1  ;;  %v4147_v21 = vsel %vm293_vm0, %v1856_v3, %v1858_v11 }
  0xa0   : >> { %4650 = vst [vmem:[#allocation28_spill] sm:$0xff] %v4118_v51  ;;  %2872 = vmatprep.mubr.msk.f32.mxu1 %vm327_vm1, %v3794_v24  ;;  %2996 = vmatprep.mubr.msk.f32.mxu0 %vm327_vm1, %v3995_v60  ;;  %v4141_v51 = vsel %vm685_vm2, %v715_v56, %v717_v5  ;;  %v4144_v60 = vsel %vm293_vm0, %v1854_v4, %v1856_v3  ;;  %v1408_v4 = vrot.slane %v2556_v38, 2 }
  0xa1   : >> { %3102 = vmatprep.subr.bf16.mxu1 %v3970_v27  ;;  %v4152_v19 = vsel %vm293_vm0, %v1858_v11, %v1860_v52  ;;  %v4155_v23 = vsel %vm293_vm0, %v1860_v52, %v1862_v45  ;;  %v4161_v56 = vsel %vm293_vm0, %v1864_v43, %v1866_v46  ;;  %v4169_v11 = vsel %vm293_vm0, %v1866_v46, %v1868_v9 }
  0xa2   : >> { %2873 = vmatmul.mubr.msk.f32.gmra.mrb[2].mxu1 %vm327_vm1, %v3803_v29  ;;  %4651 = vst [vmem:[#allocation29_spill] sm:$0xff] %v4161_v56  ;;  %v2091_v29 = vrot.slane %v4076_v55, 2  ;;  %4652 = vst [vmem:[#allocation30_spill] sm:$0xff] %v4169_v11  ;;  %v4172_v3 = vsel %vm293_vm0, %v1868_v9, %v1870_v53  ;;  %v4654_v43 = vrot.slane %v3978_v39, 2  ;;  %v4655_v45 = vrot.slane %v3959_v13, 2 }
  0xa3   : >> { %2997 = vmatmul.mubr.msk.f32.gmra.mrb[10].mxu0 %vm327_vm1, %v3999_v61  ;;  %2875 = vmatprep.mubr.msk.f32.mxu1 %vm327_vm1, %v3814_v35  ;;  %4653 = vst [vmem:[#allocation31_spill] sm:$0xff] %v4172_v3  ;;  %v4656_v35 = vrot.slane %v3981_v40, 2  ;;  %v2093_v46 = vrot.slane %v4079_v20, 2  ;;  %v4658_v9 = vrot.slane %v4015_v14, 2  ;;  %v4659_v53 = vrot.slane %v4004_v6, 2 }
  0xa4   : >> { %2999 = vmatprep.mubr.msk.f32.mxu0 %vm327_vm1, %v4011_v10  ;;  %v1405_v61 = vsel %vm685_vm2, %v4655_v45, %v4654_v43  ;;  %v4657_v52 = vmov %v4654_v43  ;;  %v2095_v13 = vrot.slane %v4088_v36, 2  ;;  %v2097_v43 = vrot.slane %v4103_v25, 2 }
  0xa5   : >> { %v1407_v5 = vsel %vm685_vm2, %v4657_v52, %v4656_v35  ;;  %v4192_v10 = vsel %vm685_vm2, %v4659_v53, %v4658_v9  ;;  %v4661_v45 = vrot.slane %v4028_v26, 2  ;;  %v4662_v39 = vmov %v4658_v9 }
  0xa6   : >> { %4660 = vst [vmem:[#allocation32_spill] sm:$0xff] %v4192_v10  ;;  %v4620_v52 = vrot.slane %v3934_v54, 1  ;;  %2876 = vmatmul.mubr.msk.f32.gmra.mrb[4].mxu1 %vm327_vm1, %v3820_v37  ;;  %v4663_v9 = vrot.slane %v4038_v32, 2  ;;  %v4665_v3 = vrot.slane %v4047_v1, 2 }
  0xa7   : >> { %v4201_v35 = vsel %vm685_vm2, %v4662_v39, %v4661_v45  ;;  %v4664_v53 = vmov %v4661_v45  ;;  %v4667_v39 = vrot.slane %v4065_v2, 2  ;;  %3000 = vmatmul.mubr.msk.f32.gmra.mrb[12].mxu0 %vm327_vm1, %v1405_v61  ;;  %2878 = vmatprep.mubr.msk.f32.mxu1 %vm327_vm1, %v3833_v44  ;;  %v4672_v61 = vrot.slane %v3981_v40, 2 }
  0xa8   : >> { %v4211_v10 = vsel %vm685_vm2, %v4664_v53, %v4663_v9  ;;  %v4666_v11 = vmov %v4663_v9  ;;  %v4668_v45 = vmov %v4665_v3  ;;  %v4669_v9 = vrot.slane %v3866_v62, 1  ;;  %3002 = vmatprep.mubr.msk.f32.mxu0 %vm327_vm1, %v1407_v5  ;;  %v2066_v5 = vld [vmem:[#allocation4 + $0x80] sm:$0xff] }
  0xa9   : >> { %v4218_v56 = vsel %vm685_vm2, %v4666_v11, %v4665_v3  ;;  %v4225_v37 = vsel %vm685_vm2, %v4668_v45, %v4667_v39  ;;  %v4670_v11 = vmov %v4667_v39  ;;  %v1409_v39 = vsel %vm685_vm2, %v4672_v61, %v1408_v4  ;;  %v4250_v45 = vld [vmem:[%s3776_s27 + $0x110] sm:$0xff] }
  0xaa   : >> { %v4235_v53 = vsel %vm293_vm0, %v4669_v9, %v4620_v52  ;;  %v4240_v3 = vsel %vm685_vm2, %v4670_v11, %v2091_v29  ;;  %v4247_v44 = vsel %vm685_vm2, %v2091_v29, %v2093_v46  ;;  %v4253_v9 = vsel %vm685_vm2, %v2093_v46, %v2095_v13  ;;  %2879 = vmatmul.mubr.msk.f32.gmra.mrb[6].mxu1 %vm327_vm1, %v3845_v50 }
  0xab   : >> { %4671 = vst [vmem:[#allocation33_spill] sm:$0xff] %v4240_v3  ;;  %v1177_v52 = vrot.slane %v3981_v40, 1  ;;  %v4257_v11 = vsel %vm685_vm2, %v2095_v13, %v2097_v43  ;;  %v2067_v3 = vld [vmem:[#allocation4 + $0x88] sm:$0xff]  ;;  %v1179_v4 = vrot.slane %v2556_v38, 1  ;;  %v2099_v29 = vrot.slane %v4097_v30, 2  ;;  %3003 = vmatmul.mubr.msk.f32.gmra.mrb[14].mxu0 %vm327_vm1, %v1409_v39  ;;  %2881 = vmatprep.mubr.msk.f32.mxu1 %vm327_vm1, %v3860_v59  ;;  %v4268_v13 = vld [vmem:[%s3776_s27 + $0x118] sm:$0xff] }
  0xac   : >> { %3009 = vmatprep.mubr.msk.f32.mxu0 %vm327_vm1, %v4250_v45  ;;  %v4279_v30 = vld [vmem:[%s3776_s27 + $0x120] sm:$0xff]  ;;  %v3121_v46 = vpack.c.bf16 %v2067_v3, %v2066_v5  ;;  %v4291_v59 = vld [vmem:[%s3776_s27 + $0x128] sm:$0xff]  ;;  %v4690_v39 = vld [vmem:[#allocation17_spill] sm:$0xff] }
  0xad   : >> { %v4273_v50 = vsel %vm293_vm0, %v1177_v52, %v1179_v4  ;;  %v4276_v38 = vsel %vm685_vm2, %v2097_v43, %v2099_v29  ;;  %v4294_v43 = vld [vmem:[%s3776_s27 + $0x130] sm:$0xff]  ;;  %v4689_v3 = vld [vmem:[#allocation30_spill] sm:$0xff] }
  0xae   : >> { %2882 = vmatmul.mubr.msk.f32.gmra.mrb[8].mxu1 %vm327_vm1, %v3869_v63  ;;  %v4305_v63 = vld [vmem:[%s3776_s27 + $0x138] sm:$0xff]  ;;  %v2075_v5 = vrot.slane %v4294_v43, 2 }
  0xaf   : >> { %3010 = vmatmul.mubr.msk.f32.vlgmr.msra.gmra.mrb[0].mxu0 %vm327_vm1, %v4268_v13  ;;  %2884 = vmatprep.mubr.msk.f32.mxu1 %vm327_vm1, %v3884_v7  ;;  %v686_v7 = vrot.slane %v3779_v17, 2  ;;  %v4673_v17 = vrot.slane %v3794_v24, 2  ;;  %v1839_v24 = vrot.slane %v4250_v45, 1  ;;  %v2077_v29 = vrot.slane %v4305_v63, 2 }
  0xb0   : >> { %3120 = vmatpush3.bf16.msra.mxu0 %v3942_v57  ;;  %3012 = vmatprep.mubr.msk.f32.mxu0 %vm327_vm1, %v4279_v30  ;;  %v687_v57 = vrot.slane %v3782_v18, 2 }
  0xb1   : >> { %3122 = vmatprep.subr.bf16.mxu0 %v3121_v46 }
  0xb2   : >> { %2885 = vmatmul.mubr.msk.f32.gmra.mrb[10].mxu1 %vm327_vm1, %v3890_v12  ;;  %v688_v12 = vsel %vm685_vm2, %v686_v7, %v687_v57  ;;  %v690_v18 = vsel %vm685_vm2, %v687_v57, %v4673_v17  ;;  %v4696_v57 = vld [vmem:[#allocation21_spill] sm:$0xff]  ;;  %v4697_v17 = vld [vmem:[#allocation22_spill] sm:$0xff] }
  0xb3   : >> { %3013 = vmatmul.mubr.msk.f32.gmra.mrb[2].mxu0 %vm327_vm1, %v4291_v59  ;;  %2887 = vmatprep.mubr.msk.f32.mxu1 %vm327_vm1, %v3898_v15  ;;  %v1840_v15 = vrot.slane %v4268_v13, 1 }
  0xb4   : >> { %3015 = vmatprep.mubr.msk.f32.mxu0 %vm327_vm1, %v4294_v43 }
  0xb6   : >> { %2888 = vmatmul.mubr.msk.f32.gmra.mrb[12].mxu1 %vm327_vm1, %v3910_v28  ;;  %v1842_v28 = vrot.slane %v4279_v30, 1 }
  0xb7   : >> { %3016 = vmatmul.mubr.msk.f32.gmra.mrb[4].mxu0 %vm327_vm1, %v4305_v63  ;;  %2890 = vmatprep.mubr.msk.f32.mxu1 %vm327_vm1, %v3919_v41  ;;  %v1844_v41 = vrot.slane %v4291_v59, 1 }
  0xb8   : >> { %3018 = vmatprep.mubr.msk.f32.mxu0 %vm327_vm1, %v4004_v6 }
  0xba   : >> { %2891 = vmatmul.mubr.msk.f32.gmra.mrb[14].mxu1 %vm327_vm1, %v3922_v42  ;;  %v1841_v42 = vsel %vm293_vm0, %v1839_v24, %v1840_v15 }
  0xbb   : >> { %3019 = vmatmul.mubr.msk.f32.gmra.mrb[6].mxu0 %vm327_vm1, %v4015_v14  ;;  %2897 = vmatprep.mubr.msk.f32.mxu1 %vm327_vm1, %v688_v12  ;;  %v4676_v14 = vld [vmem:[#allocation25_spill] sm:$0xff] }
  0xbc   : >> { %3021 = vmatprep.mubr.msk.f32.mxu0 %vm327_vm1, %v4028_v26 }
  0xbe   : >> { %2898 = vmatmul.mubr.msk.f32.vlgmr.msra.gmra.mrb[0].mxu1 %vm327_vm1, %v690_v18  ;;  %v4698_v18 = vld [vmem:[#allocation32_spill] sm:$0xff] }
  0xbf   : >> { %3104 = vmatpush3.bf16.msra.mxu1 %v3970_v27  ;;  %3022 = vmatmul.mubr.msk.f32.gmra.mrb[8].mxu0 %vm327_vm1, %v4038_v32  ;;  %v1843_v27 = vsel %vm293_vm0, %v1840_v15, %v1842_v28  ;;  %v4679_v32 = vrot.slane %v4004_v6, 1 }
  0xc0   : >> { %2900 = vmatprep.mubr.msk.f32.mxu1 %vm327_vm1, %v4020_v16  ;;  %3024 = vmatprep.mubr.msk.f32.mxu0 %vm327_vm1, %v4047_v1  ;;  %v1845_v1 = vsel %vm293_vm0, %v1842_v28, %v1844_v41  ;;  %v4677_v16 = vld [vmem:[#allocation26_spill] sm:$0xff] }
  0xc1   : >> { %3125 = vmatprep.subr.bf16.mxu1 %v3768_v8 }
  0xc2   : >> { %2901 = vmatmul.mubr.msk.f32.gmra.mrb[2].mxu1 %vm327_vm1, %v4031_v31  ;;  %v4678_v31 = vld [vmem:[#allocation27_spill] sm:$0xff] }
  0xc3   : >> { %3025 = vmatmul.mubr.msk.f32.gmra.mrb[10].mxu0 %vm327_vm1, %v4065_v2  ;;  %2903 = vmatprep.mubr.msk.f32.mxu1 %vm327_vm1, %v4041_v33  ;;  %v4675_v2 = vld [vmem:[#allocation24_spill] sm:$0xff] }
  0xc4   : >> { %3027 = vmatprep.mubr.msk.f32.mxu0 %vm327_vm1, %v4076_v55  ;;  %v4674_v55 = vld [vmem:[#allocation23_spill] sm:$0xff] }
  0xc6   : >> { %2904 = vmatmul.mubr.msk.f32.gmra.mrb[4].mxu1 %vm327_vm1, %v4050_v47  ;;  %v4680_v47 = vld [vmem:[#allocation28_spill] sm:$0xff] }
  0xc7   : >> { %3028 = vmatmul.mubr.msk.f32.gmra.mrb[12].mxu0 %vm327_vm1, %v4079_v20  ;;  %2906 = vmatprep.mubr.msk.f32.mxu1 %vm327_vm1, %v4057_v0  ;;  %v1846_v0 = vrot.slane %v4294_v43, 1  ;;  %v4681_v20 = vld [vmem:[#allocation10_spill] sm:$0xff]  ;;  %v4694_v43 = vld [vmem:[#allocation20_spill] sm:$0xff] }
  0xc8   : >> { %3030 = vmatprep.mubr.msk.f32.mxu0 %vm327_vm1, %v4088_v36  ;;  %v1848_v36 = vrot.slane %v4305_v63, 1  ;;  %v4695_v63 = vrot.slane %v4004_v6, 2  ;;  %v4699_v6 = vrot.slane %v3934_v54, 1  ;;  %v1171_v28 = vrot.slane %v4694_v43, 1 }
  0xca   : >> { %2907 = vmatmul.mubr.msk.f32.gmra.mrb[6].mxu1 %vm327_vm1, %v4674_v55  ;;  %v1849_v26 = vsel %vm293_vm0, %v1846_v0, %v1848_v36  ;;  %v1851_v33 = vsel %vm293_vm0, %v1848_v36, %v4679_v32  ;;  %v2080_v7 = vsel %vm685_vm2, %v2077_v29, %v4695_v63 }
  0xcb   : >> { %3031 = vmatmul.mubr.msk.f32.gmra.mrb[14].mxu0 %vm327_vm1, %v4103_v25  ;;  %2909 = vmatprep.mubr.msk.f32.mxu1 %vm327_vm1, %v4675_v2  ;;  %v1847_v25 = vsel %vm293_vm0, %v1844_v41, %v1846_v0 }
  0xcc   : >> { %3037 = vmatprep.mubr.msk.f32.mxu0 %vm327_vm1, %v1841_v42  ;;  %v1173_v42 = vrot.slane %v4696_v57, 1 }
  0xce   : >> { %2910 = vmatmul.mubr.msk.f32.gmra.mrb[8].mxu1 %vm327_vm1, %v4676_v14 }
  0xcf   : >> { %3038 = vmatmul.mubr.msk.f32.vlgmr.msra.gmra.mrb[0].mxu0 %vm327_vm1, %v1843_v27  ;;  %2912 = vmatprep.mubr.msk.f32.mxu1 %vm327_vm1, %v4677_v16 }
  0xd0   : >> { %3124 = vmatpush3.bf16.msra.mxu0 %v3121_v46  ;;  %3040 = vmatprep.mubr.msk.f32.mxu0 %vm327_vm1, %v1845_v1  ;;  %v2078_v46 = vsel %vm685_vm2, %v2075_v5, %v2077_v29 }
  0xd2   : >> { %2913 = vmatmul.mubr.msk.f32.gmra.mrb[10].mxu1 %vm327_vm1, %v4678_v31 }
  0xd3   : >> { %3041 = vmatmul.mubr.msk.f32.gmra.mrb[2].mxu0 %vm327_vm1, %v1847_v25  ;;  %2915 = vmatprep.mubr.msk.f32.mxu1 %vm327_vm1, %v4127_v58  ;;  %v4683_v58 = vld [vmem:[#allocation12_spill] sm:$0xff] }
  0xd4   : >> { %3043 = vmatprep.mubr.msk.f32.mxu0 %vm327_vm1, %v1849_v26 }
  0xd6   : >> { %2916 = vmatmul.mubr.msk.f32.gmra.mrb[12].mxu1 %vm327_vm1, %v4130_v22  ;;  %v4682_v22 = vld [vmem:[#allocation11_spill] sm:$0xff] }
  0xd7   : >> { %3044 = vmatmul.mubr.msk.f32.gmra.mrb[4].mxu0 %vm327_vm1, %v1851_v33  ;;  %2918 = vmatprep.mubr.msk.f32.mxu1 %vm327_vm1, %v4138_v49  ;;  %v2069_v49 = vrot.slane %v4268_v13, 2 }
  0xd8   : >> { %3046 = vmatprep.mubr.msk.f32.mxu0 %vm327_vm1, %v4680_v47 }
  0xda   : >> { %2919 = vmatmul.mubr.msk.f32.gmra.mrb[14].mxu1 %vm327_vm1, %v4141_v51  ;;  %v4684_v51 = vld [vmem:[#allocation13_spill] sm:$0xff] }
  0xdb   : >> { %3047 = vmatmul.mubr.msk.f32.gmra.mrb[6].mxu0 %vm327_vm1, %v4133_v48  ;;  %2925 = vmatprep.mubr.msk.f32.mxu1 %vm327_vm1, %v4681_v20  ;;  %v4685_v48 = vld [vmem:[#allocation14_spill] sm:$0xff] }
  0xdc   : >> { %3049 = vmatprep.mubr.msk.f32.mxu0 %vm327_vm1, %v4144_v60  ;;  %v4686_v60 = vld [vmem:[#allocation15_spill] sm:$0xff] }
  0xde   : >> { %2926 = vmatmul.mubr.msk.f32.vlgmr.msra.gmra.mrb[0].mxu1 %vm327_vm1, %v4682_v22 }
  0xdf   : >> { %3126 = vmatpush3.bf16.msra.mxu1 %v3768_v8  ;;  %3050 = vmatmul.mubr.msk.f32.gmra.mrb[8].mxu0 %vm327_vm1, %v4147_v21  ;;  %v2068_v8 = vrot.slane %v4250_v45, 2  ;;  %v4687_v21 = vld [vmem:[#allocation29_spill] sm:$0xff]  ;;  %v4691_v45 = vld [vmem:[#allocation31_spill] sm:$0xff] }
  0xe0   : >> { %2928 = vmatprep.mubr.msk.f32.mxu1 %vm327_vm1, %v4683_v58  ;;  %3052 = vmatprep.mubr.msk.f32.mxu0 %vm327_vm1, %v4152_v19  ;;  %v4688_v19 = vld [vmem:[#allocation16_spill] sm:$0xff] }
  0xe1   : >> { %v2070_v61 = vsel %vm685_vm2, %v2068_v8, %v2069_v49 }
  0xe2   : >> { %2929 = vmatmul.mubr.msk.f32.gmra.mrb[2].mxu1 %vm327_vm1, %v4684_v51 }
  0xe3   : >> { %3053 = vmatmul.mubr.msk.f32.gmra.mrb[10].mxu0 %vm327_vm1, %v4155_v23  ;;  %2931 = vmatprep.mubr.msk.f32.mxu1 %vm327_vm1, %v4685_v48  ;;  %v2071_v23 = vrot.slane %v4279_v30, 2  ;;  %v4692_v30 = vld [vmem:[#allocation18_spill] sm:$0xff] }
  0xe4   : >> { %3055 = vmatprep.mubr.msk.f32.mxu0 %vm327_vm1, %v4158_v34  ;;  %v2073_v34 = vrot.slane %v4291_v59, 2  ;;  %v4693_v59 = vld [vmem:[#allocation19_spill] sm:$0xff]  ;;  %v1167_v12 = vrot.slane %v4692_v30, 1 }
  0xe5   : >> { %v2072_v4 = vsel %vm685_vm2, %v2069_v49, %v2071_v23  ;;  %v1169_v24 = vrot.slane %v4693_v59, 1 }
  0xe6   : >> { %2932 = vmatmul.mubr.msk.f32.gmra.mrb[4].mxu1 %vm327_vm1, %v4686_v60  ;;  %v2074_v13 = vsel %vm685_vm2, %v2071_v23, %v2073_v34  ;;  %v1168_v15 = vsel %vm293_vm0, %v4699_v6, %v1167_v12 }
  0xe7   : >> { %3056 = vmatmul.mubr.msk.f32.gmra.mrb[12].mxu0 %vm327_vm1, %v4687_v21  ;;  %2934 = vmatprep.mubr.msk.f32.mxu1 %vm327_vm1, %v4688_v19  ;;  %v1170_v41 = vsel %vm293_vm0, %v1167_v12, %v1169_v24 }
  0xe8   : >> { %3058 = vmatprep.mubr.msk.f32.mxu0 %vm327_vm1, %v4689_v3 }
  0xea   : >> { %2935 = vmatmul.mubr.msk.f32.gmra.mrb[6].mxu1 %vm327_vm1, %v4690_v39 }
  0xeb   : >> { %3059 = vmatmul.mubr.msk.f32.gmra.mrb[14].mxu0 %vm327_vm1, %v4691_v45  ;;  %2937 = vmatprep.mubr.msk.f32.mxu1 %vm327_vm1, %v3866_v62  ;;  %v2076_v62 = vsel %vm685_vm2, %v2073_v34, %v2075_v5 }
  0xec   : >> { %3065 = vmatprep.mubr.msk.f32.mxu0 %vm327_vm1, %v2070_v61 }
  0xee   : >> { %2938 = vmatmul.mubr.msk.f32.gmra.mrb[8].mxu1 %vm327_vm1, %v3934_v54  ;;  %v1172_v54 = vsel %vm293_vm0, %v1169_v24, %v1171_v28 }
  0xef   : >> { %3066 = vmatmul.mubr.msk.f32.vlgmr.msra.gmra.mrb[0].mxu0 %vm327_vm1, %v2072_v4  ;;  %2940 = vmatprep.mubr.msk.f32.mxu1 %vm327_vm1, %v4692_v30 }
  0xf0   : >> { %3068 = vmatprep.mubr.msk.f32.mxu0 %vm327_vm1, %v2074_v13 }
  0xf2   : >> { %2941 = vmatmul.mubr.msk.f32.gmra.mrb[10].mxu1 %vm327_vm1, %v4693_v59 }
  0xf3   : >> { %3069 = vmatmul.mubr.msk.f32.gmra.mrb[2].mxu0 %vm327_vm1, %v2076_v62  ;;  %2943 = vmatprep.mubr.msk.f32.mxu1 %vm327_vm1, %v4694_v43 }
  0xf4   : >> { %3071 = vmatprep.mubr.msk.f32.mxu0 %vm327_vm1, %v2078_v46 }
  0xf6   : >> { %2944 = vmatmul.mubr.msk.f32.gmra.mrb[12].mxu1 %vm327_vm1, %v4696_v57 }
  0xf7   : >> { %3072 = vmatmul.mubr.msk.f32.gmra.mrb[4].mxu0 %vm327_vm1, %v2080_v7  ;;  %2946 = vmatprep.mubr.msk.f32.mxu1 %vm327_vm1, %v4697_v17 }
  0xf8   : >> { %3074 = vmatprep.mubr.msk.f32.mxu0 %vm327_vm1, %v4698_v18 }
  0xfa   : >> { %2947 = vmatmul.mubr.msk.f32.gmra.mrb[14].mxu1 %vm327_vm1, %v3981_v40 }
  0xfb   : >> { %3075 = vmatmul.mubr.msk.f32.gmra.mrb[6].mxu0 %vm327_vm1, %v4201_v35  ;;  %2965 = vmatprep.mubr.msk.f32.mxu1 %vm327_vm1, %v4235_v53  ;;  %v1175_v35 = vrot.slane %v4697_v17, 1  ;;  %v4700_v53 = vld [vmem:[#allocation33_spill] sm:$0xff] }
  0xfc   : >> { %3077 = vmatprep.mubr.msk.f32.mxu0 %vm327_vm1, %v4211_v10  ;;  %v1174_v10 = vsel %vm293_vm0, %v1171_v28, %v1173_v42 }
  0xfd   : >> { %v1178_v55 = vsel %vm293_vm0, %v1175_v35, %v1177_v52 }
  0xfe   : >> { %2966 = vmatmul.mubr.msk.f32.vlgmr.msra.gmra.mrb[8].mxu1 %vm327_vm1, %v1168_v15 }
  0xff   : >> { %3078 = vmatmul.mubr.msk.f32.gmra.mrb[8].mxu0 %vm327_vm1, %v4218_v56  ;;  %2968 = vmatprep.mubr.msk.f32.mxu1 %vm327_vm1, %v1170_v41  ;;  %v1176_v56 = vsel %vm293_vm0, %v1173_v42, %v1175_v35 }
 0x100   : >> { %3080 = vmatprep.mubr.msk.f32.mxu0 %vm327_vm1, %v4225_v37 }
 0x102   : >> { %2969 = vmatmul.mubr.msk.f32.gmra.mrb[10].mxu1 %vm327_vm1, %v1172_v54 }
 0x103   : >> { %3081 = vmatmul.mubr.msk.f32.gmra.mrb[10].mxu0 %vm327_vm1, %v4700_v53  ;;  %2971 = vmatprep.mubr.msk.f32.mxu1 %vm327_vm1, %v1174_v10 }
 0x104   : >> { %3083 = vmatprep.mubr.msk.f32.mxu0 %vm327_vm1, %v4247_v44 }
 0x106   : >> { %2972 = vmatmul.mubr.msk.f32.gmra.mrb[12].mxu1 %vm327_vm1, %v1176_v56 }
 0x107   : >> { %3084 = vmatmul.mubr.msk.f32.gmra.mrb[12].mxu0 %vm327_vm1, %v4253_v9  ;;  %2974 = vmatprep.mubr.msk.f32.mxu1 %vm327_vm1, %v1178_v55 }
 0x108   : >> { %3086 = vmatprep.mubr.msk.f32.mxu0 %vm327_vm1, %v4257_v11 }
 0x10a   : >> { %2975 = vmatmul.mubr.msk.f32.gmra.mrb[14].mxu1 %vm327_vm1, %v4273_v50  ;;  %v4701_v50 = vld [vmem:[#allocation9_spill] sm:$0xff] }
 0x10b   : >> { %3087 = vmatmul.mubr.msk.f32.gmra.mrb[14].mxu0 %vm327_vm1, %v4276_v38 }
 0x1b1   : >> { %v2927_v40 = vpop.f32.mrb[0].mxu1 }
 0x1b2   : >> { %v1049_v37 = vpop.f32.mrb[1].mxu1 }
 0x1b5   : >> { %v2930_v52 = vpop.f32.mrb[2].mxu1 }
 0x1b6   : >> { %v1059_v44 = vpop.f32.mrb[3].mxu1 }
 0x1b9   : >> { %v2933_v2 = vpop.f32.mrb[4].mxu1 }
 0x1ba   : >> { %v1069_v0 = vpop.f32.mrb[5].mxu1 }
 0x1bd   : >> { %v2936_v27 = vpop.f32.mrb[6].mxu1 }
 0x1be   : >> { %v1079_v9 = vpop.f32.mrb[7].mxu1 }
 0x1c2   : >> { %v3067_v36 = vpop.f32.mrb[0].mxu0 }
 0x1c3   : >> { %v3127_v1 = vadd.f32 %v3067_v36, %v2927_v40  ;;  %v2199_v14 = vpop.f32.mrb[1].mxu0 }
 0x1c4   : >> { %v3128_v11 = vadd.f32 %v2199_v14, %v1049_v37 }
 0x1c5   : >> { %v2301_v38 = vadd.f32 %v3127_v1, %v4701_v50 }
 0x1c6   : >> { %v2300_v16 = vadd.f32 %v3128_v11, %v4701_v50  ;;  %v3070_v25 = vpop.f32.mrb[2].mxu0 }
 0x1c7   : >> { %2320 = vst.msk [vmem:[%s4513_s24 + $0x8] sm:$0xff] %vm2318_vm3, %v2301_v38  ;;  %v3129_v26 = vadd.f32 %v3070_v25, %v2930_v52  ;;  %v2209_v31 = vpop.f32.mrb[3].mxu0 }
 0x1c8   : >> { %2319 = vst.msk [vmem:[%s4513_s24] sm:$0xff] %vm2318_vm3, %v2300_v16  ;;  %v3130_v32 = vadd.f32 %v2209_v31, %v1059_v44 }
 0x1c9   : >> { %v2303_v33 = vadd.f32 %v3129_v26, %v4701_v50 }
 0x1ca   : >> { %v2302_v47 = vadd.f32 %v3130_v32, %v4701_v50  ;;  %v3073_v20 = vpop.f32.mrb[4].mxu0 }
 0x1cb   : >> { %2322 = vst.msk [vmem:[%s4513_s24 + $0x18] sm:$0xff] %vm2318_vm3, %v2303_v33  ;;  %v3131_v22 = vadd.f32 %v3073_v20, %v2933_v2  ;;  %v2219_v58 = vpop.f32.mrb[5].mxu0 }
 0x1cc   : >> { %2321 = vst.msk [vmem:[%s4513_s24 + $0x10] sm:$0xff] %vm2318_vm3, %v2302_v47  ;;  %v3132_v51 = vadd.f32 %v2219_v58, %v1069_v0 }
 0x1cd   : >> { %v2305_v48 = vadd.f32 %v3131_v22, %v4701_v50 }
 0x1ce   : >> { %v2304_v8 = vadd.f32 %v3132_v51, %v4701_v50  ;;  %v3076_v49 = vpop.f32.mrb[6].mxu0 }
 0x1cf   : >> { %2324 = vst.msk [vmem:[%s4513_s24 + $0x28] sm:$0xff] %vm2318_vm3, %v2305_v48  ;;  %v3133_v60 = vadd.f32 %v3076_v49, %v2936_v27  ;;  %v2229_v21 = vpop.f32.mrb[7].mxu0 }
 0x1d0   : >> { %2323 = vst.msk [vmem:[%s4513_s24 + $0x20] sm:$0xff] %vm2318_vm3, %v2304_v8  ;;  %v3134_v19 = vadd.f32 %v2229_v21, %v1079_v9 }
 0x1d1   : >> { %v2307_v23 = vadd.f32 %v3133_v60, %v4701_v50  ;;  %v2967_v3 = vpop.f32.mrb[8].mxu1 }
 0x1d2   : >> { %v2306_v34 = vadd.f32 %v3134_v19, %v4701_v50  ;;  %v3079_v61 = vpop.f32.mrb[8].mxu0  ;;  %v1319_v39 = vpop.f32.mrb[9].mxu1 }
 0x1d3   : >> { %2326 = vst.msk [vmem:[%s4513_s24 + $0x38] sm:$0xff] %vm2318_vm3, %v2307_v23  ;;  %v3135_v45 = vadd.f32 %v3079_v61, %v2967_v3  ;;  %v2239_v5 = vpop.f32.mrb[9].mxu0 }
 0x1d4   : >> { %2325 = vst.msk [vmem:[%s4513_s24 + $0x30] sm:$0xff] %vm2318_vm3, %v2306_v34  ;;  %v3136_v4 = vadd.f32 %v2239_v5, %v1319_v39 }
 0x1d5   : >> { %v2309_v29 = vadd.f32 %v3135_v45, %v4701_v50  ;;  %v2970_v13 = vpop.f32.mrb[10].mxu1 }
 0x1d6   : >> { %v2308_v30 = vadd.f32 %v3136_v4, %v4701_v50  ;;  %v3082_v62 = vpop.f32.mrb[10].mxu0  ;;  %v1329_v46 = vpop.f32.mrb[11].mxu1 }
 0x1d7   : >> { %2328 = vst.msk [vmem:[%s4513_s24 + $0x48] sm:$0xff] %vm2318_vm3, %v2309_v29  ;;  %v3137_v59 = vadd.f32 %v3082_v62, %v2970_v13  ;;  %v2249_v43 = vpop.f32.mrb[11].mxu0 }
 0x1d8   : >> { %2327 = vst.msk [vmem:[%s4513_s24 + $0x40] sm:$0xff] %vm2318_vm3, %v2308_v30  ;;  %v3138_v63 = vadd.f32 %v2249_v43, %v1329_v46 }
 0x1d9   : >> { %v2311_v7 = vadd.f32 %v3137_v59, %v4701_v50  ;;  %v2973_v57 = vpop.f32.mrb[12].mxu1 }
 0x1da   : >> { %v2310_v12 = vadd.f32 %v3138_v63, %v4701_v50  ;;  %v3085_v17 = vpop.f32.mrb[12].mxu0  ;;  %v1339_v18 = vpop.f32.mrb[13].mxu1 }
 0x1db   : >> { %2330 = vst.msk [vmem:[%s4513_s24 + $0x58] sm:$0xff] %vm2318_vm3, %v2311_v7  ;;  %v3139_v24 = vadd.f32 %v3085_v17, %v2973_v57  ;;  %v2259_v6 = vpop.f32.mrb[13].mxu0 }
 0x1dc   : >> { %2329 = vst.msk [vmem:[%s4513_s24 + $0x50] sm:$0xff] %vm2318_vm3, %v2310_v12  ;;  %v3140_v15 = vadd.f32 %v2259_v6, %v1339_v18 }
 0x1dd   : >> { %v2313_v28 = vadd.f32 %v3139_v24, %v4701_v50  ;;  %v2976_v41 = vpop.f32.mrb[14].mxu1 }
 0x1de   : >> { %v2312_v42 = vadd.f32 %v3140_v15, %v4701_v50  ;;  %v3088_v54 = vpop.f32.mrb[14].mxu0  ;;  %v1349_v35 = vpop.f32.mrb[15].mxu1  ;;  %249 = sbr.rel (!%p247_p4) target bundleno = 116 (0x74), region = 99 }
 0x1df   : >> { %2332 = vst.msk [vmem:[%s4513_s24 + $0x68] sm:$0xff] %vm2318_vm3, %v2313_v28  ;;  %v3141_v10 = vadd.f32 %v3088_v54, %v2976_v41  ;;  %v2269_v53 = vpop.f32.mrb[15].mxu0 }
 0x1e0   : >> { %2331 = vst.msk [vmem:[%s4513_s24 + $0x60] sm:$0xff] %vm2318_vm3, %v2312_v42  ;;  %v3142_v56 = vadd.f32 %v2269_v53, %v1349_v35 }
 0x1e1   : >> { %v2315_v55 = vadd.f32 %v3141_v10, %v4701_v50 }
 0x1e2   : >> { %v2314_v40 = vadd.f32 %v3142_v56, %v4701_v50 }
 0x1e3   : >> { %2334 = vst.msk [vmem:[%s4513_s24 + $0x78] sm:$0xff] %vm2318_vm3, %v2315_v55 }
 0x1e4   : >> { %2333 = vst.msk [vmem:[%s4513_s24 + $0x70] sm:$0xff] %vm2318_vm3, %v2314_v40 }
 0x1e5 PF: > { %s17_s19 = sadd.s32 1, %s3520_s19   ;;  %s4702_s30 = smov %s4711_s12 }
 0x1e6   : > { %p14_p5 = scmp.ge.s32.totalorder %s17_s19, 6   ;;  %s4703_s12 = smov %s3496_s13 }
 0x1e7   : > { %s4704_s13 = smov %s3500_s14  ;;  %s4705_s14 = smov %s3702_s9 }
 0x1e8   : > { %s4706_s15 = smov %s3512_s17  ;;  %s4707_s16 = smov %s3516_s18 }
 0x1e9   : > { %s4708_s17 = smov %s4702_s30  ;;  %s4709_s18 = smov %s4715_s20 }
 0x1ea   :  { %16 = sbr.rel (!%p14_p5) target bundleno = 6 (0x6), region = 110 }
 0x1f1   :  { %2367 = vsyncpa [#allocation3], 1 }
 0x1f2   :  { %2369 = vsyncpa [#allocation3 + $0x1], 1 }
 0x1f3   :  { %2370 = vsyncpa [#allocation5], 1 }

</bundles_post_ra>
